<compile_context>
chip_gen: v5e
topology: v5e:2x2
jax: 0.10.0
libtpu: 0.0.40
codegen_flags: <defaults>
</compile_context>

<pallas_src>
import jax
import jax.numpy as jnp
from jax import lax
from jax.experimental import pallas as pl
from jax.experimental.pallas import tpu as pltpu

# Model dims (args: filters_1=32, filters_2=32, filters_3=16, tensor_neurons=16)
N, L = 16, 8                    # nodes per graph, node-label features
F1, F2, F3 = 32, 32, 16
HFC = 16                        # fully_connected_first width
GB = 8                          # graphs per grid step -> M = GB*N = 128 MXU rows
M = GB * N

# Packed-weight slab layout: one (R_TOT, 128) f32 slab holds every weight/bias.
R_W1 = 0                        # [w1_l; w1_r]  (2L,  F1)
R_W2 = R_W1 + 2 * L             # [w2_l; w2_r]  (2F1, F2)
R_W3 = R_W2 + 2 * F1            # [w3_l; w3_r]  (2F2, F3)
R_WATT = R_W3 + 2 * F2          # attention weight    (F3,  F3)
R_WFC = R_WATT + F3             # fc weight           (F3,  HFC)
R_WSC = R_WFC + F3              # scoring weight      (HFC, 1) -- lanes 1..127 MUST stay zero
R_B1 = R_WSC + HFC              # bias rows (one row each)
R_B2 = R_B1 + 1
R_B3 = R_B2 + 1
R_BFC = R_B3 + 1
R_BSC = R_BFC + 1
R_TOT = ((R_BSC + 1 + 7) // 8) * 8   # pad rows to a sublane multiple (=200)


def funcgnn_kernel(a_ref, x_ref, w_ref, out_ref):
    a = a_ref[...]              # (M, M) block-diagonal mean-aggregation (GB graphs)
    h0 = x_ref[...]             # (M, L) node features, node-stacked over GB graphs

    def sage(h, f_in, r_w, f_out, r_b):
        # SAGEConv: lin_l(mean_aggr(x_j)) + lin_r(x_i), then L2 row-normalize.
        agg = jnp.dot(a, h, preferred_element_type=jnp.float32)          # (M, f_in)
        wl = w_ref[r_w:r_w + f_in, 0:f_out]
        wr = w_ref[r_w + f_in:r_w + 2 * f_in, 0:f_out]
        b = w_ref[r_b:r_b + 1, 0:f_out]
        out = (jnp.dot(agg, wl, preferred_element_type=jnp.float32)
               + jnp.dot(h, wr, preferred_element_type=jnp.float32) + b)  # (M, f_out)
        # torch.nn.functional.normalize(p=2, dim=-1): x / max(||x||, 1e-12)
        ss = jnp.sum(out * out, axis=-1, keepdims=True)
        return out * lax.rsqrt(jnp.maximum(ss, 1e-24))

    h = jnp.maximum(sage(h0, L, R_W1, F1, R_B1), 0.0)
    # TODO(synk): dropout(p=args.dropout) is a no-op at inference (training=False)
    h = jnp.maximum(sage(h, F1, R_W2, F2, R_B2), 0.0)
    h = sage(h, F2, R_W3, F3, R_B3)                                       # (M, F3)

    # Per-graph (grouped) reductions expressed as tiny 0/1 matmuls, all 2-D.
    row = lax.broadcasted_iota(jnp.int32, (GB, M), 0)
    col = lax.broadcasted_iota(jnp.int32, (GB, M), 1)
    grp = ((col >= row * N) & (col < (row + 1) * N)).astype(jnp.float32)   # (GB, M)
    rowt = lax.broadcasted_iota(jnp.int32, (M, GB), 0)
    colt = lax.broadcasted_iota(jnp.int32, (M, GB), 1)
    grp_t = ((rowt >= colt * N) & (rowt < (colt + 1) * N)).astype(jnp.float32)  # (M, GB)

    # AttentionModule (SimGNN-style): mean(h @ W) == mean(h) @ W.
    watt = w_ref[R_WATT:R_WATT + F3, 0:F3]
    g_mean = jnp.dot(grp, h, preferred_element_type=jnp.float32) * (1.0 / N)    # (GB, F3)
    tg = jnp.tanh(jnp.dot(g_mean, watt, preferred_element_type=jnp.float32))    # (GB, F3)
    tg_nodes = jnp.dot(grp_t, tg, preferred_element_type=jnp.float32)           # (M, F3)
    att = jax.nn.sigmoid(jnp.sum(h * tg_nodes, axis=-1, keepdims=True))         # (M, 1)
    pooled = jnp.dot(grp, h * att, preferred_element_type=jnp.float32)          # (GB, F3)

    wfc = w_ref[R_WFC:R_WFC + F3, 0:HFC]
    bfc = w_ref[R_BFC:R_BFC + 1, 0:HFC]
    s = jnp.maximum(
        jnp.dot(pooled, wfc, preferred_element_type=jnp.float32) + bfc, 0.0)    # (GB, 16)

    # Lane-dense scoring: slab columns 1..127 of wsc/bsc are zero, so lanes
    # 1..127 of the result are sigmoid(0)=0.5 and get discarded by the wrapper.
    wsc = w_ref[R_WSC:R_WSC + HFC, :]                                           # (16, 128)
    bsc = w_ref[R_BSC:R_BSC + 1, :]                                             # (1, 128)
    out_ref[...] = jax.nn.sigmoid(
        jnp.dot(s, wsc, preferred_element_type=jnp.float32) + bsc)              # (GB, 128)


def pack_params(params):
    """Pack the 14 weight/bias arrays into one (R_TOT, 128) f32 VMEM slab."""
    (w1l, w1r, b1, w2l, w2r, b2, w3l, w3r, b3, watt, wfc, bfc, wsc, bsc) = params
    slab = jnp.zeros((R_TOT, 128), jnp.float32)

    def put(s, r, w):
        return s.at[r:r + w.shape[0], :w.shape[1]].set(w)

    slab = put(slab, R_W1, jnp.concatenate([w1l, w1r], axis=0))
    slab = put(slab, R_W2, jnp.concatenate([w2l, w2r], axis=0))
    slab = put(slab, R_W3, jnp.concatenate([w3l, w3r], axis=0))
    slab = put(slab, R_WATT, watt)
    slab = put(slab, R_WFC, wfc)
    slab = put(slab, R_WSC, wsc)
    slab = put(slab, R_B1, b1)
    slab = put(slab, R_B2, b2)
    slab = put(slab, R_B3, b3)
    slab = put(slab, R_BFC, bfc)
    slab = put(slab, R_BSC, bsc)
    return slab


def funcgnn_forward(a_mean, features, w_slab):
    """a_mean: (B,N,N) dense mean-aggregation, features: (B,N,L). Returns (B,) scores."""
    B = a_mean.shape[0]
    b_pad = ((B + GB - 1) // GB) * GB
    nb = b_pad // GB
    if b_pad != B:
        a_mean = jnp.concatenate(
            [a_mean, jnp.zeros((b_pad - B, N, N), a_mean.dtype)], axis=0)
        features = jnp.concatenate(
            [features, jnp.zeros((b_pad - B, N, L), features.dtype)], axis=0)

    # Host-side: pack GB graphs per step into a block-diagonal aggregation
    # matrix (M, M) and a node-stacked feature matrix (M, L).
    a_grp = a_mean.reshape(nb, GB, N, N)
    eye = jnp.eye(GB, dtype=a_mean.dtype)
    a_bd = jnp.einsum('bgij,gh->bgihj', a_grp, eye).reshape(nb * M, M)
    x_flat = features.reshape(b_pad * N, L)

    out = pl.pallas_call(
        funcgnn_kernel,
        out_shape=jax.ShapeDtypeStruct((b_pad, 128), jnp.float32),
        grid=(nb,),
        in_specs=[
            pl.BlockSpec((M, M), lambda b: (b, 0)),        # block-diag aggregation
            pl.BlockSpec((M, L), lambda b: (b, 0)),        # stacked node features
            pl.BlockSpec((R_TOT, 128), lambda b: (0, 0)),  # shared weight slab
        ],
        out_specs=pl.BlockSpec((GB, 128), lambda b: (b, 0)),
        compiler_params=pltpu.CompilerParams(
            dimension_semantics=("parallel",)),            # v7x: shard steps over both TCs
    )(a_bd, x_flat, w_slab)
    return out[:B, 0]


def reference_forward(a_mean, x, params):
    (w1l, w1r, b1, w2l, w2r, b2, w3l, w3r, b3, watt, wfc, bfc, wsc, bsc) = params

    def sage(h, wl, wr, b):
        out = (a_mean @ h) @ wl + h @ wr + b
        n = jnp.sqrt(jnp.sum(out * out, axis=-1, keepdims=True))
        return out / jnp.maximum(n, 1e-12)

    h = jnp.maximum(sage(x, w1l, w1r, b1), 0.0)
    h = jnp.maximum(sage(h, w2l, w2r, b2), 0.0)
    h = sage(h, w3l, w3r, b3)
    ctx = jnp.mean(h @ watt, axis=0, keepdims=True)
    tg = jnp.tanh(ctx)
    att = jax.nn.sigmoid(jnp.sum(h * tg, axis=-1, keepdims=True))
    pooled = jnp.sum(h * att, axis=0, keepdims=True)
    s = jnp.maximum(pooled @ wfc + bfc, 0.0)
    return jax.nn.sigmoid(s @ wsc + bsc)   # (1, 1)


if __name__ == "__main__":
    B = 16                       # 2 grid steps of GB=8 graphs each
    key = jax.random.PRNGKey(0)
    ks = jax.random.split(key, 16)

    # Batch of deterministic graphs: ring + a few random edges per graph,
    # converted to dense mean-aggregation matrices (replaces PyG scatter-mean).
    ring_src = jnp.arange(N, dtype=jnp.int32)
    ring_dst = (ring_src + 1) % N
    a_list, x_list = [], []
    for b in range(B):
        kb = jax.random.fold_in(key, b)
        k1, k2, k3 = jax.random.split(kb, 3)
        extra_src = jax.random.randint(k1, (8,), 0, N, dtype=jnp.int32)
        extra_dst = jax.random.randint(k2, (8,), 0, N, dtype=jnp.int32)
        src = jnp.concatenate([ring_src, ring_dst, extra_src])
        dst = jnp.concatenate([ring_dst, ring_src, extra_dst])
        adj = jnp.zeros((N, N), jnp.float32).at[dst, src].add(1.0)
        deg = jnp.sum(adj, axis=-1, keepdims=True)
        a_list.append(adj / jnp.maximum(deg, 1.0))
        x_list.append(jax.random.normal(k3, (N, L), jnp.float32))
    a_mean = jnp.stack(a_list)          # (B, N, N)
    features = jnp.stack(x_list)        # (B, N, L)

    def lin(k, fan_in, fan_out):
        return jax.random.normal(k, (fan_in, fan_out), jnp.float32) * (1.0 / jnp.sqrt(fan_in))

    params = (
        lin(ks[3], L, F1), lin(ks[4], L, F1), jnp.zeros((1, F1), jnp.float32),
        lin(ks[5], F1, F2), lin(ks[6], F1, F2), jnp.zeros((1, F2), jnp.float32),
        lin(ks[7], F2, F3), lin(ks[8], F2, F3), jnp.zeros((1, F3), jnp.float32),
        lin(ks[9], F3, F3),                                     # attention weight matrix
        lin(ks[10], F3, HFC), jax.random.normal(ks[11], (1, HFC), jnp.float32) * 0.01,
        lin(ks[12], HFC, 1), jax.random.normal(ks[13], (1, 1), jnp.float32) * 0.01,
    )
    w_slab = pack_params(params)

    out = funcgnn_forward(a_mean, features, w_slab)
    out = jax.block_until_ready(out)

    ref = jax.vmap(lambda a, f: reference_forward(a, f, params))(a_mean, features)[:, 0, 0]
    assert out.shape == (B,)
    assert jnp.allclose(out, ref, atol=2e-5, rtol=2e-5), (out, ref)
    print("KERNEL_OK")
</pallas_src>

<mosaic_0001>
module attributes {stable_mosaic.version = 11 : i64} {
  func.func @funcgnn_kernel(%arg0: i32, %arg1: memref<128x128xf32, #tpu.memory_space<vmem>>, %arg2: memref<128x8xf32, #tpu.memory_space<vmem>>, %arg3: memref<200x128xf32, #tpu.memory_space<vmem>>, %arg4: memref<8x128xf32, #tpu.memory_space<vmem>>) attributes {dimension_semantics = [#tpu.dimension_semantics<parallel>], iteration_bounds = array<i64: 2>, scalar_prefetch = 0 : i64, scratch_operands = 0 : i64, tpu.core_type = #tpu.core_type<tc>, window_params = [{transform_indices = @transform_0, window_bounds = array<i64: 128, 128>}, {transform_indices = @transform_1, window_bounds = array<i64: 128, 8>}, {pipeline_mode = #tpu.pipeline_mode<synchronous>, transform_indices = @transform_2, window_bounds = array<i64: 200, 128>}, {transform_indices = @transform_3, window_bounds = array<i64: 8, 128>}]} {
    %c0 = arith.constant 0 : index
    %c0_0 = arith.constant 0 : index
    %0 = vector.load %arg1[%c0, %c0_0] : memref<128x128xf32, #tpu.memory_space<vmem>>, vector<128x128xf32>
    %c0_1 = arith.constant 0 : index
    %c0_2 = arith.constant 0 : index
    %1 = vector.load %arg2[%c0_1, %c0_2] : memref<128x8xf32, #tpu.memory_space<vmem>>, vector<128x8xf32>
    %cst = arith.constant dense<0.000000e+00> : vector<128x8xf32>
    %2 = tpu.matmul %0, %1, %cst {dimension_numbers = #tpu.dot_dimension_numbers<[1], [0], [0], [1], [0, 0, 1, 1], [], []>} : vector<128x128xf32>, vector<128x8xf32>, vector<128x8xf32> -> vector<128x8xf32>
    %c0_3 = arith.constant 0 : index
    %c0_4 = arith.constant 0 : index
    %3 = vector.load %arg3[%c0_3, %c0_4] : memref<200x128xf32, #tpu.memory_space<vmem>>, vector<8x32xf32>
    %c8 = arith.constant 8 : index
    %c0_5 = arith.constant 0 : index
    %4 = vector.load %arg3[%c8, %c0_5] : memref<200x128xf32, #tpu.memory_space<vmem>>, vector<8x32xf32>
    %c192 = arith.constant 192 : index
    %c0_6 = arith.constant 0 : index
    %5 = vector.load %arg3[%c192, %c0_6] : memref<200x128xf32, #tpu.memory_space<vmem>>, vector<1x32xf32>
    %cst_7 = arith.constant dense<0.000000e+00> : vector<128x32xf32>
    %6 = tpu.matmul %2, %3, %cst_7 {dimension_numbers = #tpu.dot_dimension_numbers<[1], [0], [0], [1], [0, 0, 1, 1], [], []>} : vector<128x8xf32>, vector<8x32xf32>, vector<128x32xf32> -> vector<128x32xf32>
    %cst_8 = arith.constant dense<0.000000e+00> : vector<128x32xf32>
    %7 = tpu.matmul %1, %4, %cst_8 {dimension_numbers = #tpu.dot_dimension_numbers<[1], [0], [0], [1], [0, 0, 1, 1], [], []>} : vector<128x8xf32>, vector<8x32xf32>, vector<128x32xf32> -> vector<128x32xf32>
    %8 = arith.addf %6, %7 : vector<128x32xf32>
    %9 = vector.broadcast %5 : vector<1x32xf32> to vector<128x32xf32>
    %10 = arith.addf %8, %9 : vector<128x32xf32>
    %11 = arith.mulf %10, %10 : vector<128x32xf32>
    %cst_9 = arith.constant dense<0.000000e+00> : vector<128xf32>
    %12 = vector.multi_reduction <add>, %11, %cst_9 [1] : vector<128x32xf32> to vector<128xf32>
    %13 = vector.shape_cast %12 : vector<128xf32> to vector<128x1xf32>
    %cst_10 = arith.constant 1.000000e-24 : f32
    %14 = vector.broadcast %cst_10 : f32 to vector<128x1xf32>
    %15 = arith.maximumf %13, %14 : vector<128x1xf32>
    %16 = math.rsqrt %15 : vector<128x1xf32>
    %17 = vector.broadcast %16 : vector<128x1xf32> to vector<128x32xf32>
    %18 = arith.mulf %10, %17 : vector<128x32xf32>
    %cst_11 = arith.constant 0.000000e+00 : f32
    %19 = vector.broadcast %cst_11 : f32 to vector<128x32xf32>
    %20 = arith.maximumf %18, %19 : vector<128x32xf32>
    %cst_12 = arith.constant dense<0.000000e+00> : vector<128x32xf32>
    %21 = tpu.matmul %0, %20, %cst_12 {dimension_numbers = #tpu.dot_dimension_numbers<[1], [0], [0], [1], [0, 0, 1, 1], [], []>} : vector<128x128xf32>, vector<128x32xf32>, vector<128x32xf32> -> vector<128x32xf32>
    %c16 = arith.constant 16 : index
    %c0_13 = arith.constant 0 : index
    %22 = vector.load %arg3[%c16, %c0_13] : memref<200x128xf32, #tpu.memory_space<vmem>>, vector<32x32xf32>
    %c48 = arith.constant 48 : index
    %c0_14 = arith.constant 0 : index
    %23 = vector.load %arg3[%c48, %c0_14] : memref<200x128xf32, #tpu.memory_space<vmem>>, vector<32x32xf32>
    %c193 = arith.constant 193 : index
    %c0_15 = arith.constant 0 : index
    %24 = vector.load %arg3[%c193, %c0_15] : memref<200x128xf32, #tpu.memory_space<vmem>>, vector<1x32xf32>
    %cst_16 = arith.constant dense<0.000000e+00> : vector<128x32xf32>
    %25 = tpu.matmul %21, %22, %cst_16 {dimension_numbers = #tpu.dot_dimension_numbers<[1], [0], [0], [1], [0, 0, 1, 1], [], []>} : vector<128x32xf32>, vector<32x32xf32>, vector<128x32xf32> -> vector<128x32xf32>
    %cst_17 = arith.constant dense<0.000000e+00> : vector<128x32xf32>
    %26 = tpu.matmul %20, %23, %cst_17 {dimension_numbers = #tpu.dot_dimension_numbers<[1], [0], [0], [1], [0, 0, 1, 1], [], []>} : vector<128x32xf32>, vector<32x32xf32>, vector<128x32xf32> -> vector<128x32xf32>
    %27 = arith.addf %25, %26 : vector<128x32xf32>
    %28 = vector.broadcast %24 : vector<1x32xf32> to vector<128x32xf32>
    %29 = arith.addf %27, %28 : vector<128x32xf32>
    %30 = arith.mulf %29, %29 : vector<128x32xf32>
    %cst_18 = arith.constant dense<0.000000e+00> : vector<128xf32>
    %31 = vector.multi_reduction <add>, %30, %cst_18 [1] : vector<128x32xf32> to vector<128xf32>
    %32 = vector.shape_cast %31 : vector<128xf32> to vector<128x1xf32>
    %cst_19 = arith.constant 1.000000e-24 : f32
    %33 = vector.broadcast %cst_19 : f32 to vector<128x1xf32>
    %34 = arith.maximumf %32, %33 : vector<128x1xf32>
    %35 = math.rsqrt %34 : vector<128x1xf32>
    %36 = vector.broadcast %35 : vector<128x1xf32> to vector<128x32xf32>
    %37 = arith.mulf %29, %36 : vector<128x32xf32>
    %cst_20 = arith.constant 0.000000e+00 : f32
    %38 = vector.broadcast %cst_20 : f32 to vector<128x32xf32>
    %39 = arith.maximumf %37, %38 : vector<128x32xf32>
    %cst_21 = arith.constant dense<0.000000e+00> : vector<128x32xf32>
    %40 = tpu.matmul %0, %39, %cst_21 {dimension_numbers = #tpu.dot_dimension_numbers<[1], [0], [0], [1], [0, 0, 1, 1], [], []>} : vector<128x128xf32>, vector<128x32xf32>, vector<128x32xf32> -> vector<128x32xf32>
    %c80 = arith.constant 80 : index
    %c0_22 = arith.constant 0 : index
    %41 = vector.load %arg3[%c80, %c0_22] : memref<200x128xf32, #tpu.memory_space<vmem>>, vector<32x16xf32>
    %c112 = arith.constant 112 : index
    %c0_23 = arith.constant 0 : index
    %42 = vector.load %arg3[%c112, %c0_23] : memref<200x128xf32, #tpu.memory_space<vmem>>, vector<32x16xf32>
    %c194 = arith.constant 194 : index
    %c0_24 = arith.constant 0 : index
    %43 = vector.load %arg3[%c194, %c0_24] : memref<200x128xf32, #tpu.memory_space<vmem>>, vector<1x16xf32>
    %cst_25 = arith.constant dense<0.000000e+00> : vector<128x16xf32>
    %44 = tpu.matmul %40, %41, %cst_25 {dimension_numbers = #tpu.dot_dimension_numbers<[1], [0], [0], [1], [0, 0, 1, 1], [], []>} : vector<128x32xf32>, vector<32x16xf32>, vector<128x16xf32> -> vector<128x16xf32>
    %cst_26 = arith.constant dense<0.000000e+00> : vector<128x16xf32>
    %45 = tpu.matmul %39, %42, %cst_26 {dimension_numbers = #tpu.dot_dimension_numbers<[1], [0], [0], [1], [0, 0, 1, 1], [], []>} : vector<128x32xf32>, vector<32x16xf32>, vector<128x16xf32> -> vector<128x16xf32>
    %46 = arith.addf %44, %45 : vector<128x16xf32>
    %47 = vector.broadcast %43 : vector<1x16xf32> to vector<128x16xf32>
    %48 = arith.addf %46, %47 : vector<128x16xf32>
    %49 = arith.mulf %48, %48 : vector<128x16xf32>
    %cst_27 = arith.constant dense<0.000000e+00> : vector<128xf32>
    %50 = vector.multi_reduction <add>, %49, %cst_27 [1] : vector<128x16xf32> to vector<128xf32>
    %51 = vector.shape_cast %50 : vector<128xf32> to vector<128x1xf32>
    %cst_28 = arith.constant 1.000000e-24 : f32
    %52 = vector.broadcast %cst_28 : f32 to vector<128x1xf32>
    %53 = arith.maximumf %51, %52 : vector<128x1xf32>
    %54 = math.rsqrt %53 : vector<128x1xf32>
    %55 = vector.broadcast %54 : vector<128x1xf32> to vector<128x16xf32>
    %56 = arith.mulf %48, %55 : vector<128x16xf32>
    %57 = tpu.iota {dimensions = array<i32: 0>} : vector<8x128xi32>
    %58 = tpu.iota {dimensions = array<i32: 1>} : vector<8x128xi32>
    %c16_i32 = arith.constant 16 : i32
    %59 = vector.broadcast %c16_i32 : i32 to vector<8x128xi32>
    %60 = arith.muli %57, %59 : vector<8x128xi32>
    %61 = arith.cmpi sge, %58, %60 : vector<8x128xi32>
    %c1_i32 = arith.constant 1 : i32
    %62 = vector.broadcast %c1_i32 : i32 to vector<8x128xi32>
    %63 = arith.addi %57, %62 : vector<8x128xi32>
    %c16_i32_29 = arith.constant 16 : i32
    %64 = vector.broadcast %c16_i32_29 : i32 to vector<8x128xi32>
    %65 = arith.muli %63, %64 : vector<8x128xi32>
    %66 = arith.cmpi slt, %58, %65 : vector<8x128xi32>
    %67 = arith.andi %61, %66 : vector<8x128xi1>
    %68 = arith.extui %67 : vector<8x128xi1> to vector<8x128xi32>
    %69 = arith.sitofp %68 : vector<8x128xi32> to vector<8x128xf32>
    %70 = tpu.iota {dimensions = array<i32: 0>} : vector<128x8xi32>
    %71 = tpu.iota {dimensions = array<i32: 1>} : vector<128x8xi32>
    %c16_i32_30 = arith.constant 16 : i32
    %72 = vector.broadcast %c16_i32_30 : i32 to vector<128x8xi32>
    %73 = arith.muli %71, %72 : vector<128x8xi32>
    %74 = arith.cmpi sge, %70, %73 : vector<128x8xi32>
    %c1_i32_31 = arith.constant 1 : i32
    %75 = vector.broadcast %c1_i32_31 : i32 to vector<128x8xi32>
    %76 = arith.addi %71, %75 : vector<128x8xi32>
    %c16_i32_32 = arith.constant 16 : i32
    %77 = vector.broadcast %c16_i32_32 : i32 to vector<128x8xi32>
    %78 = arith.muli %76, %77 : vector<128x8xi32>
    %79 = arith.cmpi slt, %70, %78 : vector<128x8xi32>
    %80 = arith.andi %74, %79 : vector<128x8xi1>
    %81 = arith.extui %80 : vector<128x8xi1> to vector<128x8xi32>
    %82 = arith.sitofp %81 : vector<128x8xi32> to vector<128x8xf32>
    %c144 = arith.constant 144 : index
    %c0_33 = arith.constant 0 : index
    %83 = vector.load %arg3[%c144, %c0_33] : memref<200x128xf32, #tpu.memory_space<vmem>>, vector<16x16xf32>
    %cst_34 = arith.constant dense<0.000000e+00> : vector<8x16xf32>
    %84 = tpu.matmul %69, %56, %cst_34 {dimension_numbers = #tpu.dot_dimension_numbers<[1], [0], [0], [1], [0, 0, 1, 1], [], []>} : vector<8x128xf32>, vector<128x16xf32>, vector<8x16xf32> -> vector<8x16xf32>
    %cst_35 = arith.constant 6.250000e-02 : f32
    %85 = vector.broadcast %cst_35 : f32 to vector<8x16xf32>
    %86 = arith.mulf %84, %85 : vector<8x16xf32>
    %cst_36 = arith.constant dense<0.000000e+00> : vector<8x16xf32>
    %87 = tpu.matmul %86, %83, %cst_36 {dimension_numbers = #tpu.dot_dimension_numbers<[1], [0], [0], [1], [0, 0, 1, 1], [], []>} : vector<8x16xf32>, vector<16x16xf32>, vector<8x16xf32> -> vector<8x16xf32>
    %88 = math.tanh %87 : vector<8x16xf32>
    %cst_37 = arith.constant dense<0.000000e+00> : vector<128x16xf32>
    %89 = tpu.matmul %82, %88, %cst_37 {dimension_numbers = #tpu.dot_dimension_numbers<[1], [0], [0], [1], [0, 0, 1, 1], [], []>} : vector<128x8xf32>, vector<8x16xf32>, vector<128x16xf32> -> vector<128x16xf32>
    %90 = arith.mulf %56, %89 : vector<128x16xf32>
    %cst_38 = arith.constant dense<0.000000e+00> : vector<128xf32>
    %91 = vector.multi_reduction <add>, %90, %cst_38 [1] : vector<128x16xf32> to vector<128xf32>
    %92 = vector.shape_cast %91 : vector<128xf32> to vector<128x1xf32>
    %93 = arith.negf %92 : vector<128x1xf32>
    %94 = math.exp %93 : vector<128x1xf32>
    %cst_39 = arith.constant 1.000000e+00 : f32
    %95 = vector.broadcast %cst_39 : f32 to vector<128x1xf32>
    %96 = arith.addf %95, %94 : vector<128x1xf32>
    %97 = arith.divf %95, %96 : vector<128x1xf32>
    %98 = vector.broadcast %97 : vector<128x1xf32> to vector<128x16xf32>
    %99 = arith.mulf %56, %98 : vector<128x16xf32>
    %cst_40 = arith.constant dense<0.000000e+00> : vector<8x16xf32>
    %100 = tpu.matmul %69, %99, %cst_40 {dimension_numbers = #tpu.dot_dimension_numbers<[1], [0], [0], [1], [0, 0, 1, 1], [], []>} : vector<8x128xf32>, vector<128x16xf32>, vector<8x16xf32> -> vector<8x16xf32>
    %c160 = arith.constant 160 : index
    %c0_41 = arith.constant 0 : index
    %101 = vector.load %arg3[%c160, %c0_41] : memref<200x128xf32, #tpu.memory_space<vmem>>, vector<16x16xf32>
    %c195 = arith.constant 195 : index
    %c0_42 = arith.constant 0 : index
    %102 = vector.load %arg3[%c195, %c0_42] : memref<200x128xf32, #tpu.memory_space<vmem>>, vector<1x16xf32>
    %cst_43 = arith.constant dense<0.000000e+00> : vector<8x16xf32>
    %103 = tpu.matmul %100, %101, %cst_43 {dimension_numbers = #tpu.dot_dimension_numbers<[1], [0], [0], [1], [0, 0, 1, 1], [], []>} : vector<8x16xf32>, vector<16x16xf32>, vector<8x16xf32> -> vector<8x16xf32>
    %104 = vector.broadcast %102 : vector<1x16xf32> to vector<8x16xf32>
    %105 = arith.addf %103, %104 : vector<8x16xf32>
    %cst_44 = arith.constant 0.000000e+00 : f32
    %106 = vector.broadcast %cst_44 : f32 to vector<8x16xf32>
    %107 = arith.maximumf %105, %106 : vector<8x16xf32>
    %c176 = arith.constant 176 : index
    %c0_45 = arith.constant 0 : index
    %108 = vector.load %arg3[%c176, %c0_45] : memref<200x128xf32, #tpu.memory_space<vmem>>, vector<16x128xf32>
    %c196 = arith.constant 196 : index
    %c0_46 = arith.constant 0 : index
    %109 = vector.load %arg3[%c196, %c0_46] : memref<200x128xf32, #tpu.memory_space<vmem>>, vector<1x128xf32>
    %cst_47 = arith.constant dense<0.000000e+00> : vector<8x128xf32>
    %110 = tpu.matmul %107, %108, %cst_47 {dimension_numbers = #tpu.dot_dimension_numbers<[1], [0], [0], [1], [0, 0, 1, 1], [], []>} : vector<8x16xf32>, vector<16x128xf32>, vector<8x128xf32> -> vector<8x128xf32>
    %111 = vector.broadcast %109 : vector<1x128xf32> to vector<8x128xf32>
    %112 = arith.addf %110, %111 : vector<8x128xf32>
    %113 = arith.negf %112 : vector<8x128xf32>
    %114 = math.exp %113 : vector<8x128xf32>
    %cst_48 = arith.constant 1.000000e+00 : f32
    %115 = vector.broadcast %cst_48 : f32 to vector<8x128xf32>
    %116 = arith.addf %115, %114 : vector<8x128xf32>
    %117 = arith.divf %115, %116 : vector<8x128xf32>
    %c0_49 = arith.constant 0 : index
    %c0_50 = arith.constant 0 : index
    %118 = vector.load %arg4[%c0_49, %c0_50] : memref<8x128xf32, #tpu.memory_space<vmem>>, vector<8x128xf32>
    tpu.vector_store %arg4[%c0_49, %c0_50], %117 {strides = array<i32>} : memref<8x128xf32, #tpu.memory_space<vmem>>, vector<8x128xf32>,
    return
  }
  func.func @transform_0(%arg0: i32) -> (i32, i32) {
    %c0_i32 = arith.constant 0 : i32
    %c0_i32_0 = arith.constant 0 : i32
    return %arg0, %c0_i32 : i32, i32
  }
  func.func @transform_1(%arg0: i32) -> (i32, i32) {
    %c0_i32 = arith.constant 0 : i32
    %c0_i32_0 = arith.constant 0 : i32
    return %arg0, %c0_i32 : i32, i32
  }
  func.func @transform_2(%arg0: i32) -> (i32, i32) {
    %c0_i32 = arith.constant 0 : i32
    %c0_i32_0 = arith.constant 0 : i32
    %c0_i32_1 = arith.constant 0 : i32
    return %c0_i32, %c0_i32_0 : i32, i32
  }
  func.func @transform_3(%arg0: i32) -> (i32, i32) {
    %c0_i32 = arith.constant 0 : i32
    %c0_i32_0 = arith.constant 0 : i32
    return %arg0, %c0_i32 : i32, i32
  }
}

</mosaic_0001>

<bundles_post_ra>
// kernel: tpu_custom_call.1
= control target key start
LH: loop header
LB: loop body
LE: loop exit
PB: predicated region body
PF: predicated region fallthrough
CT: control target
= control target key end

     0   :  { %8 = vsyncpa [#allocation3], 0  ;;  %s5709_s0 = inlined_call_operand.vmem [shape: f32[256,128], index: 0, kind: input, shape index: {}]   ;;  %s5710_s1 = inlined_call_operand.vmem [shape: f32[256,8], index: 1, kind: input, shape index: {}]   ;;  %s5711_s2 = inlined_call_operand.hbm [shape: f32[200,128], index: 2, kind: input, shape index: {}]   ;;  %s5712_s3 = inlined_call_operand.hbm [shape: f32[16,128], index: 3, kind: output, shape index: {}]  }
   0x1   :  { %9 = vsyncpa [#allocation4], 0 }
   0x2   :  { %11 = vsyncpa [#allocation4 + $0x1], 0  ;;  %s3370_s12 = smov 0   ;;  %s3372_s13 = smov 0  }
   0x3   :  { %s3374_s14 = smov 0   ;;  %s3376_s15 = smov 0  }
   0x4 LB: > { %s3391_s16 = sadd.s32 4294967295, %s3343_s15   ;;  %s2838_s17 = sadd.s32 4294967294, %s3343_s15   ;;  %s3343_s15 = sphi %s3376_s15, %s5850_s15   ;;  %s3339_s14 = sphi %s3374_s14, %s5849_s14   ;;  %s3335_s13 = sphi %s3372_s13, %s5848_s13   ;;  %s3331_s12 = sphi %s3370_s12, %s5847_s12  }
   0x5   : > { %s3395_s18 = sadd.s32 1, %s3343_s15   ;;  %s97_s19 = sadd.s32 1, %s3339_s14 }
   0x6   : > { %s94_s20 = ssub.s32 %s3343_s15, %s3395_s18  ;;  %p107_p0 = scmp.ne.s32.totalorder %s3339_s14, %s3335_s13 }
   0x7   : > { %p95_p1 = scmp.eq.s32.totalorder %s94_s20, 0  ;;  %p108_p2 = scmp.eq.s32.totalorder %s3391_s16, 1 }
   0x8   : > { %p113_p3 = scmp.ne.s32.totalorder %s3335_s13, %s3331_s12  ;;  %p114_p4 = scmp.eq.s32.totalorder %s2838_s17, 1 }
   0x9   : > { %s3406_s21 = scalar_select %p95_p1, %s3339_s14, %s97_s19  }
   0xa   : > { %p3408_p5 = por %p108_p2, %p107_p0  ;;  %p3412_p6 = por %p114_p4, %p113_p3 }
   0xb   : > { %p2839_p7 = scmp.ge.s32.totalorder %s3343_s15, 1  ;;  %p121_p8 = scmp.lt.s32.totalorder %s3343_s15, 3 }
   0xc   : > { %p3020_p9 = scmp.eq.s32.totalorder %s3391_s16, 0  ;;  %s132_s26 = sshll.u32 %s5711_s2, 4  ;;  %s133_s26 = int_to_ptr.hbm [resolvable:$true] %s132_s26 }
   0xd   : > { %p122_p10 = pnand %p2839_p7, %p121_p8  ;;  %s3345_s27 = smov [#allocation2]  }
   0xe   : > { %s134_s28 = sshll.u32 %s3345_s27, 4  ;;  %s3346_s29 = smov 128   ;;  %s135_s28 = int_to_ptr.vmem [resolvable:$true] %s134_s28 }
   0xf   : > { %p3012_p11 = pneg %p122_p10  ;;  %s3347_s30 = smov 8  }
  0x10   : > { %168 = sbr.rel (%p122_p10) target bundleno = 2865 (0xb31), region = 32 }
  0x11   : > { %p3013_p12 = pnand %p3020_p9, %p3012_p11 }
  0x13   : > { %3015 = dma.hbm_to_vmem [thread:$0]  (!%p3013_p12), %s133_s26, 3200, %s135_s28, [#allocation3], %s3346_s29, %s3346_s29, %s3347_s30  }
  0x15   : > { %3322 = dma.done.wait (%p3020_p9), [#allocation3], 3200  }
  0x16   : > { %3324 = vsyncadd (%p3020_p9), [#allocation3], 4294964096  ;;  %s2845_s4 = sshll.u32 %s3391_s16, 4  ;;  %v307_v28 = vld [vmem:[#allocation2] sm:$0xff]  ;;  %v308_v30 = vld [vmem:[#allocation2 + $0x8] sm:$0xff]  ;;  %vm310_vm0 = vcmask 64512  }
  0x17   : > { %p199_p13 = scmp.lt.s32.totalorder %s2845_s4, 31  ;;  %487 = vmatpush.msra.mxu2 %v307_v28  ;;  %3005 = vmatpush.msra.mxu3 %v307_v28  ;;  %vm570_vm1 = vcmask 261120   ;;  %s195_s17 = sand.u32 1, %s3335_s13  }
  0x18   : > { %3004 = vmatpush.msra.mxu1 %v308_v30  ;;  %s2844_s19 = sshll.u32 %s195_s17, 3  ;;  %s3001_s20 = sshll.u32 %s3391_s16, 3 }
  0x19   : > { %s5852_s4 = smov (!%p199_p13, %s2845_s4), 31  ;;  %s2750_s26 = scalar_lea.hbm %s5712_s3, %s3001_s20 }
  0x1a   : > { %s2846_s5 = sshll.u32 %s5852_s4, 3  ;;  %s197_s27 = scalar_lea.vmem [#allocation5], %s2844_s19 }
  0x1b   : > { %s3437_s8 = scalar_lea.vmem %s5710_s1, %s2846_s5  ;;  %s3486_s11 = scalar_lea.vmem %s5709_s0, %s2846_s5 }
  0x1c   : > { %v3440_v0 = vld [vmem:[%s3437_s8 + $0x78] sm:$0xff]  ;;  %v3443_v1 = vld [vmem:[%s3437_s8 + $0x70] sm:$0xff]  ;;  %v3447_v2 = vld [vmem:[%s3437_s8 + $0x68] sm:$0xff]  ;;  %s2752_s28 = sshll.u32 %s197_s27, 4  ;;  %s2754_s29 = sshll.u32 %s2750_s26, 4  ;;  %s2753_s28 = int_to_ptr.vmem [resolvable:$true] %s2752_s28  ;;  %s2755_s29 = int_to_ptr.hbm [resolvable:$true] %s2754_s29 }
  0x1d   : > { %242 = vmatpush.msra.mxu0 %v3440_v0  ;;  %v3451_v3 = vld [vmem:[%s3437_s8 + $0x60] sm:$0xff]  ;;  %v3455_v4 = vld [vmem:[%s3437_s8 + $0x58] sm:$0xff]  ;;  %v3459_v5 = vld [vmem:[%s3437_s8 + $0x50] sm:$0xff]  ;;  %s2740_s16 = scalar_lea.sflag [#allocation4], %s195_s17  ;;  %s3291_s30 = sshra.s32 %s2755_s29, 4  ;;  %s3292_s30 = int_to_ptr.hbm [resolvable:$true] %s3291_s30 }
  0x1e   : > { %v3463_v6 = vld [vmem:[%s3437_s8 + $0x48] sm:$0xff]  ;;  %v234_v7 = vld [vmem:[%s3437_s8 + $0x40] sm:$0xff]  ;;  %v233_v8 = vld [vmem:[%s3437_s8 + $0x38] sm:$0xff]  ;;  %s3293_s4 = scalar_lea.hbm %s3292_s30, 8  ;;  %s3297_s7 = scalar_lea.hbm %s5712_s3, 16 }
  0x1f   : > { %243 = vmatpush.msra.mxu0 %v3443_v1  ;;  %v232_v9 = vld [vmem:[%s3437_s8 + $0x30] sm:$0xff]  ;;  %v231_v10 = vld [vmem:[%s3437_s8 + $0x28] sm:$0xff]  ;;  %v3472_v11 = vld [vmem:[%s3437_s8 + $0x20] sm:$0xff]  ;;  %p3294_p0 = scmp.ne.s32.totalorder %s3292_s30, %s3293_s4  ;;  %p3298_p3 = scmp.lt.s32.totalorder %s3292_s30, %s5712_s3 }
  0x20   : > { %v3475_v12 = vld [vmem:[%s3437_s8 + $0x18] sm:$0xff]  ;;  %v228_v13 = vld [vmem:[%s3437_s8 + $0x10] sm:$0xff]  ;;  %v227_v14 = vld [vmem:[%s3437_s8 + $0x8] sm:$0xff]  ;;  %2854 = vmatmul.msk.f32.vlgmr.msra.gmra.mxu1 %vm310_vm0, %v231_v10  ;;  %p3299_p4 = scmp.lt.s32.totalorder %s3297_s7, %s3293_s4 }
  0x21   : > { %244 = vmatpush.msra.mxu0 %v3447_v2  ;;  %v226_v15 = vld [vmem:[%s3437_s8] sm:$0xff]  ;;  %v3494_v17 = vld [vmem:[%s3486_s11 + $0x8] sm:$0xff]  ;;  %v3498_v18 = vld [vmem:[%s3486_s11 + $0x10] sm:$0xff]  ;;  %p3295_p1 = pnand %p3294_p0, %p3408_p5 }
  0x22   : > { %v3490_v16 = vld [vmem:[%s3486_s11] sm:$0xff]  ;;  %v3502_v19 = vld [vmem:[%s3486_s11 + $0x18] sm:$0xff]  ;;  %v3510_v21 = vld [vmem:[%s3486_s11 + $0x28] sm:$0xff]  ;;  %p3300_p7 = por %p3299_p4, %p3298_p3 }
  0x23   : > { %245 = vmatpush.msra.mxu0 %v3451_v3  ;;  %v3506_v20 = vld [vmem:[%s3486_s11 + $0x20] sm:$0xff]  ;;  %v3514_v22 = vld [vmem:[%s3486_s11 + $0x30] sm:$0xff]  ;;  %v3518_v23 = vld [vmem:[%s3486_s11 + $0x38] sm:$0xff]  ;;  %p3296_p2 = pneg %p3295_p1 }
  0x24   : > { %v3522_v24 = vld [vmem:[%s3486_s11 + $0x40] sm:$0xff]  ;;  %v3526_v25 = vld [vmem:[%s3486_s11 + $0x48] sm:$0xff]  ;;  %v3530_v26 = vld [vmem:[%s3486_s11 + $0x50] sm:$0xff] }
  0x25   : > { %246 = vmatpush.msra.mxu0 %v3455_v4  ;;  %5721 = vst [vmem:[#allocation8_spill] sm:$0xff] %v3530_v26  ;;  %v3534_v27 = vld [vmem:[%s3486_s11 + $0x58] sm:$0xff]  ;;  %v3538_v29 = vld [vmem:[%s3486_s11 + $0x60] sm:$0xff]  ;;  %v3543_v31 = vld [vmem:[%s3486_s11 + $0x68] sm:$0xff]  ;;  %p3301_p8 = pnand %p3300_p7, %p3296_p2 }
  0x26   : > { %5722 = vst [vmem:[#allocation9_spill] sm:$0xff] %v3534_v27  ;;  %v3548_v32 = vld [vmem:[%s3486_s11 + $0x70] sm:$0xff]  ;;  %v3553_v33 = vld [vmem:[%s3486_s11 + $0x78] sm:$0xff] }
  0x27   : > { %247 = vmatpush.msra.mxu0 %v3459_v5  ;;  %5723 = vst [vmem:[#allocation10_spill] sm:$0xff] %v3538_v29 }
  0x28   : > { %5724 = vst [vmem:[#allocation11_spill] sm:$0xff] %v3543_v31  ;;  %2855 = vmatmul.msk.f32.gmra.mxu1 %vm310_vm0, %v232_v9 }
  0x29   : > { %248 = vmatpush.msra.mxu0 %v3463_v6  ;;  %5725 = vst [vmem:[#allocation12_spill] sm:$0xff] %v3548_v32 }
  0x2a   : > { %5726 = vst [vmem:[#allocation13_spill] sm:$0xff] %v3553_v33 }
  0x2b   : > { %249 = vmatpush.msra.mxu0 %v234_v7 }
  0x2d   : > { %250 = vmatpush.msra.mxu0 %v233_v8 }
  0x2f   : > { %251 = vmatpush.msra.mxu0 %v232_v9 }
  0x30   : > { %2856 = vmatmul.msk.f32.gmra.mxu1 %vm310_vm0, %v233_v8 }
  0x31   : > { %252 = vmatpush.msra.mxu0 %v231_v10 }
  0x33   : > { %253 = vmatpush.msra.mxu0 %v3472_v11 }
  0x35   : > { %254 = vmatpush.msra.mxu0 %v3475_v12 }
  0x37   : > { %255 = vmatpush.msra.mxu0 %v228_v13 }
  0x38   : > { %2857 = vmatmul.msk.f32.gmra.mxu1 %vm310_vm0, %v234_v7 }
  0x39   : > { %256 = vmatpush.msra.mxu0 %v227_v14 }
  0x3b   : > { %257 = vmatpush.msra.mxu0 %v226_v15 }
  0x3c   : > { %258 = vmatmul.f32.vlgmr.msra.gmra.mxu0 %v3490_v16 }
  0x3d   : > { %374 = vmatpush.msrb.mxu0 %v308_v30 }
  0x40   : > { %2858 = vmatmul.msk.f32.gmra.mxu1 %vm310_vm0, %v3463_v6 }
  0x44   : > { %261 = vmatmul.f32.gmra.mxu0 %v3494_v17 }
  0x48   : > { %2859 = vmatmul.msk.f32.gmra.mxu1 %vm310_vm0, %v3459_v5  ;;  %v3614_v5 = vld [vmem:[#allocation2 + $0xc0] ss:$0 sm:$0xff] }
  0x4c   : > { %264 = vmatmul.f32.gmra.mxu0 %v3498_v18 }
  0x50   : > { %2860 = vmatmul.msk.f32.gmra.mxu1 %vm310_vm0, %v3455_v4 }
  0x54   : > { %267 = vmatmul.f32.gmra.mxu0 %v3502_v19 }
  0x58   : > { %2861 = vmatmul.msk.f32.gmra.mxu1 %vm310_vm0, %v3451_v3 }
  0x5c   : > { %270 = vmatmul.f32.gmra.mxu0 %v3506_v20 }
  0x60   : > { %2862 = vmatmul.msk.f32.gmra.mxu1 %vm310_vm0, %v3447_v2 }
  0x64   : > { %273 = vmatmul.f32.gmra.mxu0 %v3510_v21 }
  0x68   : > { %2863 = vmatmul.msk.f32.gmra.mxu1 %vm310_vm0, %v3443_v1 }
  0x6c   : > { %276 = vmatmul.f32.gmra.mxu0 %v3514_v22 }
  0x70   : > { %2864 = vmatmul.msk.f32.gmra.mxu1 %vm310_vm0, %v3440_v0 }
  0x74   : > { %279 = vmatmul.f32.gmra.mxu0 %v3518_v23 }
  0x7c   : > { %282 = vmatmul.f32.gmra.mxu0 %v3522_v24 }
  0x84   : > { %285 = vmatmul.f32.gmra.mxu0 %v3526_v25 }
  0x8c   : > { %288 = vmatmul.f32.gmra.mxu0 %v3530_v26 }
  0x94   : > { %291 = vmatmul.f32.gmra.mxu0 %v3534_v27 }
  0x9c   : > { %294 = vmatmul.f32.gmra.mxu0 %v3538_v29 }
  0x9d   : > { %v3596_v51 = vpop.f32.mrf.mxu1 }
  0xa4   : > { %297 = vmatmul.f32.gmra.mxu0 %v3543_v31 }
  0xa5   : > { %v3598_v53 = vpop.f32.mrf.mxu1 }
  0xac   : > { %300 = vmatmul.f32.gmra.mxu0 %v3548_v32 }
  0xad   : > { %v397_v55 = vpop.f32.mrf.mxu1 }
  0xb4   : > { %303 = vmatmul.f32.gmra.mxu0 %v3553_v33 }
  0xb5   : > { %v400_v57 = vpop.f32.mrf.mxu1 }
  0xb9   : > { %v259_v34 = vpop.f32.mrf.mxu0 }
  0xba   : > { %2865 = vmatmul.msk.f32.vlgmr.msra.gmra.mxu2 %vm310_vm0, %v259_v34 }
  0xbc   : > { %2849 = vmatmul.msk.f32.vlgmr.msrb.gmra.mxu0 %vm310_vm0, %v226_v15 }
  0xbd   : > { %v3606_v60 = vpop.f32.mrf.mxu1 }
  0xc1   : > { %v262_v35 = vpop.f32.mrf.mxu0 }
  0xc2   : > { %2866 = vmatmul.msk.f32.gmra.mxu2 %vm310_vm0, %v262_v35 }
  0xc4   : > { %2850 = vmatmul.msk.f32.gmra.mxu0 %vm310_vm0, %v227_v14 }
  0xc5   : > { %v406_v63 = vpop.f32.mrf.mxu1 }
  0xc9   : > { %v265_v36 = vpop.f32.mrf.mxu0 }
  0xca   : > { %2867 = vmatmul.msk.f32.gmra.mxu2 %vm310_vm0, %v265_v36 }
  0xcc   : > { %2851 = vmatmul.msk.f32.gmra.mxu0 %vm310_vm0, %v228_v13 }
  0xcd   : > { %v409_v3 = vpop.f32.mrf.mxu1 }
  0xd1   : > { %v268_v37 = vpop.f32.mrf.mxu0 }
  0xd2   : > { %2868 = vmatmul.msk.f32.gmra.mxu2 %vm310_vm0, %v268_v37 }
  0xd4   : > { %2852 = vmatmul.msk.f32.gmra.mxu0 %vm310_vm0, %v3475_v12 }
  0xd5   : > { %v412_v13 = vpop.f32.mrf.mxu1 }
  0xd9   : > { %v271_v38 = vpop.f32.mrf.mxu0 }
  0xda   : > { %2869 = vmatmul.msk.f32.gmra.mxu2 %vm310_vm0, %v271_v38 }
  0xdc   : > { %2853 = vmatmul.msk.f32.gmra.mxu0 %vm310_vm0, %v3472_v11 }
  0xe1   : > { %v274_v39 = vpop.f32.mrf.mxu0 }
  0xe2   : > { %2870 = vmatmul.msk.f32.gmra.mxu2 %vm310_vm0, %v274_v39  ;;  %v415_v39 = vpop.f32.mrf.mxu1 }
  0xe9   : > { %v277_v40 = vpop.f32.mrf.mxu0 }
  0xea   : > { %2871 = vmatmul.msk.f32.gmra.mxu2 %vm310_vm0, %v277_v40 }
  0xf1   : > { %v280_v41 = vpop.f32.mrf.mxu0 }
  0xf2   : > { %2872 = vmatmul.msk.f32.gmra.mxu2 %vm310_vm0, %v280_v41 }
  0xf9   : > { %v283_v42 = vpop.f32.mrf.mxu0 }
  0xfa   : > { %2873 = vmatmul.msk.f32.gmra.mxu2 %vm310_vm0, %v283_v42 }
 0x101   : > { %v286_v43 = vpop.f32.mrf.mxu0 }
 0x102   : > { %2874 = vmatmul.msk.f32.vlgmr.msra.gmra.mxu3 %vm310_vm0, %v286_v43 }
 0x109   : > { %v289_v44 = vpop.f32.mrf.mxu0 }
 0x10a   : > { %2875 = vmatmul.msk.f32.gmra.mxu3 %vm310_vm0, %v289_v44 }
 0x111   : > { %v292_v45 = vpop.f32.mrf.mxu0 }
 0x112   : > { %2876 = vmatmul.msk.f32.gmra.mxu3 %vm310_vm0, %v292_v45 }
 0x119   : > { %v295_v46 = vpop.f32.mrf.mxu0 }
 0x11a   : > { %2877 = vmatmul.msk.f32.gmra.mxu3 %vm310_vm0, %v295_v46 }
 0x121   : > { %v298_v47 = vpop.f32.mrf.mxu0 }
 0x122   : > { %2878 = vmatmul.msk.f32.gmra.mxu3 %vm310_vm0, %v298_v47 }
 0x129   : > { %v301_v48 = vpop.f32.mrf.mxu0 }
 0x12a   : > { %2879 = vmatmul.msk.f32.gmra.mxu3 %vm310_vm0, %v301_v48 }
 0x131   : > { %v304_v49 = vpop.f32.mrf.mxu0 }
 0x132   : > { %2880 = vmatmul.msk.f32.gmra.mxu3 %vm310_vm0, %v304_v49 }
 0x139   : > { %v3604_v58 = vpop.f32.mrf.mxu0 }
 0x13d   : > { %v3594_v50 = vpop.f32.mrf.mxu2 }
 0x141   : > { %v379_v61 = vpop.f32.mrf.mxu0 }
 0x145   : > { %v492_v52 = vpop.f32.mrf.mxu2 }
 0x149   : > { %v3610_v1 = vpop.f32.mrf.mxu0 }
 0x14d   : > { %v3600_v54 = vpop.f32.mrf.mxu2 }
 0x151   : > { %v3621_v9 = vpop.f32.mrf.mxu0 }
 0x155   : > { %v3602_v56 = vpop.f32.mrf.mxu2 }
 0x159   : > { %v388_v36 = vpop.f32.mrf.mxu0 }
 0x15d   : > { %v501_v59 = vpop.f32.mrf.mxu2 }
 0x15e   : > { %v502_v40 = vadd.f32 %v501_v59, %v388_v36 }
 0x160   : > { %v3641_v44 = vadd.f32 %v3614_v5, %v502_v40  ;;  %v496_v40 = vadd.f32 %v3600_v54, %v3610_v1 }
 0x165   : > { %v504_v62 = vpop.f32.mrf.mxu2 }
 0x16d   : > { %v3612_v2 = vpop.f32.mrf.mxu2 }
 0x175   : > { %v510_v10 = vpop.f32.mrf.mxu2 }
 0x176   : > { %v511_v15 = vadd.f32 %v510_v10, %v397_v55 }
 0x178   : > { %v3630_v34 = vadd.f32 %v3614_v5, %v511_v15 }
 0x17a   : > { %v561_v41 = vmul.f32 %v3630_v34, %v3630_v34 }
 0x17c   : > { %v592_v45 = vsel %vm570_vm1, %v561_v41, 0.0 }
 0x17d   : > { %v513_v47 = vpop.f32.mrf.mxu2 }
 0x17e   : > { %v514_v55 = vadd.f32 %v513_v47, %v400_v57  ;;  %v3688_v47 = vadd.f32 %v3614_v5, %v496_v40 }
 0x185   : > { %v3608_v0 = vpop.f32.mrf.mxu3 }
 0x186   : > { %v517_v41 = vadd.f32 %v3608_v0, %v3606_v60  ;;  %v508_v60 = vadd.f32 %v3612_v2, %v3598_v53 }
 0x18d   : > { %v519_v4 = vpop.f32.mrf.mxu3 }
 0x18e   : > { %v520_v6 = vadd.f32 %v519_v4, %v406_v63  ;;  %v558_v63 = vmul.f32 %v3641_v44, %v3641_v44  ;;  %v418_v4 = vpop.f32.mrf.mxu1 }
 0x190   : > { %v3617_v7 = vadd.f32 %v3614_v5, %v520_v6 }
 0x192   : > { %v564_v8 = vmul.f32 %v3617_v7, %v3617_v7 }
 0x194   : > { %v601_v11 = vsel %vm570_vm1, %v564_v8, 0.0  ;;  %v3653_v8 = vadd.f32 %v3614_v5, %v514_v55  ;;  %v3702_v55 = vadd.f32 %v3614_v5, %v508_v60 }
 0x195   : > { %602 = vadd.xlane.f32.xlu2 %v601_v11  ;;  %v522_v12 = vpop.f32.mrf.mxu3  ;;  %v583_v11 = vsel %vm570_vm1, %v558_v63, 0.0 }
 0x196   : > { %v523_v14 = vadd.f32 %v522_v12, %v409_v3  ;;  %v493_v3 = vadd.f32 %v492_v52, %v379_v61  ;;  %v505_v52 = vadd.f32 %v504_v62, %v3596_v51  ;;  %v562_v61 = vmul.f32 %v3653_v8, %v3653_v8 }
 0x197   : > { %v560_v53 = vmul.f32 %v3702_v55, %v3702_v55 }
 0x198   : > { %v3625_v28 = vadd.f32 %v3614_v5, %v523_v14  ;;  %v3658_v57 = vadd.f32 %v3614_v5, %v493_v3  ;;  %v3671_v36 = vadd.f32 %v3614_v5, %v505_v52 }
 0x19a   : > { %v565_v30 = vmul.f32 %v3625_v28, %v3625_v28  ;;  %v555_v15 = vmul.f32 %v3658_v57, %v3658_v57 }
 0x19c   : > { %v604_v35 = vsel %vm570_vm1, %v565_v30, 0.0 }
 0x19d   : > { %605 = vadd.xlane.f32.xlu2 %v604_v35  ;;  %v525_v37 = vpop.f32.mrf.mxu3  ;;  %v421_v35 = vpop.f32.mrf.mxu1 }
 0x19e   : > { %v526_v38 = vadd.f32 %v525_v37, %v412_v13  ;;  %v595_v37 = vsel %vm570_vm1, %v562_v61, 0.0 }
 0x1a0   : > { %v3636_v42 = vadd.f32 %v3614_v5, %v526_v38  ;;  %v574_v38 = vsel %vm570_vm1, %v555_v15, 0.0 }
 0x1a2   : > { %v566_v43 = vmul.f32 %v3636_v42, %v3636_v42 }
 0x1a4   : > { %v607_v46 = vsel %vm570_vm1, %v566_v43, 0.0 }
 0x1a5   : > { %593 = vadd.xlane.f32.xlu2 %v592_v45  ;;  %608 = vadd.xlane.f32.xlu1 %v607_v46  ;;  %v528_v48 = vpop.f32.mrf.mxu3  ;;  %v559_v45 = vmul.f32 %v3671_v36, %v3671_v36 }
 0x1a6   : > { %v529_v49 = vadd.f32 %v528_v48, %v415_v39  ;;  %v3691_v48 = vadd.f32 %v3614_v5, %v517_v41 }
 0x1a7   : > { %v586_v54 = vsel %vm570_vm1, %v559_v45, 0.0 }
 0x1a8   : > { %v3646_v59 = vadd.f32 %v3614_v5, %v529_v49  ;;  %v563_v0 = vmul.f32 %v3691_v48, %v3691_v48  ;;  %v556_v49 = vmul.f32 %v3688_v47, %v3688_v47 }
 0x1aa   : > { %v567_v6 = vmul.f32 %v3646_v59, %v3646_v59  ;;  %v598_v63 = vsel %vm570_vm1, %v563_v0, 0.0  ;;  %v577_v3 = vsel %vm570_vm1, %v556_v49, 0.0 }
 0x1ac   : > { %v610_v10 = vsel %vm570_vm1, %v567_v6, 0.0  ;;  %v589_v6 = vsel %vm570_vm1, %v560_v53, 0.0 }
 0x1ad   : > { %611 = vadd.xlane.f32.xlu1 %v610_v10  ;;  %v531_v12 = vpop.f32.mrf.mxu3  ;;  %584 = vadd.xlane.f32.xlu2 %v583_v11  ;;  %v490_v10 = vadd.f32 %v3594_v50, %v3604_v58 }
 0x1ae   : > { %v532_v13 = vadd.f32 %v531_v12, %v418_v4  ;;  %v499_v4 = vadd.f32 %v3602_v56, %v3621_v9 }
 0x1af   : > { %v3719_v12 = vadd.f32 %v3614_v5, %v490_v10 }
 0x1b0   : > { %v3664_v14 = vadd.f32 %v3614_v5, %v532_v13  ;;  %v3711_v2 = vadd.f32 %v3614_v5, %v499_v4 }
 0x1b1   : > { %v554_v9 = vmul.f32 %v3719_v12, %v3719_v12 }
 0x1b2   : > { %v568_v30 = vmul.f32 %v3664_v14, %v3664_v14  ;;  %v557_v11 = vmul.f32 %v3711_v2, %v3711_v2 }
 0x1b3   : > { %v571_v13 = vsel %vm570_vm1, %v554_v9, 0.0 }
 0x1b4   : > { %v613_v51 = vsel %vm570_vm1, %v568_v30, 0.0  ;;  %v580_v56 = vsel %vm570_vm1, %v557_v11, 0.0 }
 0x1b5   : > { %596 = vadd.xlane.f32.xlu1 %v595_v37  ;;  %614 = vadd.xlane.f32.xlu0 %v613_v51  ;;  %v534_v62 = vpop.f32.mrf.mxu3 }
 0x1b6   : > { %v535_v39 = vadd.f32 %v534_v62, %v421_v35  ;;  %575 = vadd.xlane.f32.xlu2 %v574_v38 }
 0x1b8   : > { %v3681_v43 = vadd.f32 %v3614_v5, %v535_v39 }
 0x1ba   : > { %v569_v46 = vmul.f32 %v3681_v43, %v3681_v43 }
 0x1bc   : > { %v616_v1 = vsel %vm570_vm1, %v569_v46, 0.0 }
 0x1bd   : > { %587 = vadd.xlane.f32.xlu1 %v586_v54  ;;  %617 = vadd.xlane.f32.xlu0 %v616_v1 }
 0x1c5   : > { %599 = vadd.xlane.f32.xlu0 %v598_v63  ;;  %578 = vadd.xlane.f32.xlu1 %v577_v3 }
 0x1cd   : > { %590 = vadd.xlane.f32.xlu0 %v589_v6 }
 0x1d5   : > { %581 = vadd.xlane.f32.xlu0 %v580_v56 }
 0x1dd   : > { %572 = vadd.xlane.f32.xlu0 %v571_v13 }
 0x208   : > { %v603_v52 = vpop.xlane.xlu2 %602 }
 0x209   : > { %v3725_v30 = vmax.f32 %v603_v52, 1e-24 }
 0x20b   : > { %3065 = vrsqrt.f32 %v3725_v30  ;;  %vm741_vm3 = vweird.f32 %v3725_v30 }
 0x210   : > { %v606_v15 = vpop.xlane.xlu2 %605 }
 0x211   : > { %v3727_v50 = vmax.f32 %v606_v15, 1e-24  ;;  %v3735_v37 = vpop.eup %3065 }
 0x212   : > { %v736_v38 = vmul.f32 %v3735_v37, %v3725_v30  ;;  %vm742_vm2 = vweird.f32 %v3735_v37 }
 0x213   : > { %3067 = vrsqrt.f32 %v3727_v50  ;;  %vm751_vm5 = vweird.f32 %v3727_v50  ;;  %vm3813_vm7 = vmor %vm741_vm3, %vm742_vm2 }
 0x214   : > { %v737_v54 = vmul.f32 %v3735_v37, %v736_v38 }
 0x216   : > { %v738_v3 = vmul.f32 0.5, %v737_v54 }
 0x218   : > { %v609_v61 = vpop.xlane.xlu1 %608  ;;  %v594_v51 = vpop.xlane.xlu2 %593 }
 0x219   : > { %v3731_v5 = vmax.f32 %v609_v61, 1e-24  ;;  %v3737_v62 = vpop.eup %3067  ;;  %v3745_v45 = vmax.f32 %v594_v51, 1e-24  ;;  %v739_v61 = vsub.f32 1.5, %v738_v3 }
 0x21a   : > { %v746_v41 = vmul.f32 %v3737_v62, %v3727_v50  ;;  %vm752_vm4 = vweird.f32 %v3737_v62 }
 0x21b   : > { %3069 = vrsqrt.f32 %v3731_v5  ;;  %vm761_vm6 = vweird.f32 %v3731_v5  ;;  %vm3821_vm8 = vmor %vm751_vm5, %vm752_vm4 }
 0x21c   : > { %v747_v0 = vmul.f32 %v3737_v62, %v746_v41 }
 0x21e   : > { %v748_v11 = vmul.f32 0.5, %v747_v0 }
 0x220   : > { %v612_v58 = vpop.xlane.xlu1 %611  ;;  %v585_v49 = vpop.xlane.xlu2 %584 }
 0x221   : > { %v3733_v35 = vmax.f32 %v612_v58, 1e-24  ;;  %v3750_v1 = vpop.eup %3069  ;;  %v3763_v56 = vmax.f32 %v585_v49, 1e-24 }
 0x222   : > { %v756_v4 = vmul.f32 %v3750_v1, %v3731_v5  ;;  %vm762_vm10 = vweird.f32 %v3750_v1  ;;  %v899_v5 = vld [vmem:[#allocation2 + $0x48] sm:$0xff] }
 0x223   : > { %3071 = vrsqrt.f32 %v3733_v35  ;;  %vm771_vm9 = vweird.f32 %v3733_v35  ;;  %vm3859_vm15 = vmor %vm761_vm6, %vm762_vm10  ;;  %961 = vmatpush.msrb.mxu1 %v899_v5  ;;  %vm711_vm10 = vweird.f32 %v3745_v45 }
 0x224   : > { %v757_v58 = vmul.f32 %v3750_v1, %v756_v4 }
 0x226   : > { %v758_v49 = vmul.f32 0.5, %v757_v58 }
 0x228   : > { %v597_v39 = vpop.xlane.xlu1 %596  ;;  %v615_v40 = vpop.xlane.xlu0 %614 }
 0x229   : > { %v3747_v46 = vmax.f32 %v615_v40, 1e-24  ;;  %v3753_v60 = vpop.eup %3071  ;;  %v3757_v63 = vmax.f32 %v597_v39, 1e-24  ;;  %v749_v39 = vsub.f32 1.5, %v748_v11 }
 0x22a   : > { %v766_v53 = vmul.f32 %v3753_v60, %v3733_v35  ;;  %vm772_vm11 = vweird.f32 %v3753_v60 }
 0x22b   : > { %3073 = vrsqrt.f32 %v3747_v46  ;;  %vm781_vm13 = vweird.f32 %v3747_v46  ;;  %vm3884_vm4 = vmor %vm771_vm9, %vm772_vm11 }
 0x22c   : > { %3075 = vrsqrt.f32 %v3745_v45  ;;  %v767_v51 = vmul.f32 %v3753_v60, %v766_v53 }
 0x22d   : > { %3077 = vrsqrt.f32 %v3757_v63 }
 0x22e   : > { %v768_v3 = vmul.f32 0.5, %v767_v51 }
 0x230   : > { %v588_v6 = vpop.xlane.xlu1 %587  ;;  %v618_v10 = vpop.xlane.xlu0 %617 }
 0x231   : > { %v3765_v9 = vmax.f32 %v618_v10, 1e-24  ;;  %v3767_v13 = vpop.eup %3073  ;;  %v3776_v38 = vmax.f32 %v588_v6, 1e-24  ;;  %v740_v6 = vmul.f32 %v3735_v37, %v739_v61  ;;  %v576_v10 = vpop.xlane.xlu2 %575 }
 0x232   : > { %v3770_v52 = vpop.eup %3075  ;;  %v776_v15 = vmul.f32 %v3767_v13, %v3747_v46  ;;  %v3817_v32 = vmax.f32 %v576_v10, 1e-24  ;;  %vm782_vm12 = vweird.f32 %v3767_v13 }
 0x233   : > { %3079 = vrsqrt.f32 %v3765_v9  ;;  %v706_v41 = vmul.f32 %v3770_v52, %v3745_v45  ;;  %v3784_v0 = vpop.eup %3077  ;;  %v744_v31 = vsel %vm3813_vm7, %v3735_v37, %v740_v6  ;;  %vm791_vm2 = vweird.f32 %v3765_v9  ;;  %vm3871_vm3 = vmor %vm781_vm13, %vm782_vm12 }
 0x234   : > { %3081 = vrsqrt.f32 %v3763_v56  ;;  %v777_v40 = vmul.f32 %v3767_v13, %v776_v15  ;;  %v3792_v15 = vmul.f32 %v3737_v62, %v749_v39  ;;  %vm712_vm6 = vweird.f32 %v3770_v52 }
 0x235   : > { %3083 = vrsqrt.f32 %v3776_v38  ;;  %v707_v58 = vmul.f32 %v3770_v52, %v706_v41  ;;  %v759_v41 = vsub.f32 1.5, %v758_v49  ;;  %vm721_vm12 = vweird.f32 %v3757_v63  ;;  %vm3964_vm13 = vmor %vm711_vm10, %vm712_vm6 }
 0x236   : > { %v778_v54 = vmul.f32 0.5, %v777_v40  ;;  %v754_v49 = vsel %vm3821_vm8, %v3737_v62, %v3792_v15  ;;  %vm722_vm8 = vweird.f32 %v3784_v0  ;;  %vm691_vm6 = vweird.f32 %v3776_v38 }
 0x237   : > { %v708_v10 = vmul.f32 0.5, %v707_v58  ;;  %v760_v58 = vmul.f32 %v3750_v1, %v759_v41 }
 0x238   : > { %v600_v4 = vpop.xlane.xlu0 %599  ;;  %v579_v53 = vpop.xlane.xlu1 %578  ;;  %v779_v33 = vsub.f32 1.5, %v778_v54 }
 0x239   : > { %v3789_v11 = vmax.f32 %v600_v4, 1e-24  ;;  %v3795_v40 = vpop.eup %3079  ;;  %v3800_v51 = vmax.f32 %v579_v53, 1e-24  ;;  %v716_v4 = vmul.f32 %v3784_v0, %v3757_v63  ;;  %v769_v53 = vsub.f32 1.5, %v768_v3 }
 0x23a   : > { %v3802_v61 = vpop.eup %3081  ;;  %v786_v39 = vmul.f32 %v3795_v40, %v3765_v9  ;;  %vm792_vm14 = vweird.f32 %v3795_v40 }
 0x23b   : > { %3085 = vrsqrt.f32 %v3789_v11  ;;  %v3835_v3 = vpop.eup %3083  ;;  %v676_v29 = vmul.f32 %v3802_v61, %v3763_v56  ;;  %v717_v37 = vmul.f32 %v3784_v0, %v716_v4  ;;  %v770_v15 = vmul.f32 %v3753_v60, %v769_v53  ;;  %vm793_vm5 = vmor %vm791_vm2, %vm792_vm14 }
 0x23c   : > { %v787_v30 = vmul.f32 %v3795_v40, %v786_v39  ;;  %3087 = vrsqrt.f32 %v3800_v51  ;;  %v780_v39 = vmul.f32 %v3767_v13, %v779_v33  ;;  %v686_v54 = vmul.f32 %v3835_v3, %v3776_v38  ;;  %vm3975_vm14 = vmor %vm721_vm12, %vm722_vm8 }
 0x23d   : > { %3089 = vrsqrt.f32 %v3817_v32  ;;  %v709_v53 = vsub.f32 1.5, %v708_v10  ;;  %v677_v41 = vmul.f32 %v3802_v61, %v676_v29  ;;  %v718_v27 = vmul.f32 0.5, %v717_v37 }
 0x23e   : > { %v788_v6 = vmul.f32 0.5, %v787_v30  ;;  %v784_v29 = vsel %vm3871_vm3, %v3767_v13, %v780_v39  ;;  %v898_v13 = vld [vmem:[#allocation2 + $0x40] sm:$0xff]  ;;  %v687_v35 = vmul.f32 %v3835_v3, %v686_v54  ;;  %v897_v54 = vld [vmem:[#allocation2 + $0x38] sm:$0xff]  ;;  %vm731_vm9 = vweird.f32 %v3789_v11 }
 0x23f   : > { %962 = vmatpush.msrb.mxu1 %v898_v13  ;;  %v3911_v26 = vmul.f32 %v784_v29, %v3664_v14  ;;  %vm692_vm3 = vweird.f32 %v3835_v3  ;;  %vm661_vm12 = vweird.f32 %v3800_v51 }
 0x240   : > { %v591_v62 = vpop.xlane.xlu0 %590  ;;  %v789_v4 = vsub.f32 1.5, %v788_v6  ;;  %vm693_vm8 = vmor %vm691_vm6, %vm692_vm3 }
 0x241   : > { %v3848_v50 = vpop.eup %3085  ;;  %v3852_v30 = vmax.f32 %v591_v62, 1e-24  ;;  %v774_v62 = vsel %vm3884_vm4, %v3753_v60, %v770_v15  ;;  %v678_v60 = vmul.f32 0.5, %v677_v41  ;;  %v719_v15 = vsub.f32 1.5, %v718_v27  ;;  %963 = vmatpush.msrb.mxu1 %v897_v54 }
 0x242   : > { %v726_v6 = vmul.f32 %v3848_v50, %v3789_v11  ;;  %v790_v10 = vmul.f32 %v3795_v40, %v789_v4  ;;  %v3888_v9 = vpop.eup %3087  ;;  %v3894_v4 = vmul.f32 %v744_v31, %v3617_v7  ;;  %v3923_v14 = vmul.f32 %v774_v62, %v3646_v59 }
 0x243   : > { %3091 = vrsqrt.f32 %v3852_v30  ;;  %v3905_v5 = vpop.eup %3089  ;;  %v688_v41 = vmul.f32 0.5, %v687_v35  ;;  %vm732_vm7 = vweird.f32 %v3848_v50  ;;  %v720_v13 = vmul.f32 %v3784_v0, %v719_v15 }
 0x244   : > { %v727_v37 = vmul.f32 %v3848_v50, %v726_v6  ;;  %v794_v39 = vsel %vm793_vm5, %v3795_v40, %v790_v10  ;;  %v764_v6 = vsel %vm3859_vm15, %v3750_v1, %v760_v58  ;;  %v3914_v40 = vmul.f32 %v754_v49, %v3625_v28  ;;  %v896_v10 = vld [vmem:[#allocation2 + $0x30] sm:$0xff]  ;;  %vm3953_vm11 = vmor %vm731_vm9, %vm732_vm7 }
 0x245   : > { %v3908_v7 = vmul.f32 %v794_v39, %v3681_v43  ;;  %v656_v1 = vmul.f32 %v3888_v9, %v3800_v51  ;;  %v3919_v58 = vmul.f32 %v3770_v52, %v709_v53  ;;  %v3926_v28 = vmul.f32 %v764_v6, %v3636_v42  ;;  %964 = vmatpush.msrb.mxu1 %v896_v10 }
 0x246   : > { %v728_v31 = vmul.f32 0.5, %v727_v37  ;;  %v646_v27 = vmul.f32 %v3905_v5, %v3817_v32  ;;  %v825_v42 = vmax.f32 %v3911_v26, 0.0  ;;  %v679_v35 = vsub.f32 1.5, %v678_v60 }
 0x247   : > { %v826_v46 = vmax.f32 %v3908_v7, 0.0  ;;  %v657_v37 = vmul.f32 %v3888_v9, %v656_v1  ;;  %v824_v62 = vmax.f32 %v3923_v14, 0.0  ;;  %v823_v60 = vmax.f32 %v3926_v28, 0.0 }
 0x248   : > { %v729_v33 = vsub.f32 1.5, %v728_v31  ;;  %v582_v43 = vpop.xlane.xlu0 %581  ;;  %v647_v6 = vmul.f32 %v3905_v5, %v646_v27  ;;  %v689_v31 = vsub.f32 1.5, %v688_v41  ;;  %v822_v63 = vmax.f32 %v3914_v40, 0.0 }
 0x249   : > { %v3928_v49 = vpop.eup %3091  ;;  %v3932_v29 = vmax.f32 %v582_v43, 1e-24  ;;  %827 = vmatpush.msrb.mxu3 %v826_v46  ;;  %v821_v15 = vmax.f32 %v3894_v4, 0.0  ;;  %v658_v1 = vmul.f32 0.5, %v657_v37  ;;  %v714_v43 = vsel %vm3964_vm13, %v3770_v52, %v3919_v58 }
 0x24a   : > { %v696_v53 = vmul.f32 %v3928_v49, %v3852_v30  ;;  %v730_v59 = vmul.f32 %v3848_v50, %v729_v33  ;;  %v724_v33 = vsel %vm3975_vm14, %v3784_v0, %v720_v13  ;;  %vm682_vm15 = vweird.f32 %v3802_v61 }
 0x24b   : > { %3093 = vrsqrt.f32 %v3932_v29  ;;  %828 = vmatpush.msrb.mxu3 %v825_v42  ;;  %vm702_vm2 = vweird.f32 %v3928_v49  ;;  %v648_v37 = vmul.f32 0.5, %v647_v6  ;;  %v690_v52 = vmul.f32 %v3835_v3, %v689_v31 }
 0x24c   : > { %v697_v39 = vmul.f32 %v3928_v49, %v696_v53  ;;  %v734_v45 = vsel %vm3953_vm11, %v3848_v50, %v730_v59  ;;  %v680_v59 = vmul.f32 %v3802_v61, %v679_v35  ;;  %vm701_vm4 = vweird.f32 %v3852_v30 }
 0x24d   : > { %829 = vmatpush.msrb.mxu3 %v824_v62  ;;  %v3990_v53 = vmul.f32 %v734_v45, %v3691_v48  ;;  %v4003_v48 = vmul.f32 %v724_v33, %v3653_v8  ;;  %vm681_vm5 = vweird.f32 %v3763_v56  ;;  %vm703_vm7 = vmor %vm701_vm4, %vm702_vm2  ;;  %v4015_v8 = vmul.f32 %v714_v43, %v3630_v34 }
 0x24e   : > { %v698_v10 = vmul.f32 0.5, %v697_v39  ;;  %v659_v39 = vsub.f32 1.5, %v658_v1  ;;  %v649_v56 = vsub.f32 1.5, %v648_v37  ;;  %v694_v38 = vsel %vm693_vm8, %v3835_v3, %v690_v52  ;;  %vm683_vm9 = vmor %vm681_vm5, %vm682_vm15 }
 0x24f   : > { %830 = vmatpush.msrb.mxu3 %v823_v60  ;;  %v820_v11 = vmax.f32 %v3990_v53, 0.0  ;;  %v819_v45 = vmax.f32 %v4003_v48, 0.0  ;;  %vm662_vm10 = vweird.f32 %v3888_v9  ;;  %v818_v3 = vmax.f32 %v4015_v8, 0.0 }
 0x250   : > { %v699_v27 = vsub.f32 1.5, %v698_v10  ;;  %v573_v41 = vpop.xlane.xlu0 %572  ;;  %v660_v54 = vmul.f32 %v3888_v9, %v659_v39  ;;  %v800_v50 = vmul.f32 %v694_v38, %v3671_v36  ;;  %vm652_vm13 = vweird.f32 %v3905_v5  ;;  %vm663_vm15 = vmor %vm661_vm12, %vm662_vm10 }
 0x251   : > { %v3094_v0 = vpop.eup %3093  ;;  %v3994_v13 = vmax.f32 %v573_v41, 1e-24  ;;  %831 = vmatpush.msrb.mxu3 %v822_v63  ;;  %vm671_vm14 = vweird.f32 %v3932_v29  ;;  %vm651_vm2 = vweird.f32 %v3817_v32 }
 0x252   : > { %v666_v58 = vmul.f32 %v3094_v0, %v3932_v29  ;;  %v700_v35 = vmul.f32 %v3928_v49, %v699_v27  ;;  %vm672_vm11 = vweird.f32 %v3094_v0  ;;  %v816_v51 = vmax.f32 %v800_v50, 0.0  ;;  %vm653_vm4 = vmor %vm651_vm2, %vm652_vm13 }
 0x253   : > { %3095 = vrsqrt.f32 %v3994_v13  ;;  %832 = vmatpush.msrb.mxu3 %v821_v15  ;;  %vm673_vm3 = vmor %vm671_vm14, %vm672_vm11  ;;  %vm641_vm6 = vweird.f32 %v3994_v13 }
 0x254   : > { %v667_v30 = vmul.f32 %v3094_v0, %v666_v58  ;;  %v704_v6 = vsel %vm703_vm7, %v3928_v49, %v700_v35  ;;  %v684_v49 = vsel %vm683_vm9, %v3802_v61, %v680_v59  ;;  %v650_v61 = vmul.f32 %v3905_v5, %v649_v56 }
 0x255   : > { %833 = vmatpush.msrb.mxu3 %v820_v11  ;;  %v4027_v34 = vmul.f32 %v704_v6, %v3702_v55  ;;  %v799_v55 = vmul.f32 %v684_v49, %v3641_v44  ;;  %v664_v44 = vsel %vm663_vm15, %v3888_v9, %v660_v54 }
 0x256   : > { %v668_v31 = vmul.f32 0.5, %v667_v30  ;;  %v654_v59 = vsel %vm653_vm4, %v3905_v5, %v650_v61  ;;  %v797_v58 = vmul.f32 %v664_v44, %v3688_v47 }
 0x257   : > { %834 = vmatpush.msrb.mxu3 %v819_v45  ;;  %v817_v43 = vmax.f32 %v4027_v34, 0.0  ;;  %v815_v52 = vmax.f32 %v799_v55, 0.0  ;;  %v796_v32 = vmul.f32 %v654_v59, %v3658_v57 }
 0x258   : > { %v669_v10 = vsub.f32 1.5, %v668_v31  ;;  %v813_v9 = vmax.f32 %v797_v58, 0.0 }
 0x259   : > { %v3096_v1 = vpop.eup %3095  ;;  %835 = vmatpush.msrb.mxu3 %v818_v3 }
 0x25a   : > { %v636_v33 = vmul.f32 %v3096_v1, %v3994_v13  ;;  %v670_v27 = vmul.f32 %v3094_v0, %v669_v10  ;;  %vm642_vm5 = vweird.f32 %v3096_v1 }
 0x25b   : > { %836 = vmatpush.msrb.mxu3 %v817_v43  ;;  %vm643_vm7 = vmor %vm641_vm6, %vm642_vm5 }
 0x25c   : > { %v637_v36 = vmul.f32 %v3096_v1, %v636_v33  ;;  %v674_v41 = vsel %vm673_vm3, %v3094_v0, %v670_v27 }
 0x25d   : > { %v798_v29 = vmul.f32 %v674_v41, %v3711_v2  ;;  %837 = vmatpush.msrb.mxu3 %v816_v51  ;;  %v812_v2 = vmax.f32 %v796_v32, 0.0  ;;  %v4137_v41 = vld [vmem:[#allocation2 + $0xc1] ss:$0 sm:$0xff] }
 0x25e   : > { %v638_v37 = vmul.f32 0.5, %v637_v36 }
 0x25f   : > { %v814_v35 = vmax.f32 %v798_v29, 0.0  ;;  %838 = vmatpush.msrb.mxu3 %v815_v52 }
 0x260   : > { %v639_v39 = vsub.f32 1.5, %v638_v37 }
 0x261   : > { %839 = vmatpush.msrb.mxu3 %v814_v35 }
 0x262   : > { %v640_v0 = vmul.f32 %v3096_v1, %v639_v39 }
 0x263   : > { %840 = vmatpush.msrb.mxu3 %v813_v9 }
 0x264   : > { %v644_v5 = vsel %vm643_vm7, %v3096_v1, %v640_v0 }
 0x265   : > { %v795_v30 = vmul.f32 %v644_v5, %v3719_v12  ;;  %841 = vmatpush.msrb.mxu3 %v812_v2 }
 0x267   : > { %v811_v8 = vmax.f32 %v795_v30, 0.0 }
 0x269   : > { %842 = vmatpush.msrb.mxu3 %v811_v8  ;;  %2881 = vmatmul.msk.f32.vlgmr.msrb.gmra.mxu1 %vm570_vm1, %v811_v8 }
 0x26a   : > { %843 = vmatmul.f32.vlgmr.msrb.gmra.mxu3 %v3490_v16  ;;  %v5743_v16 = vld [vmem:[#allocation8_spill] sm:$0xff] }
 0x271   : > { %2882 = vmatmul.msk.f32.gmra.mxu1 %vm570_vm1, %v812_v2 }
 0x272   : > { %846 = vmatmul.f32.gmra.mxu3 %v3494_v17  ;;  %v5744_v17 = vld [vmem:[#allocation9_spill] sm:$0xff] }
 0x279   : > { %2883 = vmatmul.msk.f32.gmra.mxu1 %vm570_vm1, %v813_v9 }
 0x27a   : > { %849 = vmatmul.f32.gmra.mxu3 %v3498_v18  ;;  %v895_v18 = vld [vmem:[#allocation2 + $0x28] sm:$0xff] }
 0x27b   : > { %1074 = vmatpush.msrb.mxu2 %v895_v18 }
 0x281   : > { %2884 = vmatmul.msk.f32.gmra.mxu1 %vm570_vm1, %v814_v35 }
 0x282   : > { %852 = vmatmul.f32.gmra.mxu3 %v3502_v19  ;;  %v894_v19 = vld [vmem:[#allocation2 + $0x20] sm:$0xff] }
 0x283   : > { %1075 = vmatpush.msrb.mxu2 %v894_v19 }
 0x289   : > { %2885 = vmatmul.msk.f32.gmra.mxu1 %vm570_vm1, %v815_v52 }
 0x28a   : > { %855 = vmatmul.f32.gmra.mxu3 %v3506_v20  ;;  %v893_v20 = vld [vmem:[#allocation2 + $0x18] sm:$0xff] }
 0x28b   : > { %1076 = vmatpush.msrb.mxu2 %v893_v20 }
 0x291   : > { %2886 = vmatmul.msk.f32.gmra.mxu1 %vm570_vm1, %v816_v51 }
 0x292   : > { %858 = vmatmul.f32.gmra.mxu3 %v3510_v21  ;;  %v5745_v21 = vld [vmem:[#allocation10_spill] sm:$0xff] }
 0x299   : > { %2887 = vmatmul.msk.f32.gmra.mxu1 %vm570_vm1, %v817_v43 }
 0x29a   : > { %861 = vmatmul.f32.gmra.mxu3 %v3514_v22  ;;  %v892_v22 = vld [vmem:[#allocation2 + $0x10] sm:$0xff] }
 0x29b   : > { %1077 = vmatpush.msrb.mxu2 %v892_v22 }
 0x2a1   : > { %2888 = vmatmul.msk.f32.gmra.mxu1 %vm570_vm1, %v818_v3 }
 0x2a2   : > { %864 = vmatmul.f32.gmra.mxu3 %v3518_v23  ;;  %v5746_v23 = vld [vmem:[#allocation11_spill] sm:$0xff] }
 0x2a9   : > { %2889 = vmatmul.msk.f32.gmra.mxu1 %vm570_vm1, %v819_v45 }
 0x2aa   : > { %867 = vmatmul.f32.gmra.mxu3 %v3522_v24  ;;  %v5747_v24 = vld [vmem:[#allocation12_spill] sm:$0xff] }
 0x2b1   : > { %2890 = vmatmul.msk.f32.gmra.mxu1 %vm570_vm1, %v820_v11 }
 0x2b2   : > { %870 = vmatmul.f32.gmra.mxu3 %v3526_v25  ;;  %v5748_v25 = vld [vmem:[#allocation13_spill] sm:$0xff] }
 0x2b9   : > { %2891 = vmatmul.msk.f32.gmra.mxu1 %vm570_vm1, %v821_v15 }
 0x2ba   : > { %873 = vmatmul.f32.gmra.mxu3 %v5743_v16 }
 0x2c1   : > { %2892 = vmatmul.msk.f32.gmra.mxu1 %vm570_vm1, %v822_v63 }
 0x2c2   : > { %876 = vmatmul.f32.gmra.mxu3 %v5744_v17 }
 0x2c9   : > { %2893 = vmatmul.msk.f32.gmra.mxu1 %vm570_vm1, %v823_v60 }
 0x2ca   : > { %879 = vmatmul.f32.gmra.mxu3 %v5745_v21 }
 0x2d1   : > { %2894 = vmatmul.msk.f32.gmra.mxu1 %vm570_vm1, %v824_v62 }
 0x2d2   : > { %882 = vmatmul.f32.gmra.mxu3 %v5746_v23 }
 0x2d9   : > { %2895 = vmatmul.msk.f32.gmra.mxu1 %vm570_vm1, %v825_v42 }
 0x2da   : > { %885 = vmatmul.f32.gmra.mxu3 %v5747_v24 }
 0x2e1   : > { %2896 = vmatmul.msk.f32.gmra.mxu1 %vm570_vm1, %v826_v46 }
 0x2e2   : > { %888 = vmatmul.f32.gmra.mxu3 %v5748_v25 }
 0x2e6   : > { %v4114_v63 = vpop.f32.mrf.mxu1 }
 0x2ed   : > { %v844_v57 = vpop.f32.mrf.mxu3 }
 0x2ee   : > { %2897 = vmatmul.msk.f32.vlgmr.msrb.gmra.mxu2 %vm570_vm1, %v844_v57  ;;  %v4117_v53 = vpop.f32.mrf.mxu1 }
 0x2f5   : > { %v847_v47 = vpop.f32.mrf.mxu3 }
 0x2f6   : > { %2898 = vmatmul.msk.f32.gmra.mxu2 %vm570_vm1, %v847_v47  ;;  %v4121_v11 = vpop.f32.mrf.mxu1 }
 0x2fd   : > { %v850_v12 = vpop.f32.mrf.mxu3 }
 0x2fe   : > { %2899 = vmatmul.msk.f32.gmra.mxu2 %vm570_vm1, %v850_v12  ;;  %v4123_v6 = vpop.f32.mrf.mxu1 }
 0x305   : > { %v853_v26 = vpop.f32.mrf.mxu3 }
 0x306   : > { %2900 = vmatmul.msk.f32.gmra.mxu2 %vm570_vm1, %v853_v26  ;;  %v978_v31 = vpop.f32.mrf.mxu1 }
 0x30d   : > { %v856_v4 = vpop.f32.mrf.mxu3 }
 0x30e   : > { %2901 = vmatmul.msk.f32.gmra.mxu2 %vm570_vm1, %v856_v4  ;;  %v981_v34 = vpop.f32.mrf.mxu1 }
 0x315   : > { %v859_v7 = vpop.f32.mrf.mxu3 }
 0x316   : > { %2902 = vmatmul.msk.f32.gmra.mxu2 %vm570_vm1, %v859_v7  ;;  %v4133_v54 = vpop.f32.mrf.mxu1 }
 0x31d   : > { %v862_v40 = vpop.f32.mrf.mxu3 }
 0x31e   : > { %2903 = vmatmul.msk.f32.gmra.mxu2 %vm570_vm1, %v862_v40  ;;  %v987_v3 = vpop.f32.mrf.mxu1 }
 0x325   : > { %v865_v46 = vpop.f32.mrf.mxu3 }
 0x326   : > { %2904 = vmatmul.msk.f32.gmra.mxu2 %vm570_vm1, %v865_v46  ;;  %v990_v55 = vpop.f32.mrf.mxu1 }
 0x32d   : > { %v868_v14 = vpop.f32.mrf.mxu3 }
 0x32e   : > { %2905 = vmatmul.msk.f32.gmra.mxu2 %vm570_vm1, %v868_v14  ;;  %v993_v33 = vpop.f32.mrf.mxu1 }
 0x335   : > { %v871_v28 = vpop.f32.mrf.mxu3 }
 0x336   : > { %2906 = vmatmul.msk.f32.gmra.mxu2 %vm570_vm1, %v871_v28  ;;  %v996_v27 = vpop.f32.mrf.mxu1 }
 0x33d   : > { %v874_v42 = vpop.f32.mrf.mxu3 }
 0x33e   : > { %2907 = vmatmul.msk.f32.gmra.mxu2 %vm570_vm1, %v874_v42  ;;  %v999_v36 = vpop.f32.mrf.mxu1 }
 0x345   : > { %v877_v62 = vpop.f32.mrf.mxu3 }
 0x346   : > { %2908 = vmatmul.msk.f32.gmra.mxu2 %vm570_vm1, %v877_v62  ;;  %v1002_v39 = vpop.f32.mrf.mxu1 }
 0x34d   : > { %v880_v60 = vpop.f32.mrf.mxu3 }
 0x34e   : > { %2909 = vmatmul.msk.f32.gmra.mxu2 %vm570_vm1, %v880_v60  ;;  %v1005_v8 = vpop.f32.mrf.mxu1 }
 0x355   : > { %v883_v15 = vpop.f32.mrf.mxu3 }
 0x356   : > { %2910 = vmatmul.msk.f32.gmra.mxu2 %vm570_vm1, %v883_v15  ;;  %v1008_v23 = vpop.f32.mrf.mxu1 }
 0x35d   : > { %v886_v13 = vpop.f32.mrf.mxu3 }
 0x35e   : > { %2911 = vmatmul.msk.f32.gmra.mxu2 %vm570_vm1, %v886_v13  ;;  %v1011_v62 = vpop.f32.mrf.mxu1 }
 0x365   : > { %v889_v48 = vpop.f32.mrf.mxu3 }
 0x366   : > { %2912 = vmatmul.msk.f32.gmra.mxu2 %vm570_vm1, %v889_v48 }
 0x371   : > { %v4125_v56 = vpop.f32.mrf.mxu2 }
 0x379   : > { %v4127_v38 = vpop.f32.mrf.mxu2 }
 0x37a   : > { %v1083_v13 = vadd.f32 %v4127_v38, %v4117_v53 }
 0x381   : > { %v4129_v45 = vpop.f32.mrf.mxu2 }
 0x389   : > { %v4131_v49 = vpop.f32.mrf.mxu2 }
 0x391   : > { %v1091_v10 = vpop.f32.mrf.mxu2 }
 0x392   : > { %v1092_v12 = vadd.f32 %v1091_v10, %v978_v31 }
 0x394   : > { %v4174_v46 = vadd.f32 %v4137_v41, %v1092_v12 }
 0x396   : > { %v1148_v10 = vmul.f32 %v4174_v46, %v4174_v46 }
 0x398   : > { %v1172_v53 = vsel %vm570_vm1, %v1148_v10, 0.0 }
 0x399   : > { %v1094_v50 = vpop.f32.mrf.mxu2 }
 0x39a   : > { %v1095_v48 = vadd.f32 %v1094_v50, %v981_v34 }
 0x3a1   : > { %v4135_v1 = vpop.f32.mrf.mxu2 }
 0x3a9   : > { %v1100_v61 = vpop.f32.mrf.mxu2 }
 0x3aa   : > { %v1101_v20 = vadd.f32 %v1100_v61, %v987_v3 }
 0x3ac   : > { %v4163_v24 = vadd.f32 %v4137_v41, %v1101_v20 }
 0x3ae   : > { %v1151_v7 = vmul.f32 %v4163_v24, %v4163_v24 }
 0x3b0   : > { %v1181_v28 = vsel %vm570_vm1, %v1151_v7, 0.0 }
 0x3b1   : > { %v1103_v43 = vpop.f32.mrf.mxu2 }
 0x3b2   : > { %v1104_v26 = vadd.f32 %v1103_v43, %v990_v55  ;;  %v4193_v43 = vadd.f32 %v4137_v41, %v1083_v13 }
 0x3b4   : > { %v4177_v14 = vadd.f32 %v4137_v41, %v1104_v26 }
 0x3b6   : > { %v1152_v3 = vmul.f32 %v4177_v14, %v4177_v14 }
 0x3b8   : > { %v1184_v38 = vsel %vm570_vm1, %v1152_v3, 0.0 }
 0x3b9   : > { %v1106_v44 = vpop.f32.mrf.mxu2 }
 0x3ba   : > { %v1107_v55 = vadd.f32 %v1106_v44, %v993_v33  ;;  %v1086_v33 = vadd.f32 %v4129_v45, %v4121_v11  ;;  %v1145_v44 = vmul.f32 %v4193_v43, %v4193_v43 }
 0x3bc   : > { %v4202_v50 = vadd.f32 %v4137_v41, %v1107_v55 }
 0x3c1   : > { %v1109_v51 = vpop.f32.mrf.mxu2 }
 0x3c2   : > { %v1110_v29 = vadd.f32 %v1109_v51, %v996_v27  ;;  %v4196_v27 = vadd.f32 %v4137_v41, %v1095_v48  ;;  %v1098_v51 = vadd.f32 %v4135_v1, %v4133_v54  ;;  %v1089_v1 = vadd.f32 %v4131_v49, %v4123_v6 }
 0x3c4   : > { %v4140_v59 = vadd.f32 %v4137_v41, %v1110_v29  ;;  %v1153_v29 = vmul.f32 %v4202_v50, %v4202_v50  ;;  %v4220_v11 = vadd.f32 %v4137_v41, %v1098_v51 }
 0x3c6   : > { %v1154_v37 = vmul.f32 %v4140_v59, %v4140_v59  ;;  %v1187_v45 = vsel %vm570_vm1, %v1153_v29, 0.0 }
 0x3c8   : > { %v1190_v52 = vsel %vm570_vm1, %v1154_v37, 0.0  ;;  %v4215_v37 = vadd.f32 %v4137_v41, %v1086_v33 }
 0x3c9   : > { %1191 = vadd.xlane.f32.xlu0 %v1190_v52  ;;  %v1112_v58 = vpop.f32.mrf.mxu2  ;;  %v1163_v52 = vsel %vm570_vm1, %v1145_v44, 0.0 }
 0x3ca   : > { %v1113_v35 = vadd.f32 %v1112_v58, %v999_v36  ;;  %v1149_v36 = vmul.f32 %v4196_v27, %v4196_v27  ;;  %v1146_v54 = vmul.f32 %v4215_v37, %v4215_v37 }
 0x3cc   : > { %v4146_v32 = vadd.f32 %v4137_v41, %v1113_v35  ;;  %v1175_v58 = vsel %vm570_vm1, %v1149_v36, 0.0  ;;  %v1150_v35 = vmul.f32 %v4220_v11, %v4220_v11 }
 0x3ce   : > { %v1155_v9 = vmul.f32 %v4146_v32, %v4146_v32 }
 0x3d0   : > { %v1193_v0 = vsel %vm570_vm1, %v1155_v9, 0.0  ;;  %v4231_v9 = vadd.f32 %v4137_v41, %v1089_v1 }
 0x3d1   : > { %1194 = vadd.xlane.f32.xlu2 %v1193_v0  ;;  %v1115_v2 = vpop.f32.mrf.mxu2  ;;  %v1178_v0 = vsel %vm570_vm1, %v1150_v35, 0.0 }
 0x3d2   : > { %v1116_v5 = vadd.f32 %v1115_v2, %v1002_v39  ;;  %v1166_v39 = vsel %vm570_vm1, %v1146_v54, 0.0  ;;  %v1080_v2 = vadd.f32 %v4125_v56, %v4114_v63 }
 0x3d4   : > { %v4152_v30 = vadd.f32 %v4137_v41, %v1116_v5  ;;  %v1147_v5 = vmul.f32 %v4231_v9, %v4231_v9  ;;  %v4239_v6 = vadd.f32 %v4137_v41, %v1080_v2 }
 0x3d6   : > { %v1156_v16 = vmul.f32 %v4152_v30, %v4152_v30  ;;  %v1169_v49 = vsel %vm570_vm1, %v1147_v5, 0.0 }
 0x3d8   : > { %v1196_v17 = vsel %vm570_vm1, %v1156_v16, 0.0 }
 0x3d9   : > { %1197 = vadd.xlane.f32.xlu1 %v1196_v17  ;;  %v1118_v18 = vpop.f32.mrf.mxu2 }
 0x3da   : > { %v1119_v19 = vadd.f32 %v1118_v18, %v1005_v8  ;;  %v1144_v8 = vmul.f32 %v4239_v6, %v4239_v6 }
 0x3dc   : > { %v4158_v21 = vadd.f32 %v4137_v41, %v1119_v19  ;;  %v1160_v16 = vsel %vm570_vm1, %v1144_v8, 0.0 }
 0x3de   : > { %v1157_v22 = vmul.f32 %v4158_v21, %v4158_v21 }
 0x3e0   : > { %v1199_v25 = vsel %vm570_vm1, %v1157_v22, 0.0 }
 0x3e1   : > { %1200 = vadd.xlane.f32.xlu0 %v1199_v25  ;;  %v1121_v57 = vpop.f32.mrf.mxu2 }
 0x3e2   : > { %v1122_v47 = vadd.f32 %v1121_v57, %v1008_v23 }
 0x3e4   : > { %v4167_v4 = vadd.f32 %v4137_v41, %v1122_v47 }
 0x3e6   : > { %v1158_v40 = vmul.f32 %v4167_v4, %v4167_v4 }
 0x3e8   : > { %v1202_v42 = vsel %vm570_vm1, %v1158_v40, 0.0 }
 0x3e9   : > { %1182 = vadd.xlane.f32.xlu0 %v1181_v28  ;;  %1203 = vadd.xlane.f32.xlu2 %v1202_v42  ;;  %v1124_v60 = vpop.f32.mrf.mxu2 }
 0x3ea   : > { %v1125_v15 = vadd.f32 %v1124_v60, %v1011_v62 }
 0x3ec   : > { %v4184_v31 = vadd.f32 %v4137_v41, %v1125_v15 }
 0x3ee   : > { %v1159_v61 = vmul.f32 %v4184_v31, %v4184_v31 }
 0x3f0   : > { %v1205_v34 = vsel %vm570_vm1, %v1159_v61, 0.0 }
 0x3f1   : > { %1173 = vadd.xlane.f32.xlu0 %v1172_v53  ;;  %1185 = vadd.xlane.f32.xlu2 %v1184_v38 }
 0x3f2   : > { %1206 = vadd.xlane.f32.xlu1 %v1205_v34 }
 0x3f9   : > { %1164 = vadd.xlane.f32.xlu0 %v1163_v52  ;;  %1176 = vadd.xlane.f32.xlu2 %v1175_v58 }
 0x3fa   : > { %1188 = vadd.xlane.f32.xlu1 %v1187_v45 }
 0x401   : > { %1167 = vadd.xlane.f32.xlu2 %v1166_v39 }
 0x402   : > { %1179 = vadd.xlane.f32.xlu1 %v1178_v0 }
 0x40a   : > { %1170 = vadd.xlane.f32.xlu1 %v1169_v49 }
 0x412   : > { %1161 = vadd.xlane.f32.xlu1 %v1160_v16 }
 0x43c   : > { %v1192_v17 = vpop.xlane.xlu0 %1191 }
 0x43d   : > { %v1218_v18 = vmax.f32 %v1192_v17, 1e-24 }
 0x43f   : > { %3097 = vrsqrt.f32 %v1218_v18  ;;  %vm1330_vm9 = vweird.f32 %v1218_v18 }
 0x444   : > { %v1195_v19 = vpop.xlane.xlu2 %1194 }
 0x445   : > { %v4245_v63 = vmax.f32 %v1195_v19, 1e-24  ;;  %v4250_v41 = vpop.eup %3097 }
 0x446   : > { %v1325_v25 = vmul.f32 %v4250_v41, %v1218_v18  ;;  %vm1331_vm8 = vweird.f32 %v4250_v41 }
 0x447   : > { %3099 = vrsqrt.f32 %v4245_v63  ;;  %vm4300_vm10 = vmor %vm1330_vm9, %vm1331_vm8  ;;  %vm1340_vm11 = vweird.f32 %v4245_v63 }
 0x448   : > { %v1326_v40 = vmul.f32 %v4250_v41, %v1325_v25 }
 0x44a   : > { %v1327_v60 = vmul.f32 0.5, %v1326_v40 }
 0x44c   : > { %v1198_v20 = vpop.xlane.xlu1 %1197  ;;  %v1328_v33 = vsub.f32 1.5, %v1327_v60 }
 0x44d   : > { %v4252_v23 = vmax.f32 %v1198_v20, 1e-24  ;;  %v4256_v57 = vpop.eup %3099 }
 0x44e   : > { %v1335_v28 = vmul.f32 %v4256_v57, %v4245_v63  ;;  %v1329_v1 = vmul.f32 %v4250_v41, %v1328_v33  ;;  %vm1341_vm12 = vweird.f32 %v4256_v57 }
 0x44f   : > { %vm1350_vm13 = vweird.f32 %v4252_v23  ;;  %vm4330_vm14 = vmor %vm1340_vm11, %vm1341_vm12 }
 0x450   : > { %v1336_v15 = vmul.f32 %v4256_v57, %v1335_v28  ;;  %v1333_v25 = vsel %vm4300_vm10, %v4250_v41, %v1329_v1 }
 0x452   : > { %v1337_v44 = vmul.f32 0.5, %v1336_v15 }
 0x454   : > { %v1201_v56 = vpop.xlane.xlu0 %1200  ;;  %v1338_v45 = vsub.f32 1.5, %v1337_v44 }
 0x455   : > { %v4247_v22 = vmax.f32 %v1201_v56, 1e-24 }
 0x456   : > { %v4312_v20 = vmul.f32 %v4256_v57, %v1338_v45 }
 0x457   : > { %3101 = vrsqrt.f32 %v4247_v22  ;;  %vm1360_vm3 = vweird.f32 %v4247_v22 }
 0x458   : > { %3103 = vrsqrt.f32 %v4252_v23  ;;  %v1343_v63 = vsel %vm4330_vm14, %v4256_v57, %v4312_v20  ;;  %v1487_v20 = vld [vmem:[#allocation2 + $0x80] sm:$0xff] }
 0x45c   : > { %v1183_v47 = vpop.xlane.xlu0 %1182  ;;  %v1204_v12 = vpop.xlane.xlu2 %1203 }
 0x45d   : > { %v4259_v26 = vmax.f32 %v1204_v12, 1e-24  ;;  %v4261_v7 = vpop.eup %3101  ;;  %v4272_v13 = vmax.f32 %v1183_v47, 1e-24 }
 0x45e   : > { %v4267_v42 = vpop.eup %3103  ;;  %v1355_v62 = vmul.f32 %v4261_v7, %v4247_v22  ;;  %vm1361_vm15 = vweird.f32 %v4261_v7 }
 0x45f   : > { %3105 = vrsqrt.f32 %v4259_v26  ;;  %v1345_v3 = vmul.f32 %v4267_v42, %v4252_v23  ;;  %vm1351_vm2 = vweird.f32 %v4267_v42  ;;  %vm4352_vm5 = vmor %vm1360_vm3, %vm1361_vm15  ;;  %vm1370_vm6 = vweird.f32 %v4259_v26 }
 0x460   : > { %v1356_v38 = vmul.f32 %v4261_v7, %v1355_v62  ;;  %3107 = vrsqrt.f32 %v4272_v13  ;;  %vm4387_vm10 = vmor %vm1350_vm13, %vm1351_vm2 }
 0x461   : > { %v1346_v51 = vmul.f32 %v4267_v42, %v1345_v3 }
 0x462   : > { %v1357_v52 = vmul.f32 0.5, %v1356_v38 }
 0x463   : > { %v1347_v0 = vmul.f32 0.5, %v1346_v51 }
 0x464   : > { %v1174_v48 = vpop.xlane.xlu0 %1173  ;;  %v1186_v10 = vpop.xlane.xlu2 %1185  ;;  %v1358_v17 = vsub.f32 1.5, %v1357_v52 }
 0x465   : > { %v4276_v55 = vmax.f32 %v1186_v10, 1e-24  ;;  %v1207_v61 = vpop.xlane.xlu1 %1206  ;;  %v4278_v53 = vpop.eup %3105  ;;  %v4290_v58 = vmax.f32 %v1174_v48, 1e-24  ;;  %v1348_v28 = vsub.f32 1.5, %v1347_v0  ;;  %v4338_v48 = vmul.f32 %v1333_v25, %v4140_v59  ;;  %v1488_v0 = vld [vmem:[#allocation2 + $0x88] sm:$0xff] }
 0x466   : > { %v4281_v34 = vmax.f32 %v1207_v61, 1e-24  ;;  %v1365_v36 = vmul.f32 %v4278_v53, %v4259_v26  ;;  %v4294_v39 = vpop.eup %3107  ;;  %v1359_v15 = vmul.f32 %v4261_v7, %v1358_v17  ;;  %vm1371_vm4 = vweird.f32 %v4278_v53  ;;  %1550 = vmatpush.msra.mxu3 %v1488_v0 }
 0x467   : > { %3109 = vrsqrt.f32 %v4276_v55  ;;  %v1295_v62 = vmul.f32 %v4294_v39, %v4272_v13  ;;  %vm4373_vm8 = vmor %vm1370_vm6, %vm1371_vm4  ;;  %vm1301_vm12 = vweird.f32 %v4294_v39  ;;  %vm1310_vm2 = vweird.f32 %v4276_v55 }
 0x468   : > { %v1366_v29 = vmul.f32 %v4278_v53, %v1365_v36  ;;  %3111 = vrsqrt.f32 %v4281_v34  ;;  %v1349_v36 = vmul.f32 %v4267_v42, %v1348_v28  ;;  %v1363_v45 = vsel %vm4352_vm5, %v4261_v7, %v1359_v15  ;;  %1551 = vmatpush.msra.mxu3 %v1487_v20 }
 0x469   : > { %3113 = vrsqrt.f32 %v4290_v58  ;;  %v1296_v22 = vmul.f32 %v4294_v39, %v1295_v62  ;;  %vm1380_vm9 = vweird.f32 %v4281_v34  ;;  %v4401_v23 = vmul.f32 %v1363_v45, %v4158_v21 }
 0x46a   : > { %v1367_v54 = vmul.f32 0.5, %v1366_v29  ;;  %v1410_v28 = vmax.f32 %v4338_v48, 0.0  ;;  %vm1300_vm4 = vweird.f32 %v4272_v13  ;;  %v3243_v48 = vld [vmem:[%s3486_s11 + $0x60] sm:$0xff] }
 0x46b   : > { %v1297_v17 = vmul.f32 0.5, %v1296_v22  ;;  %vm4476_vm6 = vmor %vm1300_vm4, %vm1301_vm12 }
 0x46c   : > { %v1177_v35 = vpop.xlane.xlu2 %1176  ;;  %v1165_v2 = vpop.xlane.xlu0 %1164  ;;  %v1368_v18 = vsub.f32 1.5, %v1367_v54 }
 0x46d   : > { %v4296_v5 = vmax.f32 %v1177_v35, 1e-24  ;;  %v1189_v49 = vpop.xlane.xlu1 %1188  ;;  %v4298_v8 = vpop.eup %3109  ;;  %v4321_v40 = vmax.f32 %v1165_v2, 1e-24 }
 0x46e   : > { %v4306_v19 = vmax.f32 %v1189_v49, 1e-24  ;;  %v4308_v56 = vpop.eup %3111  ;;  %v1305_v47 = vmul.f32 %v4298_v8, %v4276_v55  ;;  %v1369_v38 = vmul.f32 %v4278_v53, %v1368_v18  ;;  %v1353_v18 = vsel %vm4387_vm10, %v4267_v42, %v1349_v36 }
 0x46f   : > { %v1375_v12 = vmul.f32 %v4308_v56, %v4281_v34  ;;  %3115 = vrsqrt.f32 %v4296_v5  ;;  %v4347_v10 = vpop.eup %3113  ;;  %vm1381_vm7 = vweird.f32 %v4308_v56  ;;  %v4420_v42 = vmul.f32 %v1343_v63, %v4146_v32 }
 0x470   : > { %3117 = vrsqrt.f32 %v4306_v19  ;;  %v1306_v3 = vmul.f32 %v4298_v8, %v1305_v47  ;;  %v1265_v1 = vmul.f32 %v4347_v10, %v4290_v58  ;;  %v1373_v16 = vsel %vm4373_vm8, %v4278_v53, %v1369_v38  ;;  %vm1382_vm11 = vmor %vm1380_vm9, %vm1381_vm7 }
 0x471   : > { %v1376_v60 = vmul.f32 %v4308_v56, %v1375_v12  ;;  %3119 = vrsqrt.f32 %v4321_v40  ;;  %v4417_v41 = vmul.f32 %v1373_v16, %v4167_v4  ;;  %v1413_v63 = vmax.f32 %v4401_v23, 0.0 }
 0x472   : > { %v1307_v2 = vmul.f32 0.5, %v1306_v3  ;;  %v1266_v62 = vmul.f32 %v4347_v10, %v1265_v1  ;;  %vm1311_vm13 = vweird.f32 %v4298_v8  ;;  %vm1320_vm15 = vweird.f32 %v4306_v19 }
 0x473   : > { %v1377_v61 = vmul.f32 0.5, %v1376_v60  ;;  %v1486_v60 = vld [vmem:[#allocation2 + $0x78] sm:$0xff]  ;;  %v1414_v45 = vmax.f32 %v4417_v41, 0.0  ;;  %vm4464_vm5 = vmor %vm1310_vm2, %vm1311_vm13  ;;  %vm1271_vm7 = vweird.f32 %v4347_v10  ;;  %vm1280_vm10 = vweird.f32 %v4296_v5 }
 0x474   : > { %v1168_v59 = vpop.xlane.xlu2 %1167  ;;  %v1308_v15 = vsub.f32 1.5, %v1307_v2  ;;  %1552 = vmatpush.msra.mxu3 %v1486_v60  ;;  %vm1270_vm13 = vweird.f32 %v4290_v58 }
 0x475   : > { %v4358_v44 = vmax.f32 %v1168_v59, 1e-24  ;;  %v1180_v57 = vpop.xlane.xlu1 %1179  ;;  %v4361_v51 = vpop.eup %3115  ;;  %v1378_v29 = vsub.f32 1.5, %v1377_v61  ;;  %v4424_v61 = vmul.f32 %v1353_v18, %v4152_v30 }
 0x476   : > { %v4364_v52 = vmax.f32 %v1180_v57, 1e-24  ;;  %v4369_v54 = vpop.eup %3117  ;;  %v1275_v35 = vmul.f32 %v4361_v51, %v4296_v5  ;;  %vm1281_vm8 = vweird.f32 %v4361_v51 }
 0x477   : > { %3121 = vrsqrt.f32 %v4358_v44  ;;  %v1379_v49 = vmul.f32 %v4308_v56, %v1378_v29  ;;  %v1315_v34 = vmul.f32 %v4369_v54, %v4306_v19  ;;  %v4406_v25 = vpop.eup %3119  ;;  %v1267_v29 = vmul.f32 0.5, %v1266_v62 }
 0x478   : > { %3123 = vrsqrt.f32 %v4364_v52  ;;  %v1276_v53 = vmul.f32 %v4361_v51, %v1275_v35  ;;  %v1235_v4 = vmul.f32 %v4406_v25, %v4321_v40  ;;  %vm1321_vm14 = vweird.f32 %v4369_v54 }
 0x479   : > { %v1383_v47 = vsel %vm1382_vm11, %v4308_v56, %v1379_v49  ;;  %v1316_v12 = vmul.f32 %v4369_v54, %v1315_v34  ;;  %v1485_v56 = vld [vmem:[#allocation2 + $0x70] sm:$0xff]  ;;  %v1309_v35 = vmul.f32 %v4298_v8, %v1308_v15  ;;  %vm4455_vm3 = vmor %vm1320_vm15, %vm1321_vm14  ;;  %v1268_v19 = vsub.f32 1.5, %v1267_v29 }
 0x47a   : > { %v4414_v21 = vmul.f32 %v1383_v47, %v4184_v31  ;;  %v1298_v31 = vsub.f32 1.5, %v1297_v17  ;;  %v1277_v33 = vmul.f32 0.5, %v1276_v53  ;;  %1553 = vmatpush.msra.mxu3 %v1485_v56  ;;  %v1236_v0 = vmul.f32 %v4406_v25, %v1235_v4  ;;  %vm4507_vm11 = vmor %vm1280_vm10, %vm1281_vm8 }
 0x47b   : > { %v1317_v3 = vmul.f32 0.5, %v1316_v12  ;;  %v1411_v17 = vmax.f32 %v4420_v42, 0.0  ;;  %v1412_v55 = vmax.f32 %v4424_v61, 0.0  ;;  %v1313_v12 = vsel %vm4464_vm5, %v4298_v8, %v1309_v35  ;;  %vm4523_vm15 = vmor %vm1270_vm13, %vm1271_vm7  ;;  %v3245_v42 = vld [vmem:[%s3486_s11 + $0x70] sm:$0xff]  ;;  %v3246_v61 = vld [vmem:[%s3486_s11 + $0x78] sm:$0xff] }
 0x47c   : > { %v1415_v32 = vmax.f32 %v4414_v21, 0.0  ;;  %v1299_v2 = vmul.f32 %v4294_v39, %v1298_v31  ;;  %v1278_v49 = vsub.f32 1.5, %v1277_v33  ;;  %v1237_v62 = vmul.f32 0.5, %v1236_v0 }
 0x47d   : > { %v4426_v59 = vpop.eup %3121  ;;  %v1171_v38 = vpop.xlane.xlu1 %1170  ;;  %v1318_v22 = vsub.f32 1.5, %v1317_v3  ;;  %vm1290_vm12 = vweird.f32 %v4364_v52  ;;  %vm1241_vm4 = vweird.f32 %v4406_v25  ;;  %vm1250_vm5 = vweird.f32 %v4358_v44 }
 0x47e   : > { %v1245_v57 = vmul.f32 %v4426_v59, %v4358_v44  ;;  %v4434_v36 = vmax.f32 %v1171_v38, 1e-24  ;;  %v4436_v30 = vpop.eup %3123  ;;  %1416 = vmatpush.msra.mxu0 %v1415_v32  ;;  %v1303_v56 = vsel %vm4476_vm6, %v4294_v39, %v1299_v2  ;;  %v1279_v8 = vmul.f32 %v4361_v51, %v1278_v49  ;;  %v3238_v38 = vld [vmem:[%s3486_s11 + $0x38] sm:$0xff] }
 0x47f   : > { %v1285_v1 = vmul.f32 %v4436_v30, %v4364_v52  ;;  %v1319_v7 = vmul.f32 %v4369_v54, %v1318_v22  ;;  %vm1291_vm9 = vweird.f32 %v4436_v30  ;;  %v1269_v39 = vmul.f32 %v4347_v10, %v1268_v19  ;;  %v1481_v52 = vld [vmem:[#allocation2 + $0x50] sm:$0xff] }
 0x480   : > { %v1246_v26 = vmul.f32 %v4426_v59, %v1245_v57  ;;  %3125 = vrsqrt.f32 %v4434_v36  ;;  %1417 = vmatpush.msra.mxu0 %v1414_v45  ;;  %vm1292_vm14 = vmor %vm1290_vm12, %vm1291_vm9  ;;  %v4519_v57 = vmul.f32 %v1303_v56, %v4163_v24  ;;  %v1238_v29 = vsub.f32 1.5, %v1237_v62 }
 0x481   : > { %v1286_v16 = vmul.f32 %v4436_v30, %v1285_v1  ;;  %v1323_v20 = vsel %vm4455_vm3, %v4369_v54, %v1319_v7  ;;  %v1283_v58 = vsel %vm4507_vm11, %v4361_v51, %v1279_v8  ;;  %v1273_v0 = vsel %vm4523_vm15, %v4347_v10, %v1269_v39  ;;  %v3235_v8 = vld [vmem:[%s3486_s11 + $0x20] sm:$0xff]  ;;  %v3237_v39 = vld [vmem:[%s3486_s11 + $0x30] sm:$0xff] }
 0x482   : > { %1418 = vmatpush.msra.mxu0 %v1413_v63  ;;  %v1247_v47 = vmul.f32 0.5, %v1246_v26  ;;  %v4488_v60 = vmul.f32 %v1323_v20, %v4202_v50  ;;  %v4502_v50 = vmul.f32 %v1313_v12, %v4177_v14  ;;  %vm1251_vm2 = vweird.f32 %v4426_v59 }
 0x483   : > { %v1287_v53 = vmul.f32 0.5, %v1286_v16  ;;  %v1407_v51 = vmax.f32 %v4519_v57, 0.0  ;;  %v1389_v2 = vmul.f32 %v1283_v58, %v4196_v27  ;;  %v1239_v10 = vmul.f32 %v4406_v25, %v1238_v29  ;;  %vm4550_vm6 = vmor %vm1250_vm5, %vm1251_vm2  ;;  %v3241_v57 = vld [vmem:[%s3486_s11 + $0x50] sm:$0xff] }
 0x484   : > { %1419 = vmatpush.msra.mxu0 %v1412_v55  ;;  %v1248_v33 = vsub.f32 1.5, %v1247_v47  ;;  %v1409_v22 = vmax.f32 %v4488_v60, 0.0  ;;  %v1408_v24 = vmax.f32 %v4502_v50, 0.0  ;;  %vm1260_vm7 = vweird.f32 %v4434_v36  ;;  %v3242_v50 = vld [vmem:[%s3486_s11 + $0x58] sm:$0xff]  ;;  %v1483_v60 = vld [vmem:[#allocation2 + $0x60] sm:$0xff] }
 0x485   : > { %v1162_v54 = vpop.xlane.xlu1 %1161  ;;  %v1288_v3 = vsub.f32 1.5, %v1287_v53  ;;  %vm1240_vm8 = vweird.f32 %v4321_v40 }
 0x486   : > { %v3126_v15 = vpop.eup %3125  ;;  %v4494_v31 = vmax.f32 %v1162_v54, 1e-24  ;;  %1420 = vmatpush.msra.mxu0 %v1411_v17  ;;  %vm1242_vm10 = vmor %vm1240_vm8, %vm1241_vm4 }
 0x487   : > { %v1255_v4 = vmul.f32 %v3126_v15, %v4434_v36  ;;  %v1289_v5 = vmul.f32 %v4436_v30, %v1288_v3  ;;  %vm1261_vm3 = vweird.f32 %v3126_v15  ;;  %v1405_v36 = vmax.f32 %v1389_v2, 0.0  ;;  %v3232_v3 = vld [vmem:[%s3486_s11 + $0x8] sm:$0xff] }
 0x488   : > { %3127 = vrsqrt.f32 %v4494_v31  ;;  %1421 = vmatpush.msra.mxu0 %v1410_v28  ;;  %vm1262_vm9 = vmor %vm1260_vm7, %vm1261_vm3  ;;  %v1243_v13 = vsel %vm1242_vm10, %v4406_v25, %v1239_v10  ;;  %vm1230_vm12 = vweird.f32 %v4494_v31 }
 0x489   : > { %v1256_v14 = vmul.f32 %v3126_v15, %v1255_v4  ;;  %v1293_v26 = vsel %vm1292_vm14, %v4436_v30, %v1289_v5  ;;  %v1249_v30 = vmul.f32 %v4426_v59, %v1248_v33  ;;  %v3236_v4 = vld [vmem:[%s3486_s11 + $0x28] sm:$0xff]  ;;  %v3239_v5 = vld [vmem:[%s3486_s11 + $0x40] sm:$0xff] }
 0x48a   : > { %1422 = vmatpush.msra.mxu0 %v1409_v22  ;;  %v4535_v35 = vmul.f32 %v1293_v26, %v4220_v11  ;;  %v1388_v11 = vmul.f32 %v1273_v0, %v4174_v46  ;;  %v1484_v33 = vld [vmem:[#allocation2 + $0x68] sm:$0xff] }
 0x48b   : > { %v1257_v1 = vmul.f32 0.5, %v1256_v14  ;;  %v1253_v46 = vsel %vm4550_vm6, %v4426_v59, %v1249_v30  ;;  %v1385_v59 = vmul.f32 %v1243_v13, %v4193_v43  ;;  %v3231_v43 = vld [vmem:[%s3486_s11] sm:$0xff]  ;;  %1663 = vmatpush.msra.mxu1 %v1484_v33  ;;  %v3240_v14 = vld [vmem:[%s3486_s11 + $0x48] sm:$0xff] }
 0x48c   : > { %1423 = vmatpush.msra.mxu0 %v1408_v24  ;;  %v1406_v27 = vmax.f32 %v4535_v35, 0.0  ;;  %v1404_v53 = vmax.f32 %v1388_v11, 0.0  ;;  %v1386_v40 = vmul.f32 %v1253_v46, %v4215_v37 }
 0x48d   : > { %v1258_v7 = vsub.f32 1.5, %v1257_v1  ;;  %v1401_v25 = vmax.f32 %v1385_v59, 0.0  ;;  %1664 = vmatpush.msra.mxu1 %v1483_v60 }
 0x48e   : > { %v3128_v49 = vpop.eup %3127  ;;  %1424 = vmatpush.msra.mxu0 %v1407_v51  ;;  %v1402_v54 = vmax.f32 %v1386_v40, 0.0 }
 0x48f   : > { %v1225_v16 = vmul.f32 %v3128_v49, %v4494_v31  ;;  %v1259_v19 = vmul.f32 %v3126_v15, %v1258_v7  ;;  %vm1231_vm11 = vweird.f32 %v3128_v49  ;;  %v3233_v31 = vld [vmem:[%s3486_s11 + $0x10] sm:$0xff] }
 0x490   : > { %1425 = vmatpush.msra.mxu0 %v1406_v27  ;;  %vm1232_vm13 = vmor %vm1230_vm12, %vm1231_vm11 }
 0x491   : > { %v1226_v44 = vmul.f32 %v3128_v49, %v1225_v16  ;;  %v1263_v18 = vsel %vm1262_vm9, %v3126_v15, %v1259_v19 }
 0x492   : > { %v1387_v20 = vmul.f32 %v1263_v18, %v4231_v9  ;;  %1426 = vmatpush.msra.mxu0 %v1405_v36 }
 0x493   : > { %v1227_v47 = vmul.f32 0.5, %v1226_v44 }
 0x494   : > { %v1403_v12 = vmax.f32 %v1387_v20, 0.0  ;;  %1427 = vmatpush.msra.mxu0 %v1404_v53 }
 0x495   : > { %v1228_v62 = vsub.f32 1.5, %v1227_v47 }
 0x496   : > { %1428 = vmatpush.msra.mxu0 %v1403_v12 }
 0x497   : > { %v1229_v9 = vmul.f32 %v3128_v49, %v1228_v62 }
 0x498   : > { %1429 = vmatpush.msra.mxu0 %v1402_v54 }
 0x499   : > { %v1233_v56 = vsel %vm1232_vm13, %v3128_v49, %v1229_v9  ;;  %v4656_v9 = vld [vmem:[#allocation2 + $0xc2] ss:$0 sm:$0xff] }
 0x49a   : > { %v1384_v37 = vmul.f32 %v1233_v56, %v4239_v6  ;;  %1430 = vmatpush.msra.mxu0 %v1401_v25  ;;  %v3234_v6 = vld [vmem:[%s3486_s11 + $0x18] sm:$0xff] }
 0x49c   : > { %v1400_v15 = vmax.f32 %v1384_v37, 0.0 }
 0x49e   : > { %1431 = vmatpush.msra.mxu0 %v1400_v15  ;;  %2913 = vmatmul.msk.f32.vlgmr.msra.gmra.mxu3 %vm570_vm1, %v1400_v15 }
 0x49f   : > { %1432 = vmatmul.f32.vlgmr.msra.gmra.mxu0 %v3231_v43 }
 0x4a6   : > { %2914 = vmatmul.msk.f32.gmra.mxu3 %vm570_vm1, %v1401_v25 }
 0x4a7   : > { %1435 = vmatmul.f32.gmra.mxu0 %v3232_v3 }
 0x4ae   : > { %2915 = vmatmul.msk.f32.gmra.mxu3 %vm570_vm1, %v1402_v54 }
 0x4af   : > { %1438 = vmatmul.f32.gmra.mxu0 %v3233_v31 }
 0x4b6   : > { %2916 = vmatmul.msk.f32.gmra.mxu3 %vm570_vm1, %v1403_v12 }
 0x4b7   : > { %1441 = vmatmul.f32.gmra.mxu0 %v3234_v6 }
 0x4be   : > { %2917 = vmatmul.msk.f32.gmra.mxu3 %vm570_vm1, %v1404_v53 }
 0x4bf   : > { %1444 = vmatmul.f32.gmra.mxu0 %v3235_v8 }
 0x4c6   : > { %2918 = vmatmul.msk.f32.gmra.mxu3 %vm570_vm1, %v1405_v36 }
 0x4c7   : > { %1447 = vmatmul.f32.gmra.mxu0 %v3236_v4 }
 0x4ce   : > { %2919 = vmatmul.msk.f32.gmra.mxu3 %vm570_vm1, %v1406_v27 }
 0x4cf   : > { %1450 = vmatmul.f32.gmra.mxu0 %v3237_v39 }
 0x4d6   : > { %2920 = vmatmul.msk.f32.gmra.mxu3 %vm570_vm1, %v1407_v51 }
 0x4d7   : > { %1453 = vmatmul.f32.gmra.mxu0 %v3238_v38 }
 0x4de   : > { %2921 = vmatmul.msk.f32.gmra.mxu3 %vm570_vm1, %v1408_v24 }
 0x4df   : > { %1456 = vmatmul.f32.gmra.mxu0 %v3239_v5 }
 0x4e6   : > { %2922 = vmatmul.msk.f32.gmra.mxu3 %vm570_vm1, %v1409_v22  ;;  %v1482_v22 = vld [vmem:[#allocation2 + $0x58] sm:$0xff] }
 0x4e7   : > { %1459 = vmatmul.f32.gmra.mxu0 %v3240_v14  ;;  %1665 = vmatpush.msra.mxu1 %v1482_v22 }
 0x4e9   : > { %1666 = vmatpush.msra.mxu1 %v1481_v52 }
 0x4ee   : > { %2923 = vmatmul.msk.f32.gmra.mxu3 %vm570_vm1, %v1410_v28  ;;  %v3244_v28 = vld [vmem:[%s3486_s11 + $0x68] sm:$0xff] }
 0x4ef   : > { %1462 = vmatmul.f32.gmra.mxu0 %v3241_v57 }
 0x4f6   : > { %2924 = vmatmul.msk.f32.gmra.mxu3 %vm570_vm1, %v1411_v17 }
 0x4f7   : > { %1465 = vmatmul.f32.gmra.mxu0 %v3242_v50 }
 0x4fe   : > { %2925 = vmatmul.msk.f32.gmra.mxu3 %vm570_vm1, %v1412_v55 }
 0x4ff   : > { %1468 = vmatmul.f32.gmra.mxu0 %v3243_v48 }
 0x506   : > { %2926 = vmatmul.msk.f32.gmra.mxu3 %vm570_vm1, %v1413_v63 }
 0x507   : > { %1471 = vmatmul.f32.gmra.mxu0 %v3244_v28 }
 0x50e   : > { %2927 = vmatmul.msk.f32.gmra.mxu3 %vm570_vm1, %v1414_v45 }
 0x50f   : > { %1474 = vmatmul.f32.gmra.mxu0 %v3245_v42 }
 0x516   : > { %2928 = vmatmul.msk.f32.gmra.mxu3 %vm570_vm1, %v1415_v32 }
 0x517   : > { %1477 = vmatmul.f32.gmra.mxu0 %v3246_v61 }
 0x51c   : > { %v1433_v17 = vpop.f32.mrf.mxu0 }
 0x51d   : > { %2929 = vmatmul.msk.f32.vlgmr.msra.gmra.mxu1 %vm570_vm1, %v1433_v17 }
 0x521   : > { %v4632_v24 = vpop.f32.mrf.mxu3 }
 0x524   : > { %v1436_v23 = vpop.f32.mrf.mxu0 }
 0x525   : > { %2930 = vmatmul.msk.f32.gmra.mxu1 %vm570_vm1, %v1436_v23 }
 0x529   : > { %v4636_v30 = vpop.f32.mrf.mxu3 }
 0x52c   : > { %v1439_v63 = vpop.f32.mrf.mxu0 }
 0x52d   : > { %2931 = vmatmul.msk.f32.gmra.mxu1 %vm570_vm1, %v1439_v63 }
 0x531   : > { %v4639_v51 = vpop.f32.mrf.mxu3 }
 0x534   : > { %v1442_v41 = vpop.f32.mrf.mxu0 }
 0x535   : > { %2932 = vmatmul.msk.f32.gmra.mxu1 %vm570_vm1, %v1442_v41 }
 0x539   : > { %v4642_v49 = vpop.f32.mrf.mxu3 }
 0x53c   : > { %v1445_v45 = vpop.f32.mrf.mxu0 }
 0x53d   : > { %2933 = vmatmul.msk.f32.gmra.mxu1 %vm570_vm1, %v1445_v45 }
 0x541   : > { %v1567_v34 = vpop.f32.mrf.mxu3 }
 0x544   : > { %v1448_v21 = vpop.f32.mrf.mxu0 }
 0x545   : > { %2934 = vmatmul.msk.f32.gmra.mxu1 %vm570_vm1, %v1448_v21 }
 0x549   : > { %v1570_v27 = vpop.f32.mrf.mxu3 }
 0x54c   : > { %v1451_v32 = vpop.f32.mrf.mxu0 }
 0x54d   : > { %2935 = vmatmul.msk.f32.gmra.mxu1 %vm570_vm1, %v1451_v32 }
 0x551   : > { %v4652_v46 = vpop.f32.mrf.mxu3 }
 0x554   : > { %v1454_v55 = vpop.f32.mrf.mxu0 }
 0x555   : > { %2936 = vmatmul.msk.f32.gmra.mxu1 %vm570_vm1, %v1454_v55 }
 0x559   : > { %v1576_v36 = vpop.f32.mrf.mxu3 }
 0x55c   : > { %v1457_v29 = vpop.f32.mrf.mxu0 }
 0x55d   : > { %2937 = vmatmul.msk.f32.gmra.mxu1 %vm570_vm1, %v1457_v29 }
 0x561   : > { %v1579_v13 = vpop.f32.mrf.mxu3 }
 0x564   : > { %v1460_v26 = vpop.f32.mrf.mxu0 }
 0x565   : > { %2938 = vmatmul.msk.f32.gmra.mxu1 %vm570_vm1, %v1460_v26 }
 0x569   : > { %v1582_v53 = vpop.f32.mrf.mxu3 }
 0x56c   : > { %v1463_v58 = vpop.f32.mrf.mxu0 }
 0x56d   : > { %2939 = vmatmul.msk.f32.gmra.mxu1 %vm570_vm1, %v1463_v58 }
 0x571   : > { %v1585_v12 = vpop.f32.mrf.mxu3 }
 0x574   : > { %v1466_v1 = vpop.f32.mrf.mxu0 }
 0x575   : > { %2940 = vmatmul.msk.f32.gmra.mxu1 %vm570_vm1, %v1466_v1 }
 0x579   : > { %v1588_v59 = vpop.f32.mrf.mxu3 }
 0x57c   : > { %v1469_v35 = vpop.f32.mrf.mxu0 }
 0x57d   : > { %2941 = vmatmul.msk.f32.gmra.mxu1 %vm570_vm1, %v1469_v35 }
 0x581   : > { %v1591_v31 = vpop.f32.mrf.mxu3 }
 0x584   : > { %v1472_v0 = vpop.f32.mrf.mxu0 }
 0x585   : > { %2942 = vmatmul.msk.f32.gmra.mxu1 %vm570_vm1, %v1472_v0 }
 0x589   : > { %v1594_v5 = vpop.f32.mrf.mxu3 }
 0x58c   : > { %v1475_v7 = vpop.f32.mrf.mxu0 }
 0x58d   : > { %2943 = vmatmul.msk.f32.gmra.mxu1 %vm570_vm1, %v1475_v7 }
 0x591   : > { %v1597_v28 = vpop.f32.mrf.mxu3 }
 0x594   : > { %v1478_v2 = vpop.f32.mrf.mxu0 }
 0x595   : > { %2944 = vmatmul.msk.f32.gmra.mxu1 %vm570_vm1, %v1478_v2  ;;  %vm1749_vm1 = vcmask 130048  }
 0x599   : > { %v1600_v1 = vpop.f32.mrf.mxu3 }
 0x59a   : > { %v4644_v11 = vpop.f32.mrf.mxu1 }
 0x5a2   : > { %v4646_v10 = vpop.f32.mrf.mxu1 }
 0x5a3   : > { %v1672_v7 = vadd.f32 %v4646_v10, %v4636_v30 }
 0x5aa   : > { %v4648_v16 = vpop.f32.mrf.mxu1 }
 0x5b2   : > { %v4650_v19 = vpop.f32.mrf.mxu1 }
 0x5ba   : > { %v1680_v44 = vpop.f32.mrf.mxu1 }
 0x5bb   : > { %v1681_v63 = vadd.f32 %v1680_v44, %v1567_v34 }
 0x5bd   : > { %v4693_v55 = vadd.f32 %v4656_v9, %v1681_v63 }
 0x5bf   : > { %v1737_v44 = vmul.f32 %v4693_v55, %v4693_v55 }
 0x5c1   : > { %v1762_v30 = vsel %vm1749_vm1, %v1737_v44, 0.0 }
 0x5c2   : > { %v1683_v18 = vpop.f32.mrf.mxu1 }
 0x5c3   : > { %v1684_v2 = vadd.f32 %v1683_v18, %v1570_v27 }
 0x5ca   : > { %v4654_v20 = vpop.f32.mrf.mxu1 }
 0x5d2   : > { %v1689_v47 = vpop.f32.mrf.mxu1 }
 0x5d3   : > { %v1690_v22 = vadd.f32 %v1689_v47, %v1576_v36 }
 0x5d5   : > { %v4682_v42 = vadd.f32 %v4656_v9, %v1690_v22 }
 0x5d7   : > { %v1740_v21 = vmul.f32 %v4682_v42, %v4682_v42 }
 0x5d9   : > { %v1771_v26 = vsel %vm1749_vm1, %v1740_v21, 0.0 }
 0x5da   : > { %v1692_v40 = vpop.f32.mrf.mxu1 }
 0x5db   : > { %v1693_v41 = vadd.f32 %v1692_v40, %v1579_v13  ;;  %v4712_v40 = vadd.f32 %v4656_v9, %v1672_v7 }
 0x5dd   : > { %v4696_v29 = vadd.f32 %v4656_v9, %v1693_v41 }
 0x5df   : > { %v1741_v36 = vmul.f32 %v4696_v29, %v4696_v29 }
 0x5e1   : > { %v1774_v10 = vsel %vm1749_vm1, %v1741_v36, 0.0 }
 0x5e2   : > { %v1695_v62 = vpop.f32.mrf.mxu1 }
 0x5e3   : > { %v1696_v13 = vadd.f32 %v1695_v62, %v1582_v53  ;;  %v1675_v53 = vadd.f32 %v4648_v16, %v4639_v51  ;;  %v1734_v62 = vmul.f32 %v4712_v40, %v4712_v40 }
 0x5e5   : > { %v4721_v18 = vadd.f32 %v4656_v9, %v1696_v13 }
 0x5ea   : > { %v1698_v54 = vpop.f32.mrf.mxu1 }
 0x5eb   : > { %v1699_v25 = vadd.f32 %v1698_v54, %v1585_v12  ;;  %v4715_v12 = vadd.f32 %v4656_v9, %v1684_v2  ;;  %v1687_v54 = vadd.f32 %v4654_v20, %v4652_v46  ;;  %v1678_v20 = vadd.f32 %v4650_v19, %v4642_v49 }
 0x5ed   : > { %v4659_v56 = vadd.f32 %v4656_v9, %v1699_v25  ;;  %v1742_v25 = vmul.f32 %v4721_v18, %v4721_v18  ;;  %v4739_v51 = vadd.f32 %v4656_v9, %v1687_v54 }
 0x5ef   : > { %v1743_v37 = vmul.f32 %v4659_v56, %v4659_v56  ;;  %v1777_v16 = vsel %vm1749_vm1, %v1742_v25, 0.0 }
 0x5f1   : > { %v1780_v15 = vsel %vm1749_vm1, %v1743_v37, 0.0  ;;  %v4734_v37 = vadd.f32 %v4656_v9, %v1675_v53 }
 0x5f2   : > { %1781 = vadd.xlane.f32.xlu1 %v1780_v15  ;;  %v1701_v43 = vpop.f32.mrf.mxu1  ;;  %v1753_v15 = vsel %vm1749_vm1, %v1734_v62, 0.0 }
 0x5f3   : > { %v1702_v3 = vadd.f32 %v1701_v43, %v1588_v59  ;;  %v1738_v59 = vmul.f32 %v4715_v12, %v4715_v12  ;;  %v1735_v46 = vmul.f32 %v4734_v37, %v4734_v37 }
 0x5f5   : > { %v4665_v6 = vadd.f32 %v4656_v9, %v1702_v3  ;;  %v1765_v43 = vsel %vm1749_vm1, %v1738_v59, 0.0  ;;  %v1739_v3 = vmul.f32 %v4739_v51, %v4739_v51 }
 0x5f7   : > { %v1744_v8 = vmul.f32 %v4665_v6, %v4665_v6 }
 0x5f9   : > { %v1783_v4 = vsel %vm1749_vm1, %v1744_v8, 0.0  ;;  %v4750_v8 = vadd.f32 %v4656_v9, %v1678_v20 }
 0x5fa   : > { %1784 = vadd.xlane.f32.xlu0 %v1783_v4  ;;  %v1704_v39 = vpop.f32.mrf.mxu1  ;;  %v1768_v4 = vsel %vm1749_vm1, %v1739_v3, 0.0 }
 0x5fb   : > { %v1705_v38 = vadd.f32 %v1704_v39, %v1591_v31  ;;  %v1756_v31 = vsel %vm1749_vm1, %v1735_v46, 0.0  ;;  %v1669_v39 = vadd.f32 %v4644_v11, %v4632_v24 }
 0x5fd   : > { %v4671_v33 = vadd.f32 %v4656_v9, %v1705_v38  ;;  %v1736_v38 = vmul.f32 %v4750_v8, %v4750_v8  ;;  %v4758_v49 = vadd.f32 %v4656_v9, %v1669_v39 }
 0x5ff   : > { %v1745_v14 = vmul.f32 %v4671_v33, %v4671_v33  ;;  %v1759_v19 = vsel %vm1749_vm1, %v1736_v38, 0.0 }
 0x601   : > { %v1786_v57 = vsel %vm1749_vm1, %v1745_v14, 0.0 }
 0x602   : > { %1787 = vadd.xlane.f32.xlu2 %v1786_v57  ;;  %v1707_v50 = vpop.f32.mrf.mxu1 }
 0x603   : > { %v1708_v60 = vadd.f32 %v1707_v50, %v1594_v5  ;;  %v1733_v5 = vmul.f32 %v4758_v49, %v4758_v49 }
 0x605   : > { %v4677_v52 = vadd.f32 %v4656_v9, %v1708_v60  ;;  %v1750_v14 = vsel %vm1749_vm1, %v1733_v5, 0.0 }
 0x607   : > { %v1746_v48 = vmul.f32 %v4677_v52, %v4677_v52 }
 0x609   : > { %v1789_v61 = vsel %vm1749_vm1, %v1746_v48, 0.0 }
 0x60a   : > { %1790 = vadd.xlane.f32.xlu1 %v1789_v61  ;;  %v1710_v17 = vpop.f32.mrf.mxu1 }
 0x60b   : > { %v1711_v23 = vadd.f32 %v1710_v17, %v1597_v28 }
 0x60d   : > { %v4686_v45 = vadd.f32 %v4656_v9, %v1711_v23 }
 0x60f   : > { %v1747_v32 = vmul.f32 %v4686_v45, %v4686_v45 }
 0x611   : > { %v1792_v58 = vsel %vm1749_vm1, %v1747_v32, 0.0 }
 0x612   : > { %1772 = vadd.xlane.f32.xlu1 %v1771_v26  ;;  %1793 = vadd.xlane.f32.xlu0 %v1792_v58  ;;  %v1713_v35 = vpop.f32.mrf.mxu1 }
 0x613   : > { %v1714_v0 = vadd.f32 %v1713_v35, %v1600_v1 }
 0x615   : > { %v4703_v34 = vadd.f32 %v4656_v9, %v1714_v0 }
 0x617   : > { %v1748_v47 = vmul.f32 %v4703_v34, %v4703_v34 }
 0x619   : > { %v1795_v27 = vsel %vm1749_vm1, %v1748_v47, 0.0 }
 0x61a   : > { %1763 = vadd.xlane.f32.xlu1 %v1762_v30  ;;  %1775 = vadd.xlane.f32.xlu0 %v1774_v10 }
 0x61b   : > { %1796 = vadd.xlane.f32.xlu2 %v1795_v27 }
 0x622   : > { %1754 = vadd.xlane.f32.xlu1 %v1753_v15  ;;  %1766 = vadd.xlane.f32.xlu0 %v1765_v43 }
 0x623   : > { %1778 = vadd.xlane.f32.xlu2 %v1777_v16 }
 0x62a   : > { %1757 = vadd.xlane.f32.xlu0 %v1756_v31 }
 0x62b   : > { %1769 = vadd.xlane.f32.xlu2 %v1768_v4 }
 0x633   : > { %1760 = vadd.xlane.f32.xlu2 %v1759_v19 }
 0x63b   : > { %1751 = vadd.xlane.f32.xlu2 %v1750_v14 }
 0x665   : > { %v1782_v57 = vpop.xlane.xlu1 %1781 }
 0x666   : > { %v4764_v50 = vmax.f32 %v1782_v57, 1e-24 }
 0x668   : > { %3129 = vrsqrt.f32 %v4764_v50  ;;  %vm1920_vm15 = vweird.f32 %v4764_v50 }
 0x66d   : > { %v1785_v60 = vpop.xlane.xlu0 %1784 }
 0x66e   : > { %v4769_v9 = vmax.f32 %v1785_v60, 1e-24  ;;  %v4773_v28 = vpop.eup %3129 }
 0x66f   : > { %v1915_v63 = vmul.f32 %v4773_v28, %v4764_v50  ;;  %vm1921_vm14 = vweird.f32 %v4773_v28 }
 0x670   : > { %vm4839_vm2 = vmor %vm1920_vm15, %vm1921_vm14  ;;  %vm1930_vm15 = vweird.f32 %v4769_v9 }
 0x671   : > { %v1916_v32 = vmul.f32 %v4773_v28, %v1915_v63 }
 0x673   : > { %v1917_v13 = vmul.f32 0.5, %v1916_v32 }
 0x675   : > { %v1788_v11 = vpop.xlane.xlu2 %1787  ;;  %v1918_v62 = vsub.f32 1.5, %v1917_v13 }
 0x676   : > { %v4767_v22 = vmax.f32 %v1788_v11, 1e-24 }
 0x677   : > { %v1919_v5 = vmul.f32 %v4773_v28, %v1918_v62 }
 0x678   : > { %3131 = vrsqrt.f32 %v4767_v22  ;;  %vm1940_vm4 = vweird.f32 %v4767_v22 }
 0x679   : > { %3133 = vrsqrt.f32 %v4769_v9 }
 0x67d   : > { %v1791_v24 = vpop.xlane.xlu1 %1790 }
 0x67e   : > { %v4771_v48 = vmax.f32 %v1791_v24, 1e-24  ;;  %v4783_v41 = vpop.eup %3131 }
 0x67f   : > { %v4785_v21 = vpop.eup %3133  ;;  %v1935_v35 = vmul.f32 %v4783_v41, %v4767_v22  ;;  %vm1941_vm5 = vweird.f32 %v4783_v41  ;;  %v1990_v22 = vlaneseq }
 0x680   : > { %3135 = vrsqrt.f32 %v4771_v48  ;;  %v1925_v47 = vmul.f32 %v4785_v21, %v4769_v9  ;;  %vm1931_vm3 = vweird.f32 %v4785_v21  ;;  %vm4897_vm13 = vmor %vm1940_vm4, %vm1941_vm5  ;;  %vm1950_vm14 = vweird.f32 %v4771_v48 }
 0x681   : > { %v1936_v27 = vmul.f32 %v4783_v41, %v1935_v35  ;;  %vm4931_vm4 = vmor %vm1930_vm15, %vm1931_vm3 }
 0x682   : > { %v1926_v59 = vmul.f32 %v4785_v21, %v1925_v47 }
 0x683   : > { %v1937_v43 = vmul.f32 0.5, %v1936_v27 }
 0x684   : > { %v1927_v38 = vmul.f32 0.5, %v1926_v59 }
 0x685   : > { %v1773_v61 = vpop.xlane.xlu1 %1772  ;;  %v1794_v17 = vpop.xlane.xlu0 %1793  ;;  %v1938_v24 = vsub.f32 1.5, %v1937_v43 }
 0x686   : > { %v4777_v23 = vmax.f32 %v1794_v17, 1e-24  ;;  %v4788_v26 = vpop.eup %3135  ;;  %v4796_v44 = vmax.f32 %v1773_v61, 1e-24  ;;  %v1928_v50 = vsub.f32 1.5, %v1927_v38 }
 0x687   : > { %v1945_v30 = vmul.f32 %v4788_v26, %v4771_v48  ;;  %vm1951_vm6 = vweird.f32 %v4788_v26  ;;  %v1939_v27 = vmul.f32 %v4783_v41, %v1938_v24 }
 0x688   : > { %3137 = vrsqrt.f32 %v4777_v23  ;;  %vm1960_vm9 = vweird.f32 %v4777_v23 }
 0x689   : > { %v1946_v54 = vmul.f32 %v4788_v26, %v1945_v30 }
 0x68b   : > { %v1947_v19 = vmul.f32 0.5, %v1946_v54 }
 0x68d   : > { %v1764_v58 = vpop.xlane.xlu1 %1763  ;;  %v1776_v1 = vpop.xlane.xlu0 %1775  ;;  %v1948_v32 = vsub.f32 1.5, %v1947_v19 }
 0x68e   : > { %v4792_v0 = vmax.f32 %v1776_v1, 1e-24  ;;  %v1797_v7 = vpop.xlane.xlu2 %1796  ;;  %v4794_v2 = vpop.eup %3137  ;;  %v4813_v25 = vmax.f32 %v1764_v58, 1e-24  ;;  %v1923_v1 = vsel %vm4839_vm2, %v4773_v28, %v1919_v5  ;;  %v1929_v5 = vmul.f32 %v4785_v21, %v1928_v50  ;;  %vm4910_vm2 = vmor %vm1950_vm14, %vm1951_vm6 }
 0x68f   : > { %v4798_v36 = vmax.f32 %v1797_v7, 1e-24  ;;  %v1955_v10 = vmul.f32 %v4794_v2, %v4777_v23  ;;  %vm1961_vm7 = vweird.f32 %v4794_v2  ;;  %v1949_v43 = vmul.f32 %v4788_v26, %v1948_v32 }
 0x690   : > { %3139 = vrsqrt.f32 %v4792_v0  ;;  %vm4875_vm10 = vmor %vm1960_vm9, %vm1961_vm7  ;;  %v4918_v48 = vmul.f32 %v1923_v1, %v4659_v56  ;;  %vm1890_vm7 = vweird.f32 %v4796_v44  ;;  %vm1900_vm9 = vweird.f32 %v4792_v0 }
 0x691   : > { %3141 = vrsqrt.f32 %v4798_v36  ;;  %v1956_v53 = vmul.f32 %v4794_v2, %v1955_v10  ;;  %vm1970_vm11 = vweird.f32 %v4798_v36  ;;  %v1953_v9 = vsel %vm4910_vm2, %v4788_v26, %v1949_v43 }
 0x692   : > { %3143 = vrsqrt.f32 %v4796_v44 }
 0x693   : > { %v1957_v31 = vmul.f32 0.5, %v1956_v53  ;;  %3145 = vrsqrt.f32 %v4813_v25 }
 0x695   : > { %v1767_v15 = vpop.xlane.xlu0 %1766  ;;  %v1755_v16 = vpop.xlane.xlu1 %1754  ;;  %v1958_v17 = vsub.f32 1.5, %v1957_v31 }
 0x696   : > { %v4815_v46 = vmax.f32 %v1767_v15, 1e-24  ;;  %v1779_v20 = vpop.xlane.xlu2 %1778  ;;  %v4817_v3 = vpop.eup %3139  ;;  %v4830_v60 = vmax.f32 %v1755_v16, 1e-24 }
 0x697   : > { %v4820_v4 = vmax.f32 %v1779_v20, 1e-24  ;;  %v4822_v39 = vpop.eup %3141  ;;  %v1895_v11 = vmul.f32 %v4817_v3, %v4792_v0  ;;  %v1959_v59 = vmul.f32 %v4794_v2, %v1958_v17  ;;  %vm1901_vm3 = vweird.f32 %v4817_v3 }
 0x698   : > { %v4826_v14 = vpop.eup %3143  ;;  %v1965_v57 = vmul.f32 %v4822_v39, %v4798_v36  ;;  %3147 = vrsqrt.f32 %v4815_v46  ;;  %vm1971_vm8 = vweird.f32 %v4822_v39 }
 0x699   : > { %3149 = vrsqrt.f32 %v4820_v4  ;;  %v1885_v58 = vmul.f32 %v4826_v14, %v4796_v44  ;;  %v4854_v13 = vpop.eup %3145  ;;  %v1896_v47 = vmul.f32 %v4817_v3, %v1895_v11  ;;  %vm1972_vm12 = vmor %vm1970_vm11, %vm1971_vm8  ;;  %v1963_v61 = vsel %vm4875_vm10, %v4794_v2, %v1959_v59 }
 0x69a   : > { %v1966_v63 = vmul.f32 %v4822_v39, %v1965_v57  ;;  %3151 = vrsqrt.f32 %v4830_v60  ;;  %v1855_v38 = vmul.f32 %v4854_v13, %v4813_v25  ;;  %v1943_v2 = vsel %vm4897_vm13, %v4783_v41, %v1939_v27 }
 0x69b   : > { %v1886_v15 = vmul.f32 %v4826_v14, %v1885_v58  ;;  %v1897_v19 = vmul.f32 0.5, %v1896_v47  ;;  %v4957_v59 = vmul.f32 %v1943_v2, %v4671_v33  ;;  %vm1910_vm6 = vweird.f32 %v4820_v4 }
 0x69c   : > { %v1967_v35 = vmul.f32 0.5, %v1966_v63  ;;  %v1856_v56 = vmul.f32 %v4854_v13, %v1855_v38  ;;  %vm1891_vm8 = vweird.f32 %v4826_v14  ;;  %vm1861_vm11 = vweird.f32 %v4854_v13 }
 0x69d   : > { %v1758_v7 = vpop.xlane.xlu0 %1757  ;;  %v1887_v17 = vmul.f32 0.5, %v1886_v15  ;;  %v1898_v58 = vsub.f32 1.5, %v1897_v19  ;;  %vm5002_vm13 = vmor %vm1890_vm7, %vm1891_vm8 }
 0x69e   : > { %v4858_v30 = vmax.f32 %v1758_v7, 1e-24  ;;  %v1770_v10 = vpop.xlane.xlu2 %1769  ;;  %v4861_v28 = vpop.eup %3147  ;;  %v1968_v53 = vsub.f32 1.5, %v1967_v35  ;;  %v4940_v35 = vmul.f32 %v1963_v61, %v4686_v45  ;;  %v4954_v45 = vmul.f32 %v1953_v9, %v4677_v52 }
 0x69f   : > { %v4864_v62 = vmax.f32 %v1770_v10, 1e-24  ;;  %v4867_v54 = vpop.eup %3149  ;;  %v1865_v31 = vmul.f32 %v4861_v28, %v4815_v46  ;;  %v1933_v10 = vsel %vm4931_vm4, %v4785_v21, %v1929_v5  ;;  %v1857_v21 = vmul.f32 0.5, %v1856_v56 }
 0x6a0   : > { %3153 = vrsqrt.f32 %v4858_v30  ;;  %v1969_v20 = vmul.f32 %v4822_v39, %v1968_v53  ;;  %v1905_v23 = vmul.f32 %v4867_v54, %v4820_v4  ;;  %v4891_v57 = vpop.eup %3151  ;;  %v1888_v53 = vsub.f32 1.5, %v1887_v17 }
 0x6a1   : > { %3155 = vrsqrt.f32 %v4864_v62  ;;  %v1825_v1 = vmul.f32 %v4891_v57, %v4830_v60  ;;  %vm1911_vm5 = vweird.f32 %v4867_v54  ;;  %v1899_v52 = vmul.f32 %v4817_v3, %v1898_v58 }
 0x6a2   : > { %v1973_v24 = vsel %vm1972_vm12, %v4822_v39, %v1969_v20  ;;  %v1906_v11 = vmul.f32 %v4867_v54, %v1905_v23  ;;  %v1866_v39 = vmul.f32 %v4861_v28, %v1865_v31  ;;  %v4971_v23 = vmul.f32 %v1933_v10, %v4665_v6  ;;  %vm4978_vm10 = vmor %vm1910_vm6, %vm1911_vm5 }
 0x6a3   : > { %v4915_v63 = vmul.f32 %v1973_v24, %v4703_v34  ;;  %v1826_v16 = vmul.f32 %v4891_v57, %v1825_v1  ;;  %v1889_v4 = vmul.f32 %v4826_v14, %v1888_v53  ;;  %vm4987_vm12 = vmor %vm1900_vm9, %vm1901_vm3  ;;  %v1858_v36 = vsub.f32 1.5, %v1857_v21 }
 0x6a4   : > { %v1907_v50 = vmul.f32 0.5, %v1906_v11  ;;  %v1867_v15 = vmul.f32 0.5, %v1866_v39  ;;  %v1903_v61 = vsel %vm4987_vm12, %v4817_v3, %v1899_v52  ;;  %vm1871_vm15 = vweird.f32 %v4861_v28 }
 0x6a5   : > { %2102 = vmatpush.msra.mxu2 %v4915_v63  ;;  %v1827_v24 = vmul.f32 0.5, %v1826_v16  ;;  %v1893_v44 = vsel %vm5002_vm13, %v4826_v14, %v1889_v4  ;;  %vm1880_vm2 = vweird.f32 %v4864_v62  ;;  %vm1870_vm4 = vweird.f32 %v4815_v46 }
 0x6a6   : > { %v4927_v32 = vpop.eup %3153  ;;  %v1761_v26 = vpop.xlane.xlu2 %1760  ;;  %v1908_v41 = vsub.f32 1.5, %v1907_v50  ;;  %v1868_v19 = vsub.f32 1.5, %v1867_v15  ;;  %v5029_v1 = vmul.f32 %v1903_v61, %v4696_v29  ;;  %v1859_v14 = vmul.f32 %v4854_v13, %v1858_v36  ;;  %vm5040_vm6 = vmor %vm1870_vm4, %vm1871_vm15 }
 0x6a7   : > { %v1835_v7 = vmul.f32 %v4927_v32, %v4858_v30  ;;  %v4944_v47 = vmax.f32 %v1761_v26, 1e-24  ;;  %v4949_v27 = vpop.eup %3155  ;;  %2103 = vmatpush.msra.mxu2 %v4940_v35  ;;  %vm1860_vm5 = vweird.f32 %v4813_v25  ;;  %v5046_v10 = vmul.f32 %v1893_v44, %v4682_v42 }
 0x6a8   : > { %v1875_v43 = vmul.f32 %v4949_v27, %v4864_v62  ;;  %v1909_v20 = vmul.f32 %v4867_v54, %v1908_v41  ;;  %vm1881_vm14 = vweird.f32 %v4949_v27  ;;  %v1869_v56 = vmul.f32 %v4861_v28, %v1868_v19  ;;  %vm5050_vm7 = vmor %vm1860_vm5, %vm1861_vm11 }
 0x6a9   : > { %3157 = vrsqrt.f32 %v4944_v47  ;;  %2104 = vmatpush.msra.mxu2 %v4954_v45  ;;  %v1836_v33 = vmul.f32 %v4927_v32, %v1835_v7  ;;  %vm5023_vm3 = vmor %vm1880_vm2, %vm1881_vm14  ;;  %v1828_v62 = vsub.f32 1.5, %v1827_v24  ;;  %v5035_v7 = vshrl.u32 %v1990_v22, 7  ;;  %v2101_v24 = vld [vmem:[#allocation2 + $0x98] sm:$0xff] }
 0x6aa   : > { %v1876_v31 = vmul.f32 %v4949_v27, %v1875_v43  ;;  %v1913_v5 = vsel %vm4978_vm10, %v4867_v54, %v1909_v20  ;;  %vm1831_vm8 = vweird.f32 %v4891_v57  ;;  %v1873_v25 = vsel %vm5040_vm6, %v4861_v28, %v1869_v56 }
 0x6ab   : > { %2105 = vmatpush.msra.mxu2 %v4957_v59  ;;  %v1837_v54 = vmul.f32 0.5, %v1836_v33  ;;  %v5013_v2 = vmul.f32 %v1913_v5, %v4721_v18  ;;  %v1863_v42 = vsel %vm5050_vm7, %v4854_v13, %v1859_v14  ;;  %vm1841_vm10 = vweird.f32 %v4927_v32 }
 0x6ac   : > { %v1877_v0 = vmul.f32 0.5, %v1876_v31  ;;  %v1829_v16 = vmul.f32 %v4891_v57, %v1828_v62  ;;  %v1996_v28 = vadd.s32 1, %v5035_v7  ;;  %vm1850_vm11 = vweird.f32 %v4944_v47 }
 0x6ad   : > { %2106 = vmatpush.msra.mxu2 %v4971_v23  ;;  %v1838_v26 = vsub.f32 1.5, %v1837_v54  ;;  %vm1840_vm12 = vweird.f32 %v4858_v30  ;;  %vm1830_vm14 = vweird.f32 %v4830_v60  ;;  %v1993_v30 = vand.u32 127, %v1990_v22 }
 0x6ae   : > { %v1752_v11 = vpop.xlane.xlu2 %1751  ;;  %v1878_v50 = vsub.f32 1.5, %v1877_v0  ;;  %vm5078_vm15 = vmor %vm1840_vm12, %vm1841_vm10  ;;  %v1997_v6 = vmul.u32 16, %v1996_v28  ;;  %v3348_v36 = vmov 1.0   ;;  %v2004_v58 = vadd.s32 24, %v5035_v7 }
 0x6af   : > { %v3158_v17 = vpop.eup %3157  ;;  %v5007_v9 = vmax.f32 %v1752_v11, 1e-24  ;;  %2107 = vmatpush.msra.mxu2 %v4918_v48  ;;  %v1839_v21 = vmul.f32 %v4927_v32, %v1838_v26  ;;  %vm1832_vm2 = vmor %vm1830_vm14, %vm1831_vm8  ;;  %v2100_v11 = vld [vmem:[#allocation2 + $0x90] sm:$0xff]  ;;  %v2034_v22 = vadd.s32 1, %v1993_v30  ;;  %v2005_v14 = vadd.s32 32, %v5035_v7 }
 0x6b0   : > { %v1845_v3 = vmul.f32 %v3158_v17, %v4944_v47  ;;  %v1879_v34 = vmul.f32 %v4949_v27, %v1878_v50  ;;  %vm1851_vm9 = vweird.f32 %v3158_v17  ;;  %v5084_v47 = vmul.f32 %v1863_v42, %v4693_v55 }
 0x6b1   : > { %3159 = vrsqrt.f32 %v5007_v9  ;;  %2108 = vmatpush.msra.mxu2 %v5013_v2  ;;  %vm1852_vm13 = vmor %vm1850_vm11, %vm1851_vm9  ;;  %v1843_v60 = vsel %vm5078_vm15, %v4927_v32, %v1839_v21  ;;  %v1833_v4 = vsel %vm1832_vm2, %v4891_v57, %v1829_v16  ;;  %v1994_v55 = vmul.u32 16, %v5035_v7  ;;  %v3064_v57 = vld [vmem:[#allocation2 + $0xc4] ss:$0 sm:$0xff] }
 0x6b2   : > { %v1846_v18 = vmul.f32 %v3158_v17, %v1845_v3  ;;  %v1883_v41 = vsel %vm5023_vm3, %v4949_v27, %v1879_v34  ;;  %v5102_v0 = vmul.f32 %v1833_v4, %v4712_v40  ;;  %vm1820_vm3 = vweird.f32 %v5007_v9 }
 0x6b3   : > { %2109 = vmatpush.msra.mxu2 %v5029_v1  ;;  %v5060_v15 = vmul.f32 %v1883_v41, %v4739_v51  ;;  %v5073_v51 = vmul.f32 %v1873_v25, %v4715_v12  ;;  %vm5106_vm5 = vcmp.ge.s32.totalorder %v1993_v30, %v1994_v55  ;;  %vm5110_vm6 = vcmp.lt.s32.totalorder %v1993_v30, %v1997_v6 }
 0x6b4   : > { %v1847_v29 = vmul.f32 0.5, %v1846_v18  ;;  %vm1999_vm8 = vmand %vm5106_vm5, %vm5110_vm6  ;;  %v5132_v39 = vmul.u32 16, %v2034_v22  ;;  %v2002_v50 = vadd.s32 8, %v5035_v7  ;;  %v2003_v34 = vadd.s32 16, %v5035_v7 }
 0x6b5   : > { %2110 = vmatpush.msra.mxu2 %v5046_v10  ;;  %v2006_v26 = vadd.s32 40, %v5035_v7  ;;  %v2007_v46 = vadd.s32 48, %v5035_v7  ;;  %v2008_v27 = vadd.s32 56, %v5035_v7  ;;  %v2011_v16 = vadd.s32 80, %v5035_v7 }
 0x6b6   : > { %v1848_v53 = vsub.f32 1.5, %v1847_v29  ;;  %vm2036_vm10 = vcmp.lt.s32.totalorder %v5035_v7, %v5132_v39  ;;  %vm2038_vm2 = vcmp.lt.s32.totalorder %v2003_v34, %v5132_v39  ;;  %v2013_v13 = vadd.s32 96, %v5035_v7 }
 0x6b7   : > { %v3160_v43 = vpop.eup %3159  ;;  %2111 = vmatpush.msra.mxu2 %v5060_v15  ;;  %v2016_v4 = vadd.s32 120, %v5035_v7 }
 0x6b8   : > { %v1815_v20 = vmul.f32 %v3160_v43, %v5007_v9  ;;  %v1849_v52 = vmul.f32 %v3158_v17, %v1848_v53  ;;  %vm1821_vm4 = vweird.f32 %v3160_v43  ;;  %v3349_v9 = vmov 0.0  }
 0x6b9   : > { %2112 = vmatpush.msra.mxu2 %v5073_v51  ;;  %vm1822_vm7 = vmor %vm1820_vm3, %vm1821_vm4  ;;  %v2009_v53 = vadd.s32 64, %v5035_v7 }
 0x6ba   : > { %v1816_v33 = vmul.f32 %v3160_v43, %v1815_v20  ;;  %v1853_v31 = vsel %vm1852_vm13, %v3158_v17, %v1849_v52  ;;  %v5130_v17 = vmul.u32 16, %v1993_v30  ;;  %vm2037_vm13 = vcmp.lt.s32.totalorder %v2002_v50, %v5132_v39 }
 0x6bb   : > { %v5089_v12 = vmul.f32 %v1853_v31, %v4750_v8  ;;  %2113 = vmatpush.msra.mxu2 %v5084_v47  ;;  %v5099_v8 = vmul.f32 %v1843_v60, %v4734_v37  ;;  %v2012_v20 = vadd.s32 88, %v5035_v7  ;;  %v2014_v31 = vadd.s32 104, %v5035_v7 }
 0x6bc   : > { %v1817_v38 = vmul.f32 0.5, %v1816_v33  ;;  %vm2018_vm9 = vcmp.ge.s32.totalorder %v5035_v7, %v5130_v17  ;;  %vm2019_vm12 = vcmp.ge.s32.totalorder %v2002_v50, %v5130_v17  ;;  %vm2020_vm15 = vcmp.ge.s32.totalorder %v2003_v34, %v5130_v17 }
 0x6bd   : > { %2114 = vmatpush.msra.mxu2 %v5089_v12  ;;  %vm2052_vm11 = vmand %vm2018_vm9, %vm2036_vm10  ;;  %vm2021_vm3 = vcmp.ge.s32.totalorder %v2004_v58, %v5130_v17  ;;  %vm2022_vm10 = vcmp.ge.s32.totalorder %v2005_v14, %v5130_v17  ;;  %v2015_v30 = vadd.s32 112, %v5035_v7 }
 0x6be   : > { %v1818_v19 = vsub.f32 1.5, %v1817_v38  ;;  %v2946_v3 = vsel %vm2052_vm11, 1.0, %v3349_v9  ;;  %vm2053_vm14 = vmand %vm2019_vm12, %vm2037_vm13  ;;  %vm2040_vm11 = vcmp.lt.s32.totalorder %v2005_v14, %v5132_v39  ;;  %vm2023_vm13 = vcmp.ge.s32.totalorder %v2006_v26, %v5130_v17 }
 0x6bf   : > { %2115 = vmatpush.msra.mxu2 %v5099_v8  ;;  %v2947_v56 = vsel %vm2053_vm14, 1.0, %v3349_v9  ;;  %vm2054_vm4 = vmand %vm2020_vm15, %vm2038_vm2  ;;  %vm2041_vm14 = vcmp.lt.s32.totalorder %v2006_v26, %v5132_v39  ;;  %vm2024_vm2 = vcmp.ge.s32.totalorder %v2007_v46, %v5130_v17 }
 0x6c0   : > { %v1819_v32 = vmul.f32 %v3160_v43, %v1818_v19  ;;  %v2948_v18 = vsel %vm2054_vm4, 1.0, %v3349_v9  ;;  %vm2056_vm12 = vmand %vm2022_vm10, %vm2040_vm11  ;;  %vm2042_vm4 = vcmp.lt.s32.totalorder %v2007_v46, %v5132_v39  ;;  %vm2026_vm11 = vcmp.ge.s32.totalorder %v2009_v53, %v5130_v17 }
 0x6c1   : > { %2116 = vmatpush.msra.mxu2 %v5102_v0  ;;  %v2950_v41 = vsel %vm2056_vm12, 1.0, %v3349_v9  ;;  %vm2057_vm15 = vmand %vm2023_vm13, %vm2041_vm14  ;;  %vm2044_vm12 = vcmp.lt.s32.totalorder %v2009_v53, %v5132_v39 }
 0x6c2   : > { %v1823_v37 = vsel %vm1822_vm7, %v3160_v43, %v1819_v32  ;;  %vm2039_vm7 = vcmp.lt.s32.totalorder %v2004_v58, %v5132_v39  ;;  %v2951_v29 = vsel %vm2057_vm15, 1.0, %v3349_v9  ;;  %vm2060_vm13 = vmand %vm2026_vm11, %vm2044_vm12  ;;  %v2010_v43 = vadd.s32 72, %v5035_v7 }
 0x6c3   : > { %v5116_v40 = vmul.f32 %v1823_v37, %v4758_v49  ;;  %vm2055_vm9 = vmand %vm2021_vm3, %vm2039_vm7  ;;  %vm2025_vm7 = vcmp.ge.s32.totalorder %v2008_v27, %v5130_v17  ;;  %v2954_v21 = vsel %vm2060_vm13, 1.0, %v3349_v9  ;;  %vm2030_vm12 = vcmp.ge.s32.totalorder %v2013_v13, %v5130_v17 }
 0x6c4   : > { %v2949_v62 = vsel %vm2055_vm9, 1.0, %v3349_v9  ;;  %vm2058_vm3 = vmand %vm2024_vm2, %vm2042_vm4  ;;  %vm2043_vm9 = vcmp.lt.s32.totalorder %v2008_v27, %v5132_v39  ;;  %vm2027_vm14 = vcmp.ge.s32.totalorder %v2010_v43, %v5130_v17  ;;  %vm2045_vm15 = vcmp.lt.s32.totalorder %v2010_v43, %v5132_v39 }
 0x6c5   : > { %2117 = vmatpush.msra.mxu2 %v5116_v40  ;;  %v2952_v25 = vsel %vm2058_vm3, 1.0, %v3349_v9  ;;  %vm2059_vm10 = vmand %vm2025_vm7, %vm2043_vm9  ;;  %vm2028_vm4 = vcmp.ge.s32.totalorder %v2011_v16, %v5130_v17  ;;  %vm2046_vm3 = vcmp.lt.s32.totalorder %v2011_v16, %v5132_v39  ;;  %vm2029_vm9 = vcmp.ge.s32.totalorder %v2012_v20, %v5130_v17 }
 0x6c6   : > { %2962 = vmatmul.msk.f32.vlgmr.msra.gmra.mxu2 %vm1999_vm8, %v3348_v36  ;;  %v2953_v42 = vsel %vm2059_vm10, 1.0, %v3349_v9  ;;  %vm2061_vm2 = vmand %vm2027_vm14, %vm2045_vm15  ;;  %vm2047_vm10 = vcmp.lt.s32.totalorder %v2012_v20, %v5132_v39  ;;  %vm2048_vm13 = vcmp.lt.s32.totalorder %v2013_v13, %v5132_v39  ;;  %vm2031_vm15 = vcmp.ge.s32.totalorder %v2014_v31, %v5130_v17 }
 0x6c7   : > { %2140 = vmatpush.msrb.mxu2 %v2101_v24  ;;  %v2955_v28 = vsel %vm2061_vm2, 1.0, %v3349_v9  ;;  %vm2062_vm7 = vmand %vm2028_vm4, %vm2046_vm3  ;;  %vm2049_vm2 = vcmp.lt.s32.totalorder %v2014_v31, %v5132_v39  ;;  %vm2032_vm3 = vcmp.ge.s32.totalorder %v2015_v30, %v5130_v17 }
 0x6c8   : > { %v2956_v52 = vsel %vm2062_vm7, 1.0, %v3349_v9  ;;  %vm2063_vm11 = vmand %vm2029_vm9, %vm2047_vm10  ;;  %vm2050_vm7 = vcmp.lt.s32.totalorder %v2015_v30, %v5132_v39  ;;  %vm2033_vm10 = vcmp.ge.s32.totalorder %v2016_v4, %v5130_v17 }
 0x6c9   : > { %2141 = vmatpush.msrb.mxu2 %v2100_v11  ;;  %v2957_v33 = vsel %vm2063_vm11, 1.0, %v3349_v9  ;;  %vm2064_vm14 = vmand %vm2030_vm12, %vm2048_vm13  ;;  %vm2051_vm11 = vcmp.lt.s32.totalorder %v2016_v4, %v5132_v39 }
 0x6ca   : > { %v2958_v60 = vsel %vm2064_vm14, 1.0, %v3349_v9  ;;  %vm2065_vm4 = vmand %vm2031_vm15, %vm2049_vm2 }
 0x6cb   : > { %v2959_v38 = vsel %vm2065_vm4, 1.0, %v3349_v9  ;;  %vm2066_vm9 = vmand %vm2032_vm3, %vm2050_vm7 }
 0x6cc   : > { %v2960_v55 = vsel %vm2066_vm9, 1.0, %v3349_v9  ;;  %vm2067_vm12 = vmand %vm2033_vm10, %vm2051_vm11 }
 0x6cd   : > { %v2961_v6 = vsel %vm2067_vm12, 1.0, %v3349_v9 }
 0x749   : > { %v2119_v49 = vpop.f32.mrf.mxu2 }
 0x74a   : > { %v2122_v61 = vmul.f32 0.0625, %v2119_v49 }
 0x74c   : > { %2963 = vmatmul.msk.f32.vlgmr.msrb.gmra.mxu2 %vm1749_vm1, %v2122_v61 }
 0x7cf   : > { %v2143_v54 = vpop.f32.mrf.mxu2 }
 0x7d0   : > { %3161 = vtanh.f32 %v2143_v54 }
 0x7d6   : > { %v3162_v44 = vpop.eup %3161 }
 0x7d7   : > { %2210 = vmatpush.msra.mxu2 %v3162_v44 }
 0x7d8   : > { %2964 = vmatmul.msk.f32.vlgmr.msra.gmra.mxu2 %vm310_vm0, %v2946_v3 }
 0x7e0   : > { %2965 = vmatmul.msk.f32.gmra.mxu2 %vm310_vm0, %v2947_v56 }
 0x7e8   : > { %2966 = vmatmul.msk.f32.gmra.mxu2 %vm310_vm0, %v2948_v18 }
 0x7f0   : > { %2967 = vmatmul.msk.f32.gmra.mxu2 %vm310_vm0, %v2949_v62 }
 0x7f8   : > { %2968 = vmatmul.msk.f32.gmra.mxu2 %vm310_vm0, %v2950_v41 }
 0x800   : > { %2969 = vmatmul.msk.f32.gmra.mxu2 %vm310_vm0, %v2951_v29 }
 0x808   : > { %2970 = vmatmul.msk.f32.gmra.mxu2 %vm310_vm0, %v2952_v25 }
 0x810   : > { %2971 = vmatmul.msk.f32.gmra.mxu2 %vm310_vm0, %v2953_v42 }
 0x818   : > { %2972 = vmatmul.msk.f32.gmra.mxu2 %vm310_vm0, %v2954_v21 }
 0x820   : > { %2973 = vmatmul.msk.f32.gmra.mxu2 %vm310_vm0, %v2955_v28 }
 0x828   : > { %2974 = vmatmul.msk.f32.gmra.mxu2 %vm310_vm0, %v2956_v52 }
 0x830   : > { %2975 = vmatmul.msk.f32.gmra.mxu2 %vm310_vm0, %v2957_v33 }
 0x838   : > { %2976 = vmatmul.msk.f32.gmra.mxu2 %vm310_vm0, %v2958_v60 }
 0x840   : > { %2977 = vmatmul.msk.f32.gmra.mxu2 %vm310_vm0, %v2959_v38 }
 0x848   : > { %2978 = vmatmul.msk.f32.gmra.mxu2 %vm310_vm0, %v2960_v55 }
 0x850   : > { %2979 = vmatmul.msk.f32.gmra.mxu2 %vm310_vm0, %v2961_v6 }
 0x85b   : > { %v2212_v19 = vpop.f32.mrf.mxu2 }
 0x863   : > { %v2215_v32 = vpop.f32.mrf.mxu2 }
 0x864   : > { %v2261_v20 = vmul.f32 %v2215_v32, %v5102_v0 }
 0x866   : > { %v2279_v33 = vsel %vm1749_vm1, %v2261_v20, 0.0 }
 0x86b   : > { %v2218_v37 = vpop.f32.mrf.mxu2 }
 0x86c   : > { %v2262_v30 = vmul.f32 %v2218_v37, %v5099_v8 }
 0x86e   : > { %v2282_v4 = vsel %vm1749_vm1, %v2262_v30, 0.0 }
 0x873   : > { %v2221_v24 = vpop.f32.mrf.mxu2 }
 0x874   : > { %v2263_v6 = vmul.f32 %v2221_v24, %v5089_v12 }
 0x876   : > { %v2285_v32 = vsel %vm1749_vm1, %v2263_v6, 0.0 }
 0x87b   : > { %v2224_v11 = vpop.f32.mrf.mxu2 }
 0x87c   : > { %v2264_v25 = vmul.f32 %v2224_v11, %v5084_v47  ;;  %v2260_v11 = vmul.f32 %v2212_v19, %v5116_v40 }
 0x87e   : > { %v2288_v21 = vsel %vm1749_vm1, %v2264_v25, 0.0 }
 0x883   : > { %v2227_v49 = vpop.f32.mrf.mxu2 }
 0x884   : > { %v2265_v52 = vmul.f32 %v2227_v49, %v5073_v51  ;;  %v2276_v49 = vsel %vm1749_vm1, %v2260_v11, 0.0 }
 0x886   : > { %v2291_v31 = vsel %vm1749_vm1, %v2265_v52, 0.0 }
 0x88b   : > { %v2230_v7 = vpop.f32.mrf.mxu2 }
 0x88c   : > { %v2266_v38 = vmul.f32 %v2230_v7, %v5060_v15 }
 0x88e   : > { %v2294_v55 = vsel %vm1749_vm1, %v2266_v38, 0.0 }
 0x893   : > { %v2233_v61 = vpop.f32.mrf.mxu2 }
 0x894   : > { %v2267_v26 = vmul.f32 %v2233_v61, %v5046_v10 }
 0x896   : > { %v2297_v29 = vsel %vm1749_vm1, %v2267_v26, 0.0 }
 0x89b   : > { %v2236_v22 = vpop.f32.mrf.mxu2 }
 0x89c   : > { %v2268_v53 = vmul.f32 %v2236_v22, %v5029_v1 }
 0x89e   : > { %v2300_v16 = vsel %vm1749_vm1, %v2268_v53, 0.0 }
 0x8a3   : > { %v2239_v54 = vpop.f32.mrf.mxu2 }
 0x8a4   : > { %v2269_v13 = vmul.f32 %v2239_v54, %v5013_v2 }
 0x8a6   : > { %v2303_v60 = vsel %vm1749_vm1, %v2269_v13, 0.0 }
 0x8ab   : > { %v2242_v17 = vpop.f32.mrf.mxu2 }
 0x8ac   : > { %v2270_v39 = vmul.f32 %v2242_v17, %v4918_v48 }
 0x8ae   : > { %v2306_v50 = vsel %vm1749_vm1, %v2270_v39, 0.0 }
 0x8af   : > { %2307 = vadd.xlane.f32.xlu2 %v2306_v50 }
 0x8b3   : > { %v2245_v3 = vpop.f32.mrf.mxu2 }
 0x8b4   : > { %v2271_v9 = vmul.f32 %v2245_v3, %v4971_v23 }
 0x8b6   : > { %v2309_v44 = vsel %vm1749_vm1, %v2271_v9, 0.0 }
 0x8b7   : > { %2310 = vadd.xlane.f32.xlu1 %v2309_v44 }
 0x8bb   : > { %v2248_v34 = vpop.f32.mrf.mxu2 }
 0x8bc   : > { %v2272_v56 = vmul.f32 %v2248_v34, %v4957_v59 }
 0x8be   : > { %v2312_v58 = vsel %vm1749_vm1, %v2272_v56, 0.0 }
 0x8bf   : > { %2313 = vadd.xlane.f32.xlu0 %v2312_v58 }
 0x8c3   : > { %v2251_v18 = vpop.f32.mrf.mxu2 }
 0x8c4   : > { %v2273_v14 = vmul.f32 %v2251_v18, %v4954_v45 }
 0x8c6   : > { %v2315_v62 = vsel %vm1749_vm1, %v2273_v14, 0.0 }
 0x8c7   : > { %2316 = vadd.xlane.f32.xlu2 %v2315_v62 }
 0x8cb   : > { %v2254_v41 = vpop.f32.mrf.mxu2 }
 0x8cc   : > { %v2274_v46 = vmul.f32 %v2254_v41, %v4940_v35 }
 0x8ce   : > { %v2318_v27 = vsel %vm1749_vm1, %v2274_v46, 0.0 }
 0x8cf   : > { %2298 = vadd.xlane.f32.xlu2 %v2297_v29  ;;  %2319 = vadd.xlane.f32.xlu1 %v2318_v27 }
 0x8d3   : > { %v2257_v42 = vpop.f32.mrf.mxu2 }
 0x8d4   : > { %v2275_v43 = vmul.f32 %v2257_v42, %v4915_v63 }
 0x8d6   : > { %v2321_v28 = vsel %vm1749_vm1, %v2275_v43, 0.0 }
 0x8d7   : > { %2289 = vadd.xlane.f32.xlu2 %v2288_v21  ;;  %2301 = vadd.xlane.f32.xlu1 %v2300_v16 }
 0x8d8   : > { %2322 = vadd.xlane.f32.xlu0 %v2321_v28 }
 0x8df   : > { %2280 = vadd.xlane.f32.xlu2 %v2279_v33  ;;  %2292 = vadd.xlane.f32.xlu1 %v2291_v31 }
 0x8e0   : > { %2304 = vadd.xlane.f32.xlu0 %v2303_v60 }
 0x8e7   : > { %2283 = vadd.xlane.f32.xlu1 %v2282_v4 }
 0x8e8   : > { %2295 = vadd.xlane.f32.xlu0 %v2294_v55 }
 0x8f0   : > { %2286 = vadd.xlane.f32.xlu0 %v2285_v32 }
 0x8f8   : > { %2277 = vadd.xlane.f32.xlu0 %v2276_v49 }
 0x922   : > { %v2308_v61 = vpop.xlane.xlu2 %2307 }
 0x923   : > { %v2990_v37 = vmul.f32 -1.442695, %v2308_v61 }
 0x925   : > { %3163 = vpow2.f32 %v2990_v37 }
 0x92a   : > { %v2311_v7 = vpop.xlane.xlu1 %2310 }
 0x92b   : > { %v2991_v22 = vmul.f32 -1.442695, %v2311_v7  ;;  %v3164_v54 = vpop.eup %3163 }
 0x92c   : > { %v2382_v17 = vadd.f32 1.0, %v3164_v54 }
 0x92d   : > { %3165 = vpow2.f32 %v2991_v22 }
 0x92e   : > { %v2547_v16 = vand.u32 2147483647, %v2382_v17  ;;  %v2549_v28 = vand.u32 2147483648, %v2382_v17  ;;  %vm2543_vm13 = vweird.f32 %v2382_v17 }
 0x930   : > { %vm5275_vm14 = vcmp.eq.f32.partialorder %v2547_v16, 8.507059e+37  ;;  %v2550_v11 = vor.u32 1.1754944e-38, %v2549_v28 }
 0x932   : > { %v2314_v39 = vpop.xlane.xlu0 %2313 }
 0x933   : > { %v3166_v50 = vpop.eup %3165  ;;  %v2992_v3 = vmul.f32 -1.442695, %v2314_v39 }
 0x934   : > { %v5247_v24 = vadd.f32 1.0, %v3166_v50 }
 0x935   : > { %3167 = vpow2.f32 %v2992_v3 }
 0x936   : > { %3169 = vrcp.f32 %v2382_v17  ;;  %v2562_v54 = vand.u32 2147483647, %v5247_v24  ;;  %vm2558_vm3 = vweird.f32 %v5247_v24 }
 0x937   : > { %3171 = vrcp.f32 %v5247_v24 }
 0x938   : > { %vm5311_vm10 = vcmp.eq.f32.partialorder %v2562_v54, 8.507059e+37 }
 0x93a   : > { %v2317_v19 = vpop.xlane.xlu2 %2316 }
 0x93b   : > { %v3168_v9 = vpop.eup %3167  ;;  %v2993_v44 = vmul.f32 -1.442695, %v2317_v19 }
 0x93c   : > { %v5250_v34 = vpop.eup %3169  ;;  %v5252_v56 = vadd.f32 1.0, %v3168_v9 }
 0x93d   : > { %3173 = vpow2.f32 %v2993_v44  ;;  %v2539_v58 = vmul.f32 %v5250_v34, %v2382_v17  ;;  %v5256_v18 = vpop.eup %3171  ;;  %vm2544_vm0 = vweird.f32 %v5250_v34  ;;  %v2564_v44 = vand.u32 2147483648, %v5247_v24 }
 0x93e   : > { %3175 = vrcp.f32 %v5252_v56  ;;  %v2554_v41 = vmul.f32 %v5256_v18, %v5247_v24  ;;  %vm2559_vm15 = vweird.f32 %v5256_v18  ;;  %vm5289_vm2 = vmor %vm2543_vm13, %vm2544_vm0  ;;  %v2577_v19 = vand.u32 2147483647, %v5252_v56 }
 0x93f   : > { %v2540_v27 = vsub.f32 1.0, %v2539_v58  ;;  %v2579_v9 = vand.u32 2147483648, %v5252_v56  ;;  %vm2573_vm7 = vweird.f32 %v5252_v56  ;;  %vm5307_vm9 = vmor %vm2558_vm3, %vm2559_vm15 }
 0x940   : > { %v2555_v43 = vsub.f32 1.0, %v2554_v41  ;;  %vm5330_vm12 = vcmp.eq.f32.partialorder %v2577_v19, 8.507059e+37 }
 0x941   : > { %v2541_v21 = vmul.f32 %v5250_v34, %v2540_v27 }
 0x942   : > { %v2299_v14 = vpop.xlane.xlu2 %2298  ;;  %v2320_v62 = vpop.xlane.xlu1 %2319  ;;  %v2556_v38 = vmul.f32 %v5256_v18, %v2555_v43 }
 0x943   : > { %v3174_v26 = vpop.eup %3173  ;;  %v2987_v46 = vmul.f32 -1.442695, %v2299_v14  ;;  %v2994_v29 = vmul.f32 -1.442695, %v2320_v62  ;;  %v2542_v4 = vadd.f32 %v5250_v34, %v2541_v21 }
 0x944   : > { %v5260_v25 = vpop.eup %3175  ;;  %v5262_v53 = vadd.f32 1.0, %v3174_v26  ;;  %v2557_v50 = vadd.f32 %v5256_v18, %v2556_v38 }
 0x945   : > { %v2569_v42 = vmul.f32 %v5260_v25, %v5252_v56  ;;  %3177 = vpow2.f32 %v2987_v46  ;;  %v2546_v3 = vsel %vm5289_vm2, %v5250_v34, %v2542_v4  ;;  %vm2574_vm4 = vweird.f32 %v5260_v25 }
 0x946   : > { %3179 = vrcp.f32 %v5262_v53  ;;  %v2551_v41 = vsel %vm5275_vm14, %v2550_v11, %v2546_v3  ;;  %v2561_v56 = vsel %vm5307_vm9, %v5256_v18, %v2557_v50  ;;  %v2592_v21 = vand.u32 2147483647, %v5262_v53  ;;  %vm5326_vm11 = vmor %vm2573_vm7, %vm2574_vm4 }
 0x947   : > { %3181 = vpow2.f32 %v2994_v29  ;;  %v2570_v20 = vsub.f32 1.0, %v2569_v42  ;;  %vm2588_vm0 = vweird.f32 %v5262_v53  ;;  %v2594_v38 = vand.u32 2147483648, %v5262_v53 }
 0x948   : > { %vm5355_vm14 = vcmp.eq.f32.partialorder %v2592_v21, 8.507059e+37 }
 0x949   : > { %v2571_v7 = vmul.f32 %v5260_v25, %v2570_v20  ;;  %v2580_v20 = vor.u32 1.1754944e-38, %v2579_v9 }
 0x94a   : > { %v2290_v52 = vpop.xlane.xlu2 %2289  ;;  %v2302_v13 = vpop.xlane.xlu1 %2301 }
 0x94b   : > { %v3178_v33 = vpop.eup %3177  ;;  %v2984_v31 = vmul.f32 -1.442695, %v2290_v52  ;;  %v2988_v60 = vmul.f32 -1.442695, %v2302_v13  ;;  %v2323_v30 = vpop.xlane.xlu0 %2322  ;;  %v2572_v58 = vadd.f32 %v5260_v25, %v2571_v7  ;;  %v2565_v52 = vor.u32 1.1754944e-38, %v2564_v44 }
 0x94c   : > { %v5271_v55 = vpop.eup %3179  ;;  %v5273_v6 = vadd.f32 1.0, %v3178_v33  ;;  %v2995_v37 = vmul.f32 -1.442695, %v2323_v30 }
 0x94d   : > { %v3182_v49 = vpop.eup %3181  ;;  %v2584_v61 = vmul.f32 %v5271_v55, %v5262_v53  ;;  %3183 = vpow2.f32 %v2984_v31  ;;  %v2576_v18 = vsel %vm5326_vm11, %v5260_v25, %v2572_v58  ;;  %v5339_v31 = vmul.f32 %v2551_v41, %v4918_v48 }
 0x94e   : > { %3185 = vrcp.f32 %v5273_v6  ;;  %v5283_v22 = vadd.f32 1.0, %v3182_v49  ;;  %v2566_v4 = vsel %vm5311_vm10, %v2565_v52, %v2561_v56  ;;  %vm2589_vm13 = vweird.f32 %v5271_v55 }
 0x94f   : > { %3187 = vpow2.f32 %v2988_v60  ;;  %v2585_v39 = vsub.f32 1.0, %v2584_v61  ;;  %v2581_v61 = vsel %vm5330_vm12, %v2580_v20, %v2576_v18  ;;  %vm5370_vm15 = vmor %vm2588_vm0, %vm2589_vm13  ;;  %v2504_v19 = vand.u32 2147483648, %v5273_v6 }
 0x950   : > { %3189 = vrcp.f32 %v5283_v22  ;;  %v2609_v54 = vand.u32 2147483648, %v5283_v22  ;;  %v2607_v50 = vand.u32 2147483647, %v5283_v22  ;;  %v5383_v41 = vmul.f32 %v2581_v61, %v4957_v59 }
 0x951   : > { %3191 = vpow2.f32 %v2995_v37  ;;  %v2586_v42 = vmul.f32 %v5271_v55, %v2585_v39  ;;  %vm2603_vm2 = vweird.f32 %v5283_v22  ;;  %vm2498_vm3 = vweird.f32 %v5273_v6 }
 0x952   : > { %v2281_v14 = vpop.xlane.xlu2 %2280  ;;  %v2293_v62 = vpop.xlane.xlu1 %2292  ;;  %vm5392_vm4 = vcmp.eq.f32.partialorder %v2607_v50, 8.507059e+37  ;;  %v5399_v56 = vor.u32 1.1754944e-38, %v2504_v19 }
 0x953   : > { %v3184_v46 = vpop.eup %3183  ;;  %v2981_v29 = vmul.f32 -1.442695, %v2281_v14  ;;  %v2985_v24 = vmul.f32 -1.442695, %v2293_v62  ;;  %v2305_v27 = vpop.xlane.xlu0 %2304  ;;  %v2587_v25 = vadd.f32 %v5271_v55, %v2586_v42  ;;  %v2595_v14 = vor.u32 1.1754944e-38, %v2594_v38 }
 0x954   : > { %v5321_v43 = vpop.eup %3185  ;;  %v2989_v33 = vmul.f32 -1.442695, %v2305_v27  ;;  %v5364_v17 = vadd.f32 1.0, %v3184_v46  ;;  %v5379_v62 = vmul.f32 %v2566_v4, %v4971_v23  ;;  %v2502_v46 = vand.u32 2147483647, %v5273_v6 }
 0x955   : > { %v3188_v13 = vpop.eup %3187  ;;  %3193 = vpow2.f32 %v2981_v29  ;;  %v2494_v37 = vmul.f32 %v5321_v43, %v5273_v6  ;;  %v2591_v58 = vsel %vm5370_vm15, %v5271_v55, %v2587_v25  ;;  %vm2499_vm9 = vweird.f32 %v5321_v43 }
 0x956   : > { %v5341_v60 = vpop.eup %3189  ;;  %v5343_v30 = vadd.f32 1.0, %v3188_v13  ;;  %3195 = vpow2.f32 %v2985_v24  ;;  %v2610_v24 = vor.u32 1.1754944e-38, %v2609_v54  ;;  %v2596_v59 = vsel %vm5355_vm14, %v2595_v14, %v2591_v58 }
 0x957   : > { %v3192_v32 = vpop.eup %3191  ;;  %v2599_v11 = vmul.f32 %v5341_v60, %v5283_v22  ;;  %v2495_v27 = vsub.f32 1.0, %v2494_v37  ;;  %vm2604_vm7 = vweird.f32 %v5341_v60  ;;  %v5418_v25 = vmul.f32 %v2596_v59, %v4954_v45 }
 0x958   : > { %3197 = vrcp.f32 %v5343_v30  ;;  %v5353_v48 = vadd.f32 1.0, %v3192_v32  ;;  %vm5426_vm11 = vmor %vm2603_vm2, %vm2604_vm7  ;;  %vm2513_vm12 = vweird.f32 %v5343_v30  ;;  %v2517_v45 = vand.u32 2147483647, %v5343_v30 }
 0x959   : > { %3199 = vpow2.f32 %v2989_v33  ;;  %v2600_v7 = vsub.f32 1.0, %v2599_v11  ;;  %v2519_v33 = vand.u32 2147483648, %v5343_v30  ;;  %v2496_v4 = vmul.f32 %v5321_v43, %v2495_v27  ;;  %vm5468_vm2 = vmor %vm2498_vm3, %vm2499_vm9 }
 0x95a   : > { %3201 = vrcp.f32 %v5353_v48  ;;  %v2284_v39 = vpop.xlane.xlu1 %2283  ;;  %v2622_v32 = vand.u32 2147483647, %v5353_v48  ;;  %v2624_v11 = vand.u32 2147483648, %v5353_v48  ;;  %vm2618_vm10 = vweird.f32 %v5353_v48 }
 0x95b   : > { %v2982_v9 = vmul.f32 -1.442695, %v2284_v39  ;;  %v2296_v44 = vpop.xlane.xlu0 %2295  ;;  %v3194_v34 = vpop.eup %3193  ;;  %v2601_v53 = vmul.f32 %v5341_v60, %v2600_v7  ;;  %vm5432_vm0 = vcmp.eq.f32.partialorder %v2502_v46, 8.507059e+37  ;;  %v5443_v19 = vor.u32 1.1754944e-38, %v2519_v33 }
 0x95c   : > { %v2986_v26 = vmul.f32 -1.442695, %v2296_v44  ;;  %v3196_v29 = vpop.eup %3195  ;;  %v5403_v28 = vadd.f32 1.0, %v3194_v34  ;;  %v2497_v14 = vadd.f32 %v5321_v43, %v2496_v4  ;;  %vm5452_vm14 = vcmp.eq.f32.partialorder %v2622_v32, 8.507059e+37 }
 0x95d   : > { %3203 = vpow2.f32 %v2982_v9  ;;  %v5390_v23 = vadd.f32 1.0, %v3196_v29  ;;  %v2602_v13 = vadd.f32 %v5341_v60, %v2601_v53  ;;  %vm5460_vm15 = vcmp.eq.f32.partialorder %v2517_v45, 8.507059e+37 }
 0x95e   : > { %v5387_v55 = vpop.eup %3197  ;;  %3205 = vrcp.f32 %v5364_v17  ;;  %v2457_v32 = vand.u32 2147483647, %v5364_v17 }
 0x95f   : > { %v3200_v21 = vpop.eup %3199  ;;  %v2509_v16 = vmul.f32 %v5387_v55, %v5343_v30  ;;  %3207 = vpow2.f32 %v2986_v26  ;;  %v2606_v22 = vsel %vm5426_vm11, %v5341_v60, %v2602_v13  ;;  %v2625_v60 = vor.u32 1.1754944e-38, %v2624_v11 }
 0x960   : > { %v3202_v20 = vpop.eup %3201  ;;  %3209 = vrcp.f32 %v5390_v23  ;;  %v5407_v52 = vadd.f32 1.0, %v3200_v21  ;;  %v2611_v27 = vsel %vm5392_vm4, %v2610_v24, %v2606_v22  ;;  %vm2514_vm7 = vweird.f32 %v5387_v55  ;;  %v2665_v22 = vld [vmem:[#allocation2 + $0xa8] sm:$0xff] }
 0x961   : > { %v2614_v18 = vmul.f32 %v3202_v20, %v5353_v48  ;;  %v2510_v38 = vsub.f32 1.0, %v2509_v16  ;;  %vm2619_vm13 = vweird.f32 %v3202_v20  ;;  %v2642_v4 = vmul.f32 %v2611_v27, %v4940_v35  ;;  %2685 = vmatpush.msrb.mxu3 %v2665_v22 }
 0x962   : > { %3211 = vrcp.f32 %v5407_v52  ;;  %vm2620_vm4 = vmor %vm2618_vm10, %vm2619_vm13  ;;  %v2532_v24 = vand.u32 2147483647, %v5407_v52  ;;  %vm2528_vm3 = vweird.f32 %v5407_v52  ;;  %vm2468_vm11 = vweird.f32 %v5390_v23 }
 0x963   : > { %v3204_v49 = vpop.eup %3203  ;;  %v2615_v61 = vsub.f32 1.0, %v2614_v18  ;;  %3213 = vrcp.f32 %v5403_v28  ;;  %v2287_v37 = vpop.xlane.xlu0 %2286  ;;  %v2511_v58 = vmul.f32 %v5387_v55, %v2510_v38  ;;  %v2501_v38 = vsel %vm5468_vm2, %v5321_v43, %v2497_v14  ;;  %vm5511_vm10 = vmor %vm2513_vm12, %vm2514_vm7  ;;  %v2664_v14 = vld [vmem:[#allocation2 + $0xa0] sm:$0xff] }
 0x964   : > { %v5436_v39 = vpop.eup %3205  ;;  %v5438_v50 = vadd.f32 1.0, %v3204_v49  ;;  %v2983_v3 = vmul.f32 -1.442695, %v2287_v37  ;;  %vm5503_vm9 = vcmp.eq.f32.partialorder %v2532_v24, 8.507059e+37  ;;  %2686 = vmatpush.msrb.mxu3 %v2664_v14  ;;  %v2472_v24 = vand.u32 2147483647, %v5390_v23 }
 0x965   : > { %v3208_v9 = vpop.eup %3207  ;;  %v2616_v44 = vmul.f32 %v3202_v20, %v2615_v61  ;;  %v2449_v13 = vmul.f32 %v5436_v39, %v5364_v17  ;;  %v2512_v18 = vadd.f32 %v5387_v55, %v2511_v58  ;;  %vm2454_vm12 = vweird.f32 %v5436_v39 }
 0x966   : > { %v5447_v34 = vpop.eup %3209  ;;  %3215 = vrcp.f32 %v5438_v50  ;;  %v5450_v26 = vadd.f32 1.0, %v3208_v9 }
 0x967   : > { %v2464_v46 = vmul.f32 %v5447_v34, %v5390_v23  ;;  %3217 = vpow2.f32 %v2983_v3  ;;  %v2617_v29 = vadd.f32 %v3202_v20, %v2616_v44  ;;  %v2506_v3 = vsel %vm5432_vm0, %v5399_v56, %v2501_v38 }
 0x968   : > { %v5472_v16 = vpop.eup %3211  ;;  %3219 = vrcp.f32 %v5450_v26  ;;  %v2516_v30 = vsel %vm5511_vm10, %v5387_v55, %v2512_v18  ;;  %v2450_v58 = vsub.f32 1.0, %v2449_v13  ;;  %v5536_v27 = vmul.f32 %v2506_v3, %v5046_v10 }
 0x969   : > { %v5482_v6 = vpop.eup %3213  ;;  %v2524_v42 = vmul.f32 %v5472_v16, %v5407_v52  ;;  %v2621_v33 = vsel %vm2620_vm4, %v3202_v20, %v2617_v29  ;;  %v2534_v20 = vand.u32 2147483648, %v5407_v52  ;;  %v2465_v37 = vsub.f32 1.0, %v2464_v46 }
 0x96a   : > { %v2626_v48 = vsel %vm5452_vm14, %v2625_v60, %v2621_v33  ;;  %v5501_v43 = vmul.f32 %v5482_v6, %v5403_v28  ;;  %vm2529_vm13 = vweird.f32 %v5472_v16  ;;  %vm2453_vm0 = vweird.f32 %v5364_v17 }
 0x96b   : > { %v2643_v11 = vmul.f32 %v2626_v48, %v4915_v63  ;;  %v2278_v49 = vpop.xlane.xlu0 %2277  ;;  %v2525_v61 = vsub.f32 1.0, %v2524_v42  ;;  %v2466_v60 = vmul.f32 %v5447_v34, %v2465_v37  ;;  %v2535_v29 = vor.u32 1.1754944e-38, %v2534_v20  ;;  %vm5544_vm14 = vmor %vm2528_vm3, %vm2529_vm13  ;;  %v2692_v37 = vld [vmem:[#allocation2 + $0xb0] sm:$0xff] }
 0x96c   : > { %v5497_v7 = vpop.eup %3215  ;;  %v2980_v45 = vmul.f32 -1.442695, %v2278_v49  ;;  %v2521_v13 = vsel %vm5460_vm15, %v5443_v19, %v2516_v30  ;;  %v2487_v10 = vand.u32 2147483647, %v5450_v26  ;;  %v2489_v52 = vand.u32 2147483648, %v5450_v26 }
 0x96d   : > { %v3218_v9 = vpop.eup %3217  ;;  %2644 = vmatpush.msrb.mxu0 %v2643_v11  ;;  %v2526_v44 = vmul.f32 %v5472_v16, %v2525_v61  ;;  %v2419_v56 = vmul.f32 %v5497_v7, %v5438_v50  ;;  %v2451_v18 = vmul.f32 %v5436_v39, %v2450_v58  ;;  %v2467_v48 = vadd.f32 %v5447_v34, %v2466_v60 }
 0x96e   : > { %v5525_v54 = vpop.eup %3219  ;;  %v5529_v53 = vadd.f32 1.0, %v3218_v9  ;;  %3221 = vpow2.f32 %v2980_v45  ;;  %vm2469_vm15 = vweird.f32 %v5447_v34  ;;  %v2474_v19 = vand.u32 2147483648, %v5390_v23 }
 0x96f   : > { %v2479_v46 = vmul.f32 %v5525_v54, %v5450_v26  ;;  %2645 = vmatpush.msrb.mxu0 %v2642_v4  ;;  %v2527_v55 = vadd.f32 %v5472_v16, %v2526_v44  ;;  %v2420_v38 = vsub.f32 1.0, %v2419_v56  ;;  %v2405_v59 = vsub.f32 1.0, %v5501_v43  ;;  %vm5583_vm3 = vmor %vm2468_vm11, %vm2469_vm15 }
 0x970   : > { %3223 = vrcp.f32 %v5529_v53  ;;  %vm2483_vm2 = vweird.f32 %v5450_v26  ;;  %vm2484_vm4 = vweird.f32 %v5525_v54  ;;  %v2636_v11 = vmul.f32 %v2521_v13, %v5029_v1  ;;  %vm5608_vm11 = vmor %vm2453_vm0, %vm2454_vm12 }
 0x971   : > { %2646 = vmatpush.msrb.mxu0 %v5418_v25  ;;  %v2531_v42 = vsel %vm5544_vm14, %v5472_v16, %v2527_v55  ;;  %v2480_v33 = vsub.f32 1.0, %v2479_v46  ;;  %vm5570_vm7 = vcmp.eq.f32.partialorder %v2487_v10, 8.507059e+37  ;;  %v2459_v61 = vand.u32 2147483648, %v5364_v17 }
 0x972   : > { %v2536_v4 = vsel %vm5503_vm9, %v2535_v29, %v2531_v42  ;;  %v2490_v26 = vor.u32 1.1754944e-38, %v2489_v52  ;;  %v2452_v1 = vadd.f32 %v5436_v39, %v2451_v18  ;;  %vm5588_vm9 = vmor %vm2483_vm2, %vm2484_vm4  ;;  %v2475_v35 = vor.u32 1.1754944e-38, %v2474_v19 }
 0x973   : > { %2647 = vmatpush.msrb.mxu0 %v5383_v41  ;;  %v2481_v25 = vmul.f32 %v5525_v54, %v2480_v33  ;;  %v2442_v63 = vand.u32 2147483647, %v5529_v53  ;;  %v2421_v23 = vmul.f32 %v5497_v7, %v2420_v38  ;;  %v2637_v22 = vmul.f32 %v2536_v4, %v5013_v2 }
 0x974   : > { %v3222_v16 = vpop.eup %3221  ;;  %vm2473_vm10 = vcmp.eq.f32.partialorder %v2472_v24, 8.507059e+37  ;;  %vm5614_vm13 = vcmp.eq.f32.partialorder %v2457_v32, 8.507059e+37  ;;  %v2460_v2 = vor.u32 1.1754944e-38, %v2459_v61  ;;  %vm2438_vm14 = vweird.f32 %v5529_v53 }
 0x975   : > { %v5575_v20 = vadd.f32 1.0, %v3222_v16  ;;  %2648 = vmatpush.msrb.mxu0 %v5379_v62  ;;  %v2482_v41 = vadd.f32 %v5525_v54, %v2481_v25  ;;  %v2471_v62 = vsel %vm5583_vm3, %v5447_v34, %v2467_v48  ;;  %v2456_v30 = vsel %vm5608_vm11, %v5436_v39, %v2452_v1 }
 0x976   : > { %v3224_v43 = vpop.eup %3223  ;;  %v2406_v14 = vmul.f32 %v5482_v6, %v2405_v59  ;;  %v2444_v17 = vand.u32 2147483648, %v5529_v53  ;;  %v2422_v32 = vadd.f32 %v5497_v7, %v2421_v23  ;;  %vm2424_vm12 = vweird.f32 %v5497_v7 }
 0x977   : > { %v2434_v3 = vmul.f32 %v3224_v43, %v5529_v53  ;;  %3225 = vrcp.f32 %v5575_v20  ;;  %2649 = vmatpush.msrb.mxu0 %v5339_v31  ;;  %v2486_v9 = vsel %vm5588_vm9, %v5525_v54, %v2482_v41  ;;  %v2476_v31 = vsel %vm2473_vm10, %v2475_v35, %v2471_v62 }
 0x978   : > { %v2491_v54 = vsel %vm5570_vm7, %v2490_v26, %v2486_v9  ;;  %vm2439_vm0 = vweird.f32 %v3224_v43  ;;  %vm5628_vm15 = vcmp.eq.f32.partialorder %v2442_v63, 8.507059e+37  ;;  %v2429_v39 = vand.u32 2147483648, %v5438_v50 }
 0x979   : > { %2650 = vmatpush.msrb.mxu0 %v2637_v22  ;;  %v2435_v58 = vsub.f32 1.0, %v2434_v3  ;;  %v2633_v46 = vmul.f32 %v2476_v31, %v5073_v51  ;;  %v2461_v55 = vsel %vm5614_vm13, %v2460_v2, %v2456_v30  ;;  %vm2423_vm2 = vweird.f32 %v5438_v50  ;;  %vm2440_vm3 = vmor %vm2438_vm14, %vm2439_vm0 }
 0x97a   : > { %v2427_v29 = vand.u32 2147483647, %v5438_v50  ;;  %v2634_v13 = vmul.f32 %v2491_v54, %v5060_v15  ;;  %vm5640_vm4 = vmor %vm2423_vm2, %vm2424_vm12  ;;  %v2407_v42 = vadd.f32 %v5482_v6, %v2406_v14  ;;  %vm2409_vm7 = vweird.f32 %v5482_v6 }
 0x97b   : > { %2651 = vmatpush.msrb.mxu0 %v2636_v11  ;;  %v2436_v56 = vmul.f32 %v3224_v43, %v2435_v58  ;;  %v2445_v50 = vor.u32 1.1754944e-38, %v2444_v17  ;;  %v2426_v15 = vsel %vm5640_vm4, %v5497_v7, %v2422_v32  ;;  %v2430_v52 = vor.u32 1.1754944e-38, %v2429_v39 }
 0x97c   : > { %vm2408_vm9 = vweird.f32 %v5403_v28  ;;  %v2412_v18 = vand.u32 2147483647, %v5403_v28  ;;  %v2632_v48 = vmul.f32 %v2461_v55, %v5084_v47  ;;  %vm2428_vm10 = vcmp.eq.f32.partialorder %v2427_v29, 8.507059e+37 }
 0x97d   : > { %v3226_v21 = vpop.eup %3225  ;;  %2652 = vmatpush.msrb.mxu0 %v5536_v27  ;;  %v2437_v10 = vadd.f32 %v3224_v43, %v2436_v56  ;;  %v2414_v27 = vand.u32 2147483648, %v5403_v28  ;;  %vm2410_vm11 = vmor %vm2408_vm9, %vm2409_vm7  ;;  %v2431_v19 = vsel %vm2428_vm10, %v2430_v52, %v2426_v15  ;;  %v2399_v25 = vand.u32 2147483648, %v5575_v20 }
 0x97e   : > { %v2389_v51 = vmul.f32 %v3226_v21, %v5575_v20  ;;  %v2411_v59 = vsel %vm2410_vm11, %v5482_v6, %v2407_v42  ;;  %vm2394_vm13 = vweird.f32 %v3226_v21  ;;  %v2397_v47 = vand.u32 2147483647, %v5575_v20 }
 0x97f   : > { %2653 = vmatpush.msrb.mxu0 %v2634_v13  ;;  %v2441_v33 = vsel %vm2440_vm3, %v3224_v43, %v2437_v10  ;;  %v2415_v16 = vor.u32 1.1754944e-38, %v2414_v27  ;;  %vm2413_vm14 = vcmp.eq.f32.partialorder %v2412_v18, 8.507059e+37  ;;  %vm2393_vm12 = vweird.f32 %v5575_v20  ;;  %v2693_v20 = vld [vmem:[#allocation2 + $0xb8] sm:$0xff] }
 0x980   : > { %v2390_v38 = vsub.f32 1.0, %v2389_v51  ;;  %v2446_v53 = vsel %vm5628_vm15, %v2445_v50, %v2441_v33  ;;  %v2630_v49 = vmul.f32 %v2431_v19, %v5099_v8  ;;  %vm2395_vm0 = vmor %vm2393_vm12, %vm2394_vm13  ;;  %vm2398_vm15 = vcmp.eq.f32.partialorder %v2397_v47, 8.507059e+37 }
 0x981   : > { %2654 = vmatpush.msrb.mxu0 %v2633_v46  ;;  %v2631_v7 = vmul.f32 %v2446_v53, %v5089_v12  ;;  %v2416_v4 = vsel %vm2413_vm14, %v2415_v16, %v2411_v59  ;;  %v2400_v12 = vor.u32 1.1754944e-38, %v2399_v25 }
 0x982   : > { %v2391_v28 = vmul.f32 %v3226_v21, %v2390_v38  ;;  %v2629_v6 = vmul.f32 %v2416_v4, %v5102_v0  ;;  %v3063_v0 = vld [vmem:[#allocation2 + $0xc3] ss:$0 sm:$0xff] }
 0x983   : > { %2655 = vmatpush.msrb.mxu0 %v2632_v48 }
 0x984   : > { %v2392_v11 = vadd.f32 %v3226_v21, %v2391_v28 }
 0x985   : > { %2656 = vmatpush.msrb.mxu0 %v2631_v7 }
 0x986   : > { %v2396_v61 = vsel %vm2395_vm0, %v3226_v21, %v2392_v11 }
 0x987   : > { %2657 = vmatpush.msrb.mxu0 %v2630_v49  ;;  %v2401_v41 = vsel %vm2398_vm15, %v2400_v12, %v2396_v61 }
 0x988   : > { %v2628_v26 = vmul.f32 %v2401_v41, %v5116_v40 }
 0x989   : > { %2658 = vmatpush.msrb.mxu0 %v2629_v6 }
 0x98b   : > { %2659 = vmatpush.msrb.mxu0 %v2628_v26 }
 0x98c   : > { %2996 = vmatmul.msk.f32.vlgmr.msrb.gmra.mxu0 %vm1999_vm8, %v3348_v36 }
 0x98d   : > { %2713 = vmatpush.msra.mxu0 %v2693_v20 }
 0x98f   : > { %2714 = vmatpush.msra.mxu0 %v2692_v37 }
 0xa09   : > { %v2661_v8 = vpop.f32.mrf.mxu0 }
 0xa0a   : > { %2997 = vmatmul.msk.f32.vlgmr.msrb.gmra.mxu3 %vm1749_vm1, %v2661_v8 }
 0xa8d   : > { %v2688_v40 = vpop.f32.mrf.mxu3 }
 0xa8e   : > { %v2689_v1 = vadd.f32 %v3063_v0, %v2688_v40 }
 0xa90   : > { %v2691_v43 = vmax.f32 %v2689_v1, 0.0 }
 0xa92   : > { %2998 = vmatmul.msk.f32.vlgmr.msra.gmra.mxu0 %vm1749_vm1, %v2691_v43 }
 0xb0f   : > { %v2716_v45 = vpop.f32.mrf.mxu0 }
 0xb10   : > { %v2717_v5 = vadd.f32 %v3064_v57, %v2716_v45 }
 0xb12   : > { %v2999_v62 = vmul.f32 -1.442695, %v2717_v5 }
 0xb14   : > { %3227 = vpow2.f32 %v2999_v62 }
 0xb1a   : > { %v3228_v36 = vpop.eup %3227 }
 0xb1b   : > { %v2722_v35 = vadd.f32 1.0, %v3228_v36 }
 0xb1d   : > { %3229 = vrcp.f32 %v2722_v35  ;;  %v2734_v22 = vand.u32 2147483648, %v2722_v35  ;;  %v2732_v34 = vand.u32 2147483647, %v2722_v35  ;;  %vm2728_vm5 = vweird.f32 %v2722_v35 }
 0xb1f   : > { %v2735_v2 = vor.u32 1.1754944e-38, %v2734_v22  ;;  %vm2733_vm8 = vcmp.eq.f32.partialorder %v2732_v34, 8.507059e+37 }
 0xb23   : > { %v3230_v63 = vpop.eup %3229 }
 0xb24   : > { %v2724_v23 = vmul.f32 %v3230_v63, %v2722_v35  ;;  %vm2729_vm1 = vweird.f32 %v3230_v63 }
 0xb25   : > { %vm2730_vm6 = vmor %vm2728_vm5, %vm2729_vm1 }
 0xb26   : > { %v2725_v3 = vsub.f32 1.0, %v2724_v23 }
 0xb28   : > { %v2726_v9 = vmul.f32 %v3230_v63, %v2725_v3 }
 0xb2a   : > { %v2727_v44 = vadd.f32 %v3230_v63, %v2726_v9 }
 0xb2c   : > { %v2731_v31 = vsel %vm2730_vm6, %v3230_v63, %v2727_v44 }
 0xb2d   : > { %v2736_v30 = vsel %vm2733_vm8, %v2735_v2, %v2731_v31 }
 0xb2e   : > { %2738 = vst [vmem:[%s197_s27] sm:$0xff] %v2736_v30 }
 0xb2f   : > { %3304 = shalt.err (!%p3301_p8)
}
 0xb30   : > { %3010 = dma.vmem_to_hbm [thread:$0]  (%p3408_p5), %s2753_s28, 128, %s2755_s29, %s2740_s16  }
 0xb31 PF: > { %p3022_p9 = scmp.ge.s32.totalorder %s3343_s15, 2  ;;  %s2766_s10 = sand.u32 1, %s3331_s12  }
 0xb32   : > { %s2767_s11 = scalar_lea.sflag [#allocation4], %s2766_s10 }
 0xb33   : > { %p3017_p10 = pnand %p3022_p9, %p3412_p6 }
 0xb35   : > { %p3018_p11 = pneg %p3017_p10 }
 0xb37   : > { %3326 = dma.done.wait (%p3018_p11), %s2767_s11, 128  }
 0xb38   : > { %3328 = vsyncadd (%p3018_p11), %s2767_s11, 4294967168  ;;  %p14_p12 = scmp.ge.s32.totalorder %s3395_s18, 4   ;;  %s5847_s12 = smov %s3335_s13 }
 0xb39   : > { %s5848_s13 = smov %s3339_s14  ;;  %s5849_s14 = smov %s3406_s21 }
 0xb3a   : > { %s5850_s15 = smov %s3395_s18  ;;  %16 = sbr.rel (!%p14_p12) target bundleno = 4 (0x4), region = 75 }
 0xb3f   :  { %2773 = vsyncpa [#allocation3], 1 }
 0xb40   :  { %2775 = vsyncpa [#allocation3 + $0x1], 1 }
 0xb41   :  { %2776 = vsyncpa [#allocation4], 1 }
 0xb42   :  { %2778 = vsyncpa [#allocation4 + $0x1], 1 }

</bundles_post_ra>
